<compile_context>
chip_gen: v6e
topology: v6e:2x2x1
jax: 0.10.0
libtpu: 0.0.40
codegen_flags: <defaults>
</compile_context>

<pallas_src>
import jax
import jax.numpy as jnp
from jax.experimental import pallas as pl
from jax.experimental.pallas import tpu as pltpu

EPS = 1e-5
D1, D2, D3 = 10, 10, 5  # layer widths


def _tree_sum(terms):
    """Pairwise-tree sum of a list of same-shaped slabs (shorter dep chain)."""
    while len(terms) > 1:
        nxt = [terms[i] + terms[i + 1] for i in range(0, len(terms) - 1, 2)]
        if len(terms) % 2:
            nxt.append(terms[-1])
        terms = nxt
    return terms[0]


def _sum_all(a):
    """Full-slab sum as a (1,1) tile: lane reduce then sublane reduce."""
    return jnp.sum(jnp.sum(a, axis=1, keepdims=True), axis=0, keepdims=True)


def _bn_relu_slab(z, gamma, beta, inv_b):
    """Training-mode BatchNorm1d + ReLU for one feature's dense (Bs,128) batch slab.

    gamma/beta are traced scalars (SMEM reads); stats stay as (1,1) vector tiles.
    """
    mu = _sum_all(z) * inv_b                         # (1,1)
    zc = z - mu
    var = _sum_all(zc * zc) * inv_b                  # biased batch variance, (1,1)
    coeff = gamma * jax.lax.rsqrt(var + EPS)         # (1,1)
    return jnp.maximum(zc * coeff + beta, 0.0)


def discriminator_kernel(
    x_ref,
    w1_ref, g1_ref, be1_ref,
    w2_ref, g2_ref, be2_ref,
    w3_ref, g3_ref, be3_ref,
    w4_ref, b4_ref,
    o_ref,
):
    x = x_ref[...]                                   # (Bs, 128): dense batch slab
    inv_b = 1.0 / float(x.shape[0] * x.shape[1])     # static Python float

    # ---- Layer 1: Linear(1,10,bias=False) + BN + ReLU (algebraically fused) ----
    mu_x = _sum_all(x) * inv_b                       # (1,1)
    xc = x - mu_x
    var_x = _sum_all(xc * xc) * inv_b                # (1,1)
    h1 = []
    for f in range(D1):
        w = w1_ref[f]                                # SMEM scalar
        inv_std = jax.lax.rsqrt(w * (w * var_x) + EPS)   # (1,1); scalar*vector only
        coeff = g1_ref[f] * (w * inv_std)                # (1,1)
        h1.append(jnp.maximum(xc * coeff + be1_ref[f], 0.0))

    # ---- Layer 2: Linear(10,10) + BN + ReLU (bias dropped: cancelled by BN) ----
    h2 = []
    for o in range(D2):
        z = _tree_sum([w2_ref[o * D1 + k] * h1[k] for k in range(D1)])
        h2.append(_bn_relu_slab(z, g2_ref[o], be2_ref[o], inv_b))

    # ---- Layer 3: Linear(10,5) + BN + ReLU (bias dropped: cancelled by BN) ----
    h3 = []
    for o in range(D3):
        z = _tree_sum([w3_ref[o * D2 + k] * h2[k] for k in range(D2)])
        h3.append(_bn_relu_slab(z, g3_ref[o], be3_ref[o], inv_b))

    # ---- Layer 4: Linear(5,1) + Sigmoid (tanh form: single EUP op, stable) ----
    z = _tree_sum([w4_ref[k] * h3[k] for k in range(D3)]) + b4_ref[0]
    o_ref[...] = 0.5 + 0.5 * jnp.tanh(0.5 * z)


def discriminator_forward(x, params):
    """x: (B, 1) float32 -> (B, 1) float32 sigmoid scores. Requires B % 128 == 0."""
    B = x.shape[0]
    assert B % 128 == 0, "batch must be a multiple of 128"
    bs = B // 128
    x_slab = x.reshape(bs, 128)                      # dense on sublanes+lanes (bs>=8)

    args = (
        x_slab,
        params["w1"].reshape(-1), params["g1"], params["be1"],
        params["w2"].reshape(-1), params["g2"], params["be2"],
        params["w3"].reshape(-1), params["g3"], params["be3"],
        params["w4"].reshape(-1), params["b4"].reshape(-1),
    )
    vmem = pl.BlockSpec(memory_space=pltpu.MemorySpace.VMEM)
    smem = pl.BlockSpec(memory_space=pltpu.MemorySpace.SMEM)
    out = pl.pallas_call(
        discriminator_kernel,
        out_shape=jax.ShapeDtypeStruct((bs, 128), jnp.float32),
        in_specs=[vmem] + [smem] * (len(args) - 1),  # x in VMEM; all params as SMEM scalars
        out_specs=vmem,
    )(*args)
    return out.reshape(B, 1)


def init_params(key):
    """Deterministic synthetic parameters (torch (out, in) weight convention)."""
    ks = jax.random.split(key, 4)

    def lin(k, fan_in, fan_out):
        bound = 1.0 / (fan_in ** 0.5)
        kw, kb = jax.random.split(k)
        w = jax.random.uniform(kw, (fan_out, fan_in), jnp.float32, -bound, bound)
        b = jax.random.uniform(kb, (fan_out,), jnp.float32, -bound, bound)
        return w, b

    w1, _ = lin(ks[0], 1, 10)          # Linear(1, 10, bias=False)
    w2, b2 = lin(ks[1], 10, 10)        # Linear(10, 10)
    w3, b3 = lin(ks[2], 10, 5)         # Linear(10, 5)
    w4, b4 = lin(ks[3], 5, 1)          # Linear(5, 1)

    return {
        "w1": w1,
        "g1": jnp.ones((10,), jnp.float32), "be1": jnp.zeros((10,), jnp.float32),
        "w2": w2, "b2": b2,             # b2/b3 kept for the reference; inert through BN
        "g2": jnp.ones((10,), jnp.float32), "be2": jnp.zeros((10,), jnp.float32),
        "w3": w3, "b3": b3,
        "g3": jnp.ones((5,), jnp.float32), "be3": jnp.zeros((5,), jnp.float32),
        "w4": w4, "b4": b4,
    }


def reference_forward(x, p):
    """Pure-JAX reference in the standard (B, F) layout (includes b2/b3, like PyTorch)."""
    def bn_relu(h, g, b):
        mu = jnp.mean(h, axis=0, keepdims=True)
        var = jnp.mean((h - mu) ** 2, axis=0, keepdims=True)
        return jnp.maximum((h - mu) / jnp.sqrt(var + EPS) * g + b, 0.0)

    h = bn_relu(x @ p["w1"].T, p["g1"], p["be1"])
    h = bn_relu(h @ p["w2"].T + p["b2"], p["g2"], p["be2"])
    h = bn_relu(h @ p["w3"].T + p["b3"], p["g3"], p["be3"])
    return jax.nn.sigmoid(h @ p["w4"].T + p["b4"])


if __name__ == "__main__":
    key = jax.random.PRNGKey(0)
    k_params, k_x = jax.random.split(key)

    B = 1024                                         # multiple of 128 -> fully dense (8,128) slab
    x = jax.random.normal(k_x, (B, 1), jnp.float32)
    params = init_params(k_params)

    out = jax.block_until_ready(discriminator_forward(x, params))

    ref = reference_forward(x, params)
    assert out.shape == (B, 1)
    assert jnp.allclose(out, ref, atol=1e-4, rtol=1e-4), (out, ref)

    print("KERNEL_OK")
</pallas_src>

<mosaic_0001>
module attributes {stable_mosaic.version = 11 : i64} {
  func.func @discriminator_kernel(%arg0: memref<8x128xf32, #tpu.memory_space<vmem>>, %arg1: memref<10xf32, #tpu.memory_space<smem>>, %arg2: memref<10xf32, #tpu.memory_space<smem>>, %arg3: memref<10xf32, #tpu.memory_space<smem>>, %arg4: memref<100xf32, #tpu.memory_space<smem>>, %arg5: memref<10xf32, #tpu.memory_space<smem>>, %arg6: memref<10xf32, #tpu.memory_space<smem>>, %arg7: memref<50xf32, #tpu.memory_space<smem>>, %arg8: memref<5xf32, #tpu.memory_space<smem>>, %arg9: memref<5xf32, #tpu.memory_space<smem>>, %arg10: memref<5xf32, #tpu.memory_space<smem>>, %arg11: memref<1xf32, #tpu.memory_space<smem>>, %arg12: memref<8x128xf32, #tpu.memory_space<vmem>>) attributes {dimension_semantics = [], scalar_prefetch = 0 : i64, scratch_operands = 0 : i64, tpu.core_type = #tpu.core_type<tc>} {
    %c0 = arith.constant 0 : index
    %c0_0 = arith.constant 0 : index
    %0 = vector.load %arg0[%c0, %c0_0] : memref<8x128xf32, #tpu.memory_space<vmem>>, vector<8x128xf32>
    %cst = arith.constant dense<0.000000e+00> : vector<8xf32>
    %1 = vector.multi_reduction <add>, %0, %cst [1] : vector<8x128xf32> to vector<8xf32>
    %2 = vector.shape_cast %1 : vector<8xf32> to vector<8x1xf32>
    %cst_1 = arith.constant dense<0.000000e+00> : vector<1xf32>
    %3 = vector.multi_reduction <add>, %2, %cst_1 [0] : vector<8x1xf32> to vector<1xf32>
    %4 = vector.shape_cast %3 : vector<1xf32> to vector<1x1xf32>
    %cst_2 = arith.constant 9.765625E-4 : f32
    %5 = vector.broadcast %cst_2 : f32 to vector<1x1xf32>
    %6 = arith.mulf %4, %5 : vector<1x1xf32>
    %7 = vector.broadcast %6 : vector<1x1xf32> to vector<8x128xf32>
    %8 = arith.subf %0, %7 : vector<8x128xf32>
    %9 = arith.mulf %8, %8 : vector<8x128xf32>
    %cst_3 = arith.constant dense<0.000000e+00> : vector<8xf32>
    %10 = vector.multi_reduction <add>, %9, %cst_3 [1] : vector<8x128xf32> to vector<8xf32>
    %11 = vector.shape_cast %10 : vector<8xf32> to vector<8x1xf32>
    %cst_4 = arith.constant dense<0.000000e+00> : vector<1xf32>
    %12 = vector.multi_reduction <add>, %11, %cst_4 [0] : vector<8x1xf32> to vector<1xf32>
    %13 = vector.shape_cast %12 : vector<1xf32> to vector<1x1xf32>
    %cst_5 = arith.constant 9.765625E-4 : f32
    %14 = vector.broadcast %cst_5 : f32 to vector<1x1xf32>
    %15 = arith.mulf %13, %14 : vector<1x1xf32>
    %c0_6 = arith.constant 0 : index
    %16 = memref.load %arg1[%c0_6] : memref<10xf32, #tpu.memory_space<smem>>
    %17 = vector.broadcast %16 : f32 to vector<1x1xf32>
    %18 = arith.mulf %17, %15 : vector<1x1xf32>
    %19 = vector.broadcast %16 : f32 to vector<1x1xf32>
    %20 = arith.mulf %19, %18 : vector<1x1xf32>
    %cst_7 = arith.constant 9.99999974E-6 : f32
    %21 = vector.broadcast %cst_7 : f32 to vector<1x1xf32>
    %22 = arith.addf %20, %21 : vector<1x1xf32>
    %23 = math.rsqrt %22 : vector<1x1xf32>
    %c0_8 = arith.constant 0 : index
    %24 = memref.load %arg2[%c0_8] : memref<10xf32, #tpu.memory_space<smem>>
    %25 = vector.broadcast %16 : f32 to vector<1x1xf32>
    %26 = arith.mulf %25, %23 : vector<1x1xf32>
    %27 = vector.broadcast %24 : f32 to vector<1x1xf32>
    %28 = arith.mulf %27, %26 : vector<1x1xf32>
    %29 = vector.broadcast %28 : vector<1x1xf32> to vector<8x128xf32>
    %30 = arith.mulf %8, %29 : vector<8x128xf32>
    %c0_9 = arith.constant 0 : index
    %31 = memref.load %arg3[%c0_9] : memref<10xf32, #tpu.memory_space<smem>>
    %32 = vector.broadcast %31 : f32 to vector<8x128xf32>
    %33 = arith.addf %30, %32 : vector<8x128xf32>
    %cst_10 = arith.constant 0.000000e+00 : f32
    %34 = vector.broadcast %cst_10 : f32 to vector<8x128xf32>
    %35 = arith.maximumf %33, %34 : vector<8x128xf32>
    %c1 = arith.constant 1 : index
    %36 = memref.load %arg1[%c1] : memref<10xf32, #tpu.memory_space<smem>>
    %37 = vector.broadcast %36 : f32 to vector<1x1xf32>
    %38 = arith.mulf %37, %15 : vector<1x1xf32>
    %39 = vector.broadcast %36 : f32 to vector<1x1xf32>
    %40 = arith.mulf %39, %38 : vector<1x1xf32>
    %cst_11 = arith.constant 9.99999974E-6 : f32
    %41 = vector.broadcast %cst_11 : f32 to vector<1x1xf32>
    %42 = arith.addf %40, %41 : vector<1x1xf32>
    %43 = math.rsqrt %42 : vector<1x1xf32>
    %c1_12 = arith.constant 1 : index
    %44 = memref.load %arg2[%c1_12] : memref<10xf32, #tpu.memory_space<smem>>
    %45 = vector.broadcast %36 : f32 to vector<1x1xf32>
    %46 = arith.mulf %45, %43 : vector<1x1xf32>
    %47 = vector.broadcast %44 : f32 to vector<1x1xf32>
    %48 = arith.mulf %47, %46 : vector<1x1xf32>
    %49 = vector.broadcast %48 : vector<1x1xf32> to vector<8x128xf32>
    %50 = arith.mulf %8, %49 : vector<8x128xf32>
    %c1_13 = arith.constant 1 : index
    %51 = memref.load %arg3[%c1_13] : memref<10xf32, #tpu.memory_space<smem>>
    %52 = vector.broadcast %51 : f32 to vector<8x128xf32>
    %53 = arith.addf %50, %52 : vector<8x128xf32>
    %cst_14 = arith.constant 0.000000e+00 : f32
    %54 = vector.broadcast %cst_14 : f32 to vector<8x128xf32>
    %55 = arith.maximumf %53, %54 : vector<8x128xf32>
    %c2 = arith.constant 2 : index
    %56 = memref.load %arg1[%c2] : memref<10xf32, #tpu.memory_space<smem>>
    %57 = vector.broadcast %56 : f32 to vector<1x1xf32>
    %58 = arith.mulf %57, %15 : vector<1x1xf32>
    %59 = vector.broadcast %56 : f32 to vector<1x1xf32>
    %60 = arith.mulf %59, %58 : vector<1x1xf32>
    %cst_15 = arith.constant 9.99999974E-6 : f32
    %61 = vector.broadcast %cst_15 : f32 to vector<1x1xf32>
    %62 = arith.addf %60, %61 : vector<1x1xf32>
    %63 = math.rsqrt %62 : vector<1x1xf32>
    %c2_16 = arith.constant 2 : index
    %64 = memref.load %arg2[%c2_16] : memref<10xf32, #tpu.memory_space<smem>>
    %65 = vector.broadcast %56 : f32 to vector<1x1xf32>
    %66 = arith.mulf %65, %63 : vector<1x1xf32>
    %67 = vector.broadcast %64 : f32 to vector<1x1xf32>
    %68 = arith.mulf %67, %66 : vector<1x1xf32>
    %69 = vector.broadcast %68 : vector<1x1xf32> to vector<8x128xf32>
    %70 = arith.mulf %8, %69 : vector<8x128xf32>
    %c2_17 = arith.constant 2 : index
    %71 = memref.load %arg3[%c2_17] : memref<10xf32, #tpu.memory_space<smem>>
    %72 = vector.broadcast %71 : f32 to vector<8x128xf32>
    %73 = arith.addf %70, %72 : vector<8x128xf32>
    %cst_18 = arith.constant 0.000000e+00 : f32
    %74 = vector.broadcast %cst_18 : f32 to vector<8x128xf32>
    %75 = arith.maximumf %73, %74 : vector<8x128xf32>
    %c3 = arith.constant 3 : index
    %76 = memref.load %arg1[%c3] : memref<10xf32, #tpu.memory_space<smem>>
    %77 = vector.broadcast %76 : f32 to vector<1x1xf32>
    %78 = arith.mulf %77, %15 : vector<1x1xf32>
    %79 = vector.broadcast %76 : f32 to vector<1x1xf32>
    %80 = arith.mulf %79, %78 : vector<1x1xf32>
    %cst_19 = arith.constant 9.99999974E-6 : f32
    %81 = vector.broadcast %cst_19 : f32 to vector<1x1xf32>
    %82 = arith.addf %80, %81 : vector<1x1xf32>
    %83 = math.rsqrt %82 : vector<1x1xf32>
    %c3_20 = arith.constant 3 : index
    %84 = memref.load %arg2[%c3_20] : memref<10xf32, #tpu.memory_space<smem>>
    %85 = vector.broadcast %76 : f32 to vector<1x1xf32>
    %86 = arith.mulf %85, %83 : vector<1x1xf32>
    %87 = vector.broadcast %84 : f32 to vector<1x1xf32>
    %88 = arith.mulf %87, %86 : vector<1x1xf32>
    %89 = vector.broadcast %88 : vector<1x1xf32> to vector<8x128xf32>
    %90 = arith.mulf %8, %89 : vector<8x128xf32>
    %c3_21 = arith.constant 3 : index
    %91 = memref.load %arg3[%c3_21] : memref<10xf32, #tpu.memory_space<smem>>
    %92 = vector.broadcast %91 : f32 to vector<8x128xf32>
    %93 = arith.addf %90, %92 : vector<8x128xf32>
    %cst_22 = arith.constant 0.000000e+00 : f32
    %94 = vector.broadcast %cst_22 : f32 to vector<8x128xf32>
    %95 = arith.maximumf %93, %94 : vector<8x128xf32>
    %c4 = arith.constant 4 : index
    %96 = memref.load %arg1[%c4] : memref<10xf32, #tpu.memory_space<smem>>
    %97 = vector.broadcast %96 : f32 to vector<1x1xf32>
    %98 = arith.mulf %97, %15 : vector<1x1xf32>
    %99 = vector.broadcast %96 : f32 to vector<1x1xf32>
    %100 = arith.mulf %99, %98 : vector<1x1xf32>
    %cst_23 = arith.constant 9.99999974E-6 : f32
    %101 = vector.broadcast %cst_23 : f32 to vector<1x1xf32>
    %102 = arith.addf %100, %101 : vector<1x1xf32>
    %103 = math.rsqrt %102 : vector<1x1xf32>
    %c4_24 = arith.constant 4 : index
    %104 = memref.load %arg2[%c4_24] : memref<10xf32, #tpu.memory_space<smem>>
    %105 = vector.broadcast %96 : f32 to vector<1x1xf32>
    %106 = arith.mulf %105, %103 : vector<1x1xf32>
    %107 = vector.broadcast %104 : f32 to vector<1x1xf32>
    %108 = arith.mulf %107, %106 : vector<1x1xf32>
    %109 = vector.broadcast %108 : vector<1x1xf32> to vector<8x128xf32>
    %110 = arith.mulf %8, %109 : vector<8x128xf32>
    %c4_25 = arith.constant 4 : index
    %111 = memref.load %arg3[%c4_25] : memref<10xf32, #tpu.memory_space<smem>>
    %112 = vector.broadcast %111 : f32 to vector<8x128xf32>
    %113 = arith.addf %110, %112 : vector<8x128xf32>
    %cst_26 = arith.constant 0.000000e+00 : f32
    %114 = vector.broadcast %cst_26 : f32 to vector<8x128xf32>
    %115 = arith.maximumf %113, %114 : vector<8x128xf32>
    %c5 = arith.constant 5 : index
    %116 = memref.load %arg1[%c5] : memref<10xf32, #tpu.memory_space<smem>>
    %117 = vector.broadcast %116 : f32 to vector<1x1xf32>
    %118 = arith.mulf %117, %15 : vector<1x1xf32>
    %119 = vector.broadcast %116 : f32 to vector<1x1xf32>
    %120 = arith.mulf %119, %118 : vector<1x1xf32>
    %cst_27 = arith.constant 9.99999974E-6 : f32
    %121 = vector.broadcast %cst_27 : f32 to vector<1x1xf32>
    %122 = arith.addf %120, %121 : vector<1x1xf32>
    %123 = math.rsqrt %122 : vector<1x1xf32>
    %c5_28 = arith.constant 5 : index
    %124 = memref.load %arg2[%c5_28] : memref<10xf32, #tpu.memory_space<smem>>
    %125 = vector.broadcast %116 : f32 to vector<1x1xf32>
    %126 = arith.mulf %125, %123 : vector<1x1xf32>
    %127 = vector.broadcast %124 : f32 to vector<1x1xf32>
    %128 = arith.mulf %127, %126 : vector<1x1xf32>
    %129 = vector.broadcast %128 : vector<1x1xf32> to vector<8x128xf32>
    %130 = arith.mulf %8, %129 : vector<8x128xf32>
    %c5_29 = arith.constant 5 : index
    %131 = memref.load %arg3[%c5_29] : memref<10xf32, #tpu.memory_space<smem>>
    %132 = vector.broadcast %131 : f32 to vector<8x128xf32>
    %133 = arith.addf %130, %132 : vector<8x128xf32>
    %cst_30 = arith.constant 0.000000e+00 : f32
    %134 = vector.broadcast %cst_30 : f32 to vector<8x128xf32>
    %135 = arith.maximumf %133, %134 : vector<8x128xf32>
    %c6 = arith.constant 6 : index
    %136 = memref.load %arg1[%c6] : memref<10xf32, #tpu.memory_space<smem>>
    %137 = vector.broadcast %136 : f32 to vector<1x1xf32>
    %138 = arith.mulf %137, %15 : vector<1x1xf32>
    %139 = vector.broadcast %136 : f32 to vector<1x1xf32>
    %140 = arith.mulf %139, %138 : vector<1x1xf32>
    %cst_31 = arith.constant 9.99999974E-6 : f32
    %141 = vector.broadcast %cst_31 : f32 to vector<1x1xf32>
    %142 = arith.addf %140, %141 : vector<1x1xf32>
    %143 = math.rsqrt %142 : vector<1x1xf32>
    %c6_32 = arith.constant 6 : index
    %144 = memref.load %arg2[%c6_32] : memref<10xf32, #tpu.memory_space<smem>>
    %145 = vector.broadcast %136 : f32 to vector<1x1xf32>
    %146 = arith.mulf %145, %143 : vector<1x1xf32>
    %147 = vector.broadcast %144 : f32 to vector<1x1xf32>
    %148 = arith.mulf %147, %146 : vector<1x1xf32>
    %149 = vector.broadcast %148 : vector<1x1xf32> to vector<8x128xf32>
    %150 = arith.mulf %8, %149 : vector<8x128xf32>
    %c6_33 = arith.constant 6 : index
    %151 = memref.load %arg3[%c6_33] : memref<10xf32, #tpu.memory_space<smem>>
    %152 = vector.broadcast %151 : f32 to vector<8x128xf32>
    %153 = arith.addf %150, %152 : vector<8x128xf32>
    %cst_34 = arith.constant 0.000000e+00 : f32
    %154 = vector.broadcast %cst_34 : f32 to vector<8x128xf32>
    %155 = arith.maximumf %153, %154 : vector<8x128xf32>
    %c7 = arith.constant 7 : index
    %156 = memref.load %arg1[%c7] : memref<10xf32, #tpu.memory_space<smem>>
    %157 = vector.broadcast %156 : f32 to vector<1x1xf32>
    %158 = arith.mulf %157, %15 : vector<1x1xf32>
    %159 = vector.broadcast %156 : f32 to vector<1x1xf32>
    %160 = arith.mulf %159, %158 : vector<1x1xf32>
    %cst_35 = arith.constant 9.99999974E-6 : f32
    %161 = vector.broadcast %cst_35 : f32 to vector<1x1xf32>
    %162 = arith.addf %160, %161 : vector<1x1xf32>
    %163 = math.rsqrt %162 : vector<1x1xf32>
    %c7_36 = arith.constant 7 : index
    %164 = memref.load %arg2[%c7_36] : memref<10xf32, #tpu.memory_space<smem>>
    %165 = vector.broadcast %156 : f32 to vector<1x1xf32>
    %166 = arith.mulf %165, %163 : vector<1x1xf32>
    %167 = vector.broadcast %164 : f32 to vector<1x1xf32>
    %168 = arith.mulf %167, %166 : vector<1x1xf32>
    %169 = vector.broadcast %168 : vector<1x1xf32> to vector<8x128xf32>
    %170 = arith.mulf %8, %169 : vector<8x128xf32>
    %c7_37 = arith.constant 7 : index
    %171 = memref.load %arg3[%c7_37] : memref<10xf32, #tpu.memory_space<smem>>
    %172 = vector.broadcast %171 : f32 to vector<8x128xf32>
    %173 = arith.addf %170, %172 : vector<8x128xf32>
    %cst_38 = arith.constant 0.000000e+00 : f32
    %174 = vector.broadcast %cst_38 : f32 to vector<8x128xf32>
    %175 = arith.maximumf %173, %174 : vector<8x128xf32>
    %c8 = arith.constant 8 : index
    %176 = memref.load %arg1[%c8] : memref<10xf32, #tpu.memory_space<smem>>
    %177 = vector.broadcast %176 : f32 to vector<1x1xf32>
    %178 = arith.mulf %177, %15 : vector<1x1xf32>
    %179 = vector.broadcast %176 : f32 to vector<1x1xf32>
    %180 = arith.mulf %179, %178 : vector<1x1xf32>
    %cst_39 = arith.constant 9.99999974E-6 : f32
    %181 = vector.broadcast %cst_39 : f32 to vector<1x1xf32>
    %182 = arith.addf %180, %181 : vector<1x1xf32>
    %183 = math.rsqrt %182 : vector<1x1xf32>
    %c8_40 = arith.constant 8 : index
    %184 = memref.load %arg2[%c8_40] : memref<10xf32, #tpu.memory_space<smem>>
    %185 = vector.broadcast %176 : f32 to vector<1x1xf32>
    %186 = arith.mulf %185, %183 : vector<1x1xf32>
    %187 = vector.broadcast %184 : f32 to vector<1x1xf32>
    %188 = arith.mulf %187, %186 : vector<1x1xf32>
    %189 = vector.broadcast %188 : vector<1x1xf32> to vector<8x128xf32>
    %190 = arith.mulf %8, %189 : vector<8x128xf32>
    %c8_41 = arith.constant 8 : index
    %191 = memref.load %arg3[%c8_41] : memref<10xf32, #tpu.memory_space<smem>>
    %192 = vector.broadcast %191 : f32 to vector<8x128xf32>
    %193 = arith.addf %190, %192 : vector<8x128xf32>
    %cst_42 = arith.constant 0.000000e+00 : f32
    %194 = vector.broadcast %cst_42 : f32 to vector<8x128xf32>
    %195 = arith.maximumf %193, %194 : vector<8x128xf32>
    %c9 = arith.constant 9 : index
    %196 = memref.load %arg1[%c9] : memref<10xf32, #tpu.memory_space<smem>>
    %197 = vector.broadcast %196 : f32 to vector<1x1xf32>
    %198 = arith.mulf %197, %15 : vector<1x1xf32>
    %199 = vector.broadcast %196 : f32 to vector<1x1xf32>
    %200 = arith.mulf %199, %198 : vector<1x1xf32>
    %cst_43 = arith.constant 9.99999974E-6 : f32
    %201 = vector.broadcast %cst_43 : f32 to vector<1x1xf32>
    %202 = arith.addf %200, %201 : vector<1x1xf32>
    %203 = math.rsqrt %202 : vector<1x1xf32>
    %c9_44 = arith.constant 9 : index
    %204 = memref.load %arg2[%c9_44] : memref<10xf32, #tpu.memory_space<smem>>
    %205 = vector.broadcast %196 : f32 to vector<1x1xf32>
    %206 = arith.mulf %205, %203 : vector<1x1xf32>
    %207 = vector.broadcast %204 : f32 to vector<1x1xf32>
    %208 = arith.mulf %207, %206 : vector<1x1xf32>
    %209 = vector.broadcast %208 : vector<1x1xf32> to vector<8x128xf32>
    %210 = arith.mulf %8, %209 : vector<8x128xf32>
    %c9_45 = arith.constant 9 : index
    %211 = memref.load %arg3[%c9_45] : memref<10xf32, #tpu.memory_space<smem>>
    %212 = vector.broadcast %211 : f32 to vector<8x128xf32>
    %213 = arith.addf %210, %212 : vector<8x128xf32>
    %cst_46 = arith.constant 0.000000e+00 : f32
    %214 = vector.broadcast %cst_46 : f32 to vector<8x128xf32>
    %215 = arith.maximumf %213, %214 : vector<8x128xf32>
    %c0_47 = arith.constant 0 : index
    %216 = memref.load %arg4[%c0_47] : memref<100xf32, #tpu.memory_space<smem>>
    %217 = vector.broadcast %216 : f32 to vector<8x128xf32>
    %218 = arith.mulf %217, %35 : vector<8x128xf32>
    %c1_48 = arith.constant 1 : index
    %219 = memref.load %arg4[%c1_48] : memref<100xf32, #tpu.memory_space<smem>>
    %220 = vector.broadcast %219 : f32 to vector<8x128xf32>
    %221 = arith.mulf %220, %55 : vector<8x128xf32>
    %c2_49 = arith.constant 2 : index
    %222 = memref.load %arg4[%c2_49] : memref<100xf32, #tpu.memory_space<smem>>
    %223 = vector.broadcast %222 : f32 to vector<8x128xf32>
    %224 = arith.mulf %223, %75 : vector<8x128xf32>
    %c3_50 = arith.constant 3 : index
    %225 = memref.load %arg4[%c3_50] : memref<100xf32, #tpu.memory_space<smem>>
    %226 = vector.broadcast %225 : f32 to vector<8x128xf32>
    %227 = arith.mulf %226, %95 : vector<8x128xf32>
    %c4_51 = arith.constant 4 : index
    %228 = memref.load %arg4[%c4_51] : memref<100xf32, #tpu.memory_space<smem>>
    %229 = vector.broadcast %228 : f32 to vector<8x128xf32>
    %230 = arith.mulf %229, %115 : vector<8x128xf32>
    %c5_52 = arith.constant 5 : index
    %231 = memref.load %arg4[%c5_52] : memref<100xf32, #tpu.memory_space<smem>>
    %232 = vector.broadcast %231 : f32 to vector<8x128xf32>
    %233 = arith.mulf %232, %135 : vector<8x128xf32>
    %c6_53 = arith.constant 6 : index
    %234 = memref.load %arg4[%c6_53] : memref<100xf32, #tpu.memory_space<smem>>
    %235 = vector.broadcast %234 : f32 to vector<8x128xf32>
    %236 = arith.mulf %235, %155 : vector<8x128xf32>
    %c7_54 = arith.constant 7 : index
    %237 = memref.load %arg4[%c7_54] : memref<100xf32, #tpu.memory_space<smem>>
    %238 = vector.broadcast %237 : f32 to vector<8x128xf32>
    %239 = arith.mulf %238, %175 : vector<8x128xf32>
    %c8_55 = arith.constant 8 : index
    %240 = memref.load %arg4[%c8_55] : memref<100xf32, #tpu.memory_space<smem>>
    %241 = vector.broadcast %240 : f32 to vector<8x128xf32>
    %242 = arith.mulf %241, %195 : vector<8x128xf32>
    %c9_56 = arith.constant 9 : index
    %243 = memref.load %arg4[%c9_56] : memref<100xf32, #tpu.memory_space<smem>>
    %244 = vector.broadcast %243 : f32 to vector<8x128xf32>
    %245 = arith.mulf %244, %215 : vector<8x128xf32>
    %246 = arith.addf %218, %221 : vector<8x128xf32>
    %247 = arith.addf %224, %227 : vector<8x128xf32>
    %248 = arith.addf %230, %233 : vector<8x128xf32>
    %249 = arith.addf %236, %239 : vector<8x128xf32>
    %250 = arith.addf %242, %245 : vector<8x128xf32>
    %251 = arith.addf %246, %247 : vector<8x128xf32>
    %252 = arith.addf %248, %249 : vector<8x128xf32>
    %253 = arith.addf %251, %252 : vector<8x128xf32>
    %254 = arith.addf %253, %250 : vector<8x128xf32>
    %c0_57 = arith.constant 0 : index
    %255 = memref.load %arg5[%c0_57] : memref<10xf32, #tpu.memory_space<smem>>
    %c0_58 = arith.constant 0 : index
    %256 = memref.load %arg6[%c0_58] : memref<10xf32, #tpu.memory_space<smem>>
    %cst_59 = arith.constant dense<0.000000e+00> : vector<8xf32>
    %257 = vector.multi_reduction <add>, %254, %cst_59 [1] : vector<8x128xf32> to vector<8xf32>
    %258 = vector.shape_cast %257 : vector<8xf32> to vector<8x1xf32>
    %cst_60 = arith.constant dense<0.000000e+00> : vector<1xf32>
    %259 = vector.multi_reduction <add>, %258, %cst_60 [0] : vector<8x1xf32> to vector<1xf32>
    %260 = vector.shape_cast %259 : vector<1xf32> to vector<1x1xf32>
    %cst_61 = arith.constant 9.765625E-4 : f32
    %261 = vector.broadcast %cst_61 : f32 to vector<1x1xf32>
    %262 = arith.mulf %260, %261 : vector<1x1xf32>
    %263 = vector.broadcast %262 : vector<1x1xf32> to vector<8x128xf32>
    %264 = arith.subf %254, %263 : vector<8x128xf32>
    %265 = arith.mulf %264, %264 : vector<8x128xf32>
    %cst_62 = arith.constant dense<0.000000e+00> : vector<8xf32>
    %266 = vector.multi_reduction <add>, %265, %cst_62 [1] : vector<8x128xf32> to vector<8xf32>
    %267 = vector.shape_cast %266 : vector<8xf32> to vector<8x1xf32>
    %cst_63 = arith.constant dense<0.000000e+00> : vector<1xf32>
    %268 = vector.multi_reduction <add>, %267, %cst_63 [0] : vector<8x1xf32> to vector<1xf32>
    %269 = vector.shape_cast %268 : vector<1xf32> to vector<1x1xf32>
    %cst_64 = arith.constant 9.765625E-4 : f32
    %270 = vector.broadcast %cst_64 : f32 to vector<1x1xf32>
    %271 = arith.mulf %269, %270 : vector<1x1xf32>
    %cst_65 = arith.constant 9.99999974E-6 : f32
    %272 = vector.broadcast %cst_65 : f32 to vector<1x1xf32>
    %273 = arith.addf %271, %272 : vector<1x1xf32>
    %274 = math.rsqrt %273 : vector<1x1xf32>
    %275 = vector.broadcast %255 : f32 to vector<1x1xf32>
    %276 = arith.mulf %275, %274 : vector<1x1xf32>
    %277 = vector.broadcast %276 : vector<1x1xf32> to vector<8x128xf32>
    %278 = arith.mulf %264, %277 : vector<8x128xf32>
    %279 = vector.broadcast %256 : f32 to vector<8x128xf32>
    %280 = arith.addf %278, %279 : vector<8x128xf32>
    %cst_66 = arith.constant 0.000000e+00 : f32
    %281 = vector.broadcast %cst_66 : f32 to vector<8x128xf32>
    %282 = arith.maximumf %280, %281 : vector<8x128xf32>
    %c10 = arith.constant 10 : index
    %283 = memref.load %arg4[%c10] : memref<100xf32, #tpu.memory_space<smem>>
    %284 = vector.broadcast %283 : f32 to vector<8x128xf32>
    %285 = arith.mulf %284, %35 : vector<8x128xf32>
    %c11 = arith.constant 11 : index
    %286 = memref.load %arg4[%c11] : memref<100xf32, #tpu.memory_space<smem>>
    %287 = vector.broadcast %286 : f32 to vector<8x128xf32>
    %288 = arith.mulf %287, %55 : vector<8x128xf32>
    %c12 = arith.constant 12 : index
    %289 = memref.load %arg4[%c12] : memref<100xf32, #tpu.memory_space<smem>>
    %290 = vector.broadcast %289 : f32 to vector<8x128xf32>
    %291 = arith.mulf %290, %75 : vector<8x128xf32>
    %c13 = arith.constant 13 : index
    %292 = memref.load %arg4[%c13] : memref<100xf32, #tpu.memory_space<smem>>
    %293 = vector.broadcast %292 : f32 to vector<8x128xf32>
    %294 = arith.mulf %293, %95 : vector<8x128xf32>
    %c14 = arith.constant 14 : index
    %295 = memref.load %arg4[%c14] : memref<100xf32, #tpu.memory_space<smem>>
    %296 = vector.broadcast %295 : f32 to vector<8x128xf32>
    %297 = arith.mulf %296, %115 : vector<8x128xf32>
    %c15 = arith.constant 15 : index
    %298 = memref.load %arg4[%c15] : memref<100xf32, #tpu.memory_space<smem>>
    %299 = vector.broadcast %298 : f32 to vector<8x128xf32>
    %300 = arith.mulf %299, %135 : vector<8x128xf32>
    %c16 = arith.constant 16 : index
    %301 = memref.load %arg4[%c16] : memref<100xf32, #tpu.memory_space<smem>>
    %302 = vector.broadcast %301 : f32 to vector<8x128xf32>
    %303 = arith.mulf %302, %155 : vector<8x128xf32>
    %c17 = arith.constant 17 : index
    %304 = memref.load %arg4[%c17] : memref<100xf32, #tpu.memory_space<smem>>
    %305 = vector.broadcast %304 : f32 to vector<8x128xf32>
    %306 = arith.mulf %305, %175 : vector<8x128xf32>
    %c18 = arith.constant 18 : index
    %307 = memref.load %arg4[%c18] : memref<100xf32, #tpu.memory_space<smem>>
    %308 = vector.broadcast %307 : f32 to vector<8x128xf32>
    %309 = arith.mulf %308, %195 : vector<8x128xf32>
    %c19 = arith.constant 19 : index
    %310 = memref.load %arg4[%c19] : memref<100xf32, #tpu.memory_space<smem>>
    %311 = vector.broadcast %310 : f32 to vector<8x128xf32>
    %312 = arith.mulf %311, %215 : vector<8x128xf32>
    %313 = arith.addf %285, %288 : vector<8x128xf32>
    %314 = arith.addf %291, %294 : vector<8x128xf32>
    %315 = arith.addf %297, %300 : vector<8x128xf32>
    %316 = arith.addf %303, %306 : vector<8x128xf32>
    %317 = arith.addf %309, %312 : vector<8x128xf32>
    %318 = arith.addf %313, %314 : vector<8x128xf32>
    %319 = arith.addf %315, %316 : vector<8x128xf32>
    %320 = arith.addf %318, %319 : vector<8x128xf32>
    %321 = arith.addf %320, %317 : vector<8x128xf32>
    %c1_67 = arith.constant 1 : index
    %322 = memref.load %arg5[%c1_67] : memref<10xf32, #tpu.memory_space<smem>>
    %c1_68 = arith.constant 1 : index
    %323 = memref.load %arg6[%c1_68] : memref<10xf32, #tpu.memory_space<smem>>
    %cst_69 = arith.constant dense<0.000000e+00> : vector<8xf32>
    %324 = vector.multi_reduction <add>, %321, %cst_69 [1] : vector<8x128xf32> to vector<8xf32>
    %325 = vector.shape_cast %324 : vector<8xf32> to vector<8x1xf32>
    %cst_70 = arith.constant dense<0.000000e+00> : vector<1xf32>
    %326 = vector.multi_reduction <add>, %325, %cst_70 [0] : vector<8x1xf32> to vector<1xf32>
    %327 = vector.shape_cast %326 : vector<1xf32> to vector<1x1xf32>
    %cst_71 = arith.constant 9.765625E-4 : f32
    %328 = vector.broadcast %cst_71 : f32 to vector<1x1xf32>
    %329 = arith.mulf %327, %328 : vector<1x1xf32>
    %330 = vector.broadcast %329 : vector<1x1xf32> to vector<8x128xf32>
    %331 = arith.subf %321, %330 : vector<8x128xf32>
    %332 = arith.mulf %331, %331 : vector<8x128xf32>
    %cst_72 = arith.constant dense<0.000000e+00> : vector<8xf32>
    %333 = vector.multi_reduction <add>, %332, %cst_72 [1] : vector<8x128xf32> to vector<8xf32>
    %334 = vector.shape_cast %333 : vector<8xf32> to vector<8x1xf32>
    %cst_73 = arith.constant dense<0.000000e+00> : vector<1xf32>
    %335 = vector.multi_reduction <add>, %334, %cst_73 [0] : vector<8x1xf32> to vector<1xf32>
    %336 = vector.shape_cast %335 : vector<1xf32> to vector<1x1xf32>
    %cst_74 = arith.constant 9.765625E-4 : f32
    %337 = vector.broadcast %cst_74 : f32 to vector<1x1xf32>
    %338 = arith.mulf %336, %337 : vector<1x1xf32>
    %cst_75 = arith.constant 9.99999974E-6 : f32
    %339 = vector.broadcast %cst_75 : f32 to vector<1x1xf32>
    %340 = arith.addf %338, %339 : vector<1x1xf32>
    %341 = math.rsqrt %340 : vector<1x1xf32>
    %342 = vector.broadcast %322 : f32 to vector<1x1xf32>
    %343 = arith.mulf %342, %341 : vector<1x1xf32>
    %344 = vector.broadcast %343 : vector<1x1xf32> to vector<8x128xf32>
    %345 = arith.mulf %331, %344 : vector<8x128xf32>
    %346 = vector.broadcast %323 : f32 to vector<8x128xf32>
    %347 = arith.addf %345, %346 : vector<8x128xf32>
    %cst_76 = arith.constant 0.000000e+00 : f32
    %348 = vector.broadcast %cst_76 : f32 to vector<8x128xf32>
    %349 = arith.maximumf %347, %348 : vector<8x128xf32>
    %c20 = arith.constant 20 : index
    %350 = memref.load %arg4[%c20] : memref<100xf32, #tpu.memory_space<smem>>
    %351 = vector.broadcast %350 : f32 to vector<8x128xf32>
    %352 = arith.mulf %351, %35 : vector<8x128xf32>
    %c21 = arith.constant 21 : index
    %353 = memref.load %arg4[%c21] : memref<100xf32, #tpu.memory_space<smem>>
    %354 = vector.broadcast %353 : f32 to vector<8x128xf32>
    %355 = arith.mulf %354, %55 : vector<8x128xf32>
    %c22 = arith.constant 22 : index
    %356 = memref.load %arg4[%c22] : memref<100xf32, #tpu.memory_space<smem>>
    %357 = vector.broadcast %356 : f32 to vector<8x128xf32>
    %358 = arith.mulf %357, %75 : vector<8x128xf32>
    %c23 = arith.constant 23 : index
    %359 = memref.load %arg4[%c23] : memref<100xf32, #tpu.memory_space<smem>>
    %360 = vector.broadcast %359 : f32 to vector<8x128xf32>
    %361 = arith.mulf %360, %95 : vector<8x128xf32>
    %c24 = arith.constant 24 : index
    %362 = memref.load %arg4[%c24] : memref<100xf32, #tpu.memory_space<smem>>
    %363 = vector.broadcast %362 : f32 to vector<8x128xf32>
    %364 = arith.mulf %363, %115 : vector<8x128xf32>
    %c25 = arith.constant 25 : index
    %365 = memref.load %arg4[%c25] : memref<100xf32, #tpu.memory_space<smem>>
    %366 = vector.broadcast %365 : f32 to vector<8x128xf32>
    %367 = arith.mulf %366, %135 : vector<8x128xf32>
    %c26 = arith.constant 26 : index
    %368 = memref.load %arg4[%c26] : memref<100xf32, #tpu.memory_space<smem>>
    %369 = vector.broadcast %368 : f32 to vector<8x128xf32>
    %370 = arith.mulf %369, %155 : vector<8x128xf32>
    %c27 = arith.constant 27 : index
    %371 = memref.load %arg4[%c27] : memref<100xf32, #tpu.memory_space<smem>>
    %372 = vector.broadcast %371 : f32 to vector<8x128xf32>
    %373 = arith.mulf %372, %175 : vector<8x128xf32>
    %c28 = arith.constant 28 : index
    %374 = memref.load %arg4[%c28] : memref<100xf32, #tpu.memory_space<smem>>
    %375 = vector.broadcast %374 : f32 to vector<8x128xf32>
    %376 = arith.mulf %375, %195 : vector<8x128xf32>
    %c29 = arith.constant 29 : index
    %377 = memref.load %arg4[%c29] : memref<100xf32, #tpu.memory_space<smem>>
    %378 = vector.broadcast %377 : f32 to vector<8x128xf32>
    %379 = arith.mulf %378, %215 : vector<8x128xf32>
    %380 = arith.addf %352, %355 : vector<8x128xf32>
    %381 = arith.addf %358, %361 : vector<8x128xf32>
    %382 = arith.addf %364, %367 : vector<8x128xf32>
    %383 = arith.addf %370, %373 : vector<8x128xf32>
    %384 = arith.addf %376, %379 : vector<8x128xf32>
    %385 = arith.addf %380, %381 : vector<8x128xf32>
    %386 = arith.addf %382, %383 : vector<8x128xf32>
    %387 = arith.addf %385, %386 : vector<8x128xf32>
    %388 = arith.addf %387, %384 : vector<8x128xf32>
    %c2_77 = arith.constant 2 : index
    %389 = memref.load %arg5[%c2_77] : memref<10xf32, #tpu.memory_space<smem>>
    %c2_78 = arith.constant 2 : index
    %390 = memref.load %arg6[%c2_78] : memref<10xf32, #tpu.memory_space<smem>>
    %cst_79 = arith.constant dense<0.000000e+00> : vector<8xf32>
    %391 = vector.multi_reduction <add>, %388, %cst_79 [1] : vector<8x128xf32> to vector<8xf32>
    %392 = vector.shape_cast %391 : vector<8xf32> to vector<8x1xf32>
    %cst_80 = arith.constant dense<0.000000e+00> : vector<1xf32>
    %393 = vector.multi_reduction <add>, %392, %cst_80 [0] : vector<8x1xf32> to vector<1xf32>
    %394 = vector.shape_cast %393 : vector<1xf32> to vector<1x1xf32>
    %cst_81 = arith.constant 9.765625E-4 : f32
    %395 = vector.broadcast %cst_81 : f32 to vector<1x1xf32>
    %396 = arith.mulf %394, %395 : vector<1x1xf32>
    %397 = vector.broadcast %396 : vector<1x1xf32> to vector<8x128xf32>
    %398 = arith.subf %388, %397 : vector<8x128xf32>
    %399 = arith.mulf %398, %398 : vector<8x128xf32>
    %cst_82 = arith.constant dense<0.000000e+00> : vector<8xf32>
    %400 = vector.multi_reduction <add>, %399, %cst_82 [1] : vector<8x128xf32> to vector<8xf32>
    %401 = vector.shape_cast %400 : vector<8xf32> to vector<8x1xf32>
    %cst_83 = arith.constant dense<0.000000e+00> : vector<1xf32>
    %402 = vector.multi_reduction <add>, %401, %cst_83 [0] : vector<8x1xf32> to vector<1xf32>
    %403 = vector.shape_cast %402 : vector<1xf32> to vector<1x1xf32>
    %cst_84 = arith.constant 9.765625E-4 : f32
    %404 = vector.broadcast %cst_84 : f32 to vector<1x1xf32>
    %405 = arith.mulf %403, %404 : vector<1x1xf32>
    %cst_85 = arith.constant 9.99999974E-6 : f32
    %406 = vector.broadcast %cst_85 : f32 to vector<1x1xf32>
    %407 = arith.addf %405, %406 : vector<1x1xf32>
    %408 = math.rsqrt %407 : vector<1x1xf32>
    %409 = vector.broadcast %389 : f32 to vector<1x1xf32>
    %410 = arith.mulf %409, %408 : vector<1x1xf32>
    %411 = vector.broadcast %410 : vector<1x1xf32> to vector<8x128xf32>
    %412 = arith.mulf %398, %411 : vector<8x128xf32>
    %413 = vector.broadcast %390 : f32 to vector<8x128xf32>
    %414 = arith.addf %412, %413 : vector<8x128xf32>
    %cst_86 = arith.constant 0.000000e+00 : f32
    %415 = vector.broadcast %cst_86 : f32 to vector<8x128xf32>
    %416 = arith.maximumf %414, %415 : vector<8x128xf32>
    %c30 = arith.constant 30 : index
    %417 = memref.load %arg4[%c30] : memref<100xf32, #tpu.memory_space<smem>>
    %418 = vector.broadcast %417 : f32 to vector<8x128xf32>
    %419 = arith.mulf %418, %35 : vector<8x128xf32>
    %c31 = arith.constant 31 : index
    %420 = memref.load %arg4[%c31] : memref<100xf32, #tpu.memory_space<smem>>
    %421 = vector.broadcast %420 : f32 to vector<8x128xf32>
    %422 = arith.mulf %421, %55 : vector<8x128xf32>
    %c32 = arith.constant 32 : index
    %423 = memref.load %arg4[%c32] : memref<100xf32, #tpu.memory_space<smem>>
    %424 = vector.broadcast %423 : f32 to vector<8x128xf32>
    %425 = arith.mulf %424, %75 : vector<8x128xf32>
    %c33 = arith.constant 33 : index
    %426 = memref.load %arg4[%c33] : memref<100xf32, #tpu.memory_space<smem>>
    %427 = vector.broadcast %426 : f32 to vector<8x128xf32>
    %428 = arith.mulf %427, %95 : vector<8x128xf32>
    %c34 = arith.constant 34 : index
    %429 = memref.load %arg4[%c34] : memref<100xf32, #tpu.memory_space<smem>>
    %430 = vector.broadcast %429 : f32 to vector<8x128xf32>
    %431 = arith.mulf %430, %115 : vector<8x128xf32>
    %c35 = arith.constant 35 : index
    %432 = memref.load %arg4[%c35] : memref<100xf32, #tpu.memory_space<smem>>
    %433 = vector.broadcast %432 : f32 to vector<8x128xf32>
    %434 = arith.mulf %433, %135 : vector<8x128xf32>
    %c36 = arith.constant 36 : index
    %435 = memref.load %arg4[%c36] : memref<100xf32, #tpu.memory_space<smem>>
    %436 = vector.broadcast %435 : f32 to vector<8x128xf32>
    %437 = arith.mulf %436, %155 : vector<8x128xf32>
    %c37 = arith.constant 37 : index
    %438 = memref.load %arg4[%c37] : memref<100xf32, #tpu.memory_space<smem>>
    %439 = vector.broadcast %438 : f32 to vector<8x128xf32>
    %440 = arith.mulf %439, %175 : vector<8x128xf32>
    %c38 = arith.constant 38 : index
    %441 = memref.load %arg4[%c38] : memref<100xf32, #tpu.memory_space<smem>>
    %442 = vector.broadcast %441 : f32 to vector<8x128xf32>
    %443 = arith.mulf %442, %195 : vector<8x128xf32>
    %c39 = arith.constant 39 : index
    %444 = memref.load %arg4[%c39] : memref<100xf32, #tpu.memory_space<smem>>
    %445 = vector.broadcast %444 : f32 to vector<8x128xf32>
    %446 = arith.mulf %445, %215 : vector<8x128xf32>
    %447 = arith.addf %419, %422 : vector<8x128xf32>
    %448 = arith.addf %425, %428 : vector<8x128xf32>
    %449 = arith.addf %431, %434 : vector<8x128xf32>
    %450 = arith.addf %437, %440 : vector<8x128xf32>
    %451 = arith.addf %443, %446 : vector<8x128xf32>
    %452 = arith.addf %447, %448 : vector<8x128xf32>
    %453 = arith.addf %449, %450 : vector<8x128xf32>
    %454 = arith.addf %452, %453 : vector<8x128xf32>
    %455 = arith.addf %454, %451 : vector<8x128xf32>
    %c3_87 = arith.constant 3 : index
    %456 = memref.load %arg5[%c3_87] : memref<10xf32, #tpu.memory_space<smem>>
    %c3_88 = arith.constant 3 : index
    %457 = memref.load %arg6[%c3_88] : memref<10xf32, #tpu.memory_space<smem>>
    %cst_89 = arith.constant dense<0.000000e+00> : vector<8xf32>
    %458 = vector.multi_reduction <add>, %455, %cst_89 [1] : vector<8x128xf32> to vector<8xf32>
    %459 = vector.shape_cast %458 : vector<8xf32> to vector<8x1xf32>
    %cst_90 = arith.constant dense<0.000000e+00> : vector<1xf32>
    %460 = vector.multi_reduction <add>, %459, %cst_90 [0] : vector<8x1xf32> to vector<1xf32>
    %461 = vector.shape_cast %460 : vector<1xf32> to vector<1x1xf32>
    %cst_91 = arith.constant 9.765625E-4 : f32
    %462 = vector.broadcast %cst_91 : f32 to vector<1x1xf32>
    %463 = arith.mulf %461, %462 : vector<1x1xf32>
    %464 = vector.broadcast %463 : vector<1x1xf32> to vector<8x128xf32>
    %465 = arith.subf %455, %464 : vector<8x128xf32>
    %466 = arith.mulf %465, %465 : vector<8x128xf32>
    %cst_92 = arith.constant dense<0.000000e+00> : vector<8xf32>
    %467 = vector.multi_reduction <add>, %466, %cst_92 [1] : vector<8x128xf32> to vector<8xf32>
    %468 = vector.shape_cast %467 : vector<8xf32> to vector<8x1xf32>
    %cst_93 = arith.constant dense<0.000000e+00> : vector<1xf32>
    %469 = vector.multi_reduction <add>, %468, %cst_93 [0] : vector<8x1xf32> to vector<1xf32>
    %470 = vector.shape_cast %469 : vector<1xf32> to vector<1x1xf32>
    %cst_94 = arith.constant 9.765625E-4 : f32
    %471 = vector.broadcast %cst_94 : f32 to vector<1x1xf32>
    %472 = arith.mulf %470, %471 : vector<1x1xf32>
    %cst_95 = arith.constant 9.99999974E-6 : f32
    %473 = vector.broadcast %cst_95 : f32 to vector<1x1xf32>
    %474 = arith.addf %472, %473 : vector<1x1xf32>
    %475 = math.rsqrt %474 : vector<1x1xf32>
    %476 = vector.broadcast %456 : f32 to vector<1x1xf32>
    %477 = arith.mulf %476, %475 : vector<1x1xf32>
    %478 = vector.broadcast %477 : vector<1x1xf32> to vector<8x128xf32>
    %479 = arith.mulf %465, %478 : vector<8x128xf32>
    %480 = vector.broadcast %457 : f32 to vector<8x128xf32>
    %481 = arith.addf %479, %480 : vector<8x128xf32>
    %cst_96 = arith.constant 0.000000e+00 : f32
    %482 = vector.broadcast %cst_96 : f32 to vector<8x128xf32>
    %483 = arith.maximumf %481, %482 : vector<8x128xf32>
    %c40 = arith.constant 40 : index
    %484 = memref.load %arg4[%c40] : memref<100xf32, #tpu.memory_space<smem>>
    %485 = vector.broadcast %484 : f32 to vector<8x128xf32>
    %486 = arith.mulf %485, %35 : vector<8x128xf32>
    %c41 = arith.constant 41 : index
    %487 = memref.load %arg4[%c41] : memref<100xf32, #tpu.memory_space<smem>>
    %488 = vector.broadcast %487 : f32 to vector<8x128xf32>
    %489 = arith.mulf %488, %55 : vector<8x128xf32>
    %c42 = arith.constant 42 : index
    %490 = memref.load %arg4[%c42] : memref<100xf32, #tpu.memory_space<smem>>
    %491 = vector.broadcast %490 : f32 to vector<8x128xf32>
    %492 = arith.mulf %491, %75 : vector<8x128xf32>
    %c43 = arith.constant 43 : index
    %493 = memref.load %arg4[%c43] : memref<100xf32, #tpu.memory_space<smem>>
    %494 = vector.broadcast %493 : f32 to vector<8x128xf32>
    %495 = arith.mulf %494, %95 : vector<8x128xf32>
    %c44 = arith.constant 44 : index
    %496 = memref.load %arg4[%c44] : memref<100xf32, #tpu.memory_space<smem>>
    %497 = vector.broadcast %496 : f32 to vector<8x128xf32>
    %498 = arith.mulf %497, %115 : vector<8x128xf32>
    %c45 = arith.constant 45 : index
    %499 = memref.load %arg4[%c45] : memref<100xf32, #tpu.memory_space<smem>>
    %500 = vector.broadcast %499 : f32 to vector<8x128xf32>
    %501 = arith.mulf %500, %135 : vector<8x128xf32>
    %c46 = arith.constant 46 : index
    %502 = memref.load %arg4[%c46] : memref<100xf32, #tpu.memory_space<smem>>
    %503 = vector.broadcast %502 : f32 to vector<8x128xf32>
    %504 = arith.mulf %503, %155 : vector<8x128xf32>
    %c47 = arith.constant 47 : index
    %505 = memref.load %arg4[%c47] : memref<100xf32, #tpu.memory_space<smem>>
    %506 = vector.broadcast %505 : f32 to vector<8x128xf32>
    %507 = arith.mulf %506, %175 : vector<8x128xf32>
    %c48 = arith.constant 48 : index
    %508 = memref.load %arg4[%c48] : memref<100xf32, #tpu.memory_space<smem>>
    %509 = vector.broadcast %508 : f32 to vector<8x128xf32>
    %510 = arith.mulf %509, %195 : vector<8x128xf32>
    %c49 = arith.constant 49 : index
    %511 = memref.load %arg4[%c49] : memref<100xf32, #tpu.memory_space<smem>>
    %512 = vector.broadcast %511 : f32 to vector<8x128xf32>
    %513 = arith.mulf %512, %215 : vector<8x128xf32>
    %514 = arith.addf %486, %489 : vector<8x128xf32>
    %515 = arith.addf %492, %495 : vector<8x128xf32>
    %516 = arith.addf %498, %501 : vector<8x128xf32>
    %517 = arith.addf %504, %507 : vector<8x128xf32>
    %518 = arith.addf %510, %513 : vector<8x128xf32>
    %519 = arith.addf %514, %515 : vector<8x128xf32>
    %520 = arith.addf %516, %517 : vector<8x128xf32>
    %521 = arith.addf %519, %520 : vector<8x128xf32>
    %522 = arith.addf %521, %518 : vector<8x128xf32>
    %c4_97 = arith.constant 4 : index
    %523 = memref.load %arg5[%c4_97] : memref<10xf32, #tpu.memory_space<smem>>
    %c4_98 = arith.constant 4 : index
    %524 = memref.load %arg6[%c4_98] : memref<10xf32, #tpu.memory_space<smem>>
    %cst_99 = arith.constant dense<0.000000e+00> : vector<8xf32>
    %525 = vector.multi_reduction <add>, %522, %cst_99 [1] : vector<8x128xf32> to vector<8xf32>
    %526 = vector.shape_cast %525 : vector<8xf32> to vector<8x1xf32>
    %cst_100 = arith.constant dense<0.000000e+00> : vector<1xf32>
    %527 = vector.multi_reduction <add>, %526, %cst_100 [0] : vector<8x1xf32> to vector<1xf32>
    %528 = vector.shape_cast %527 : vector<1xf32> to vector<1x1xf32>
    %cst_101 = arith.constant 9.765625E-4 : f32
    %529 = vector.broadcast %cst_101 : f32 to vector<1x1xf32>
    %530 = arith.mulf %528, %529 : vector<1x1xf32>
    %531 = vector.broadcast %530 : vector<1x1xf32> to vector<8x128xf32>
    %532 = arith.subf %522, %531 : vector<8x128xf32>
    %533 = arith.mulf %532, %532 : vector<8x128xf32>
    %cst_102 = arith.constant dense<0.000000e+00> : vector<8xf32>
    %534 = vector.multi_reduction <add>, %533, %cst_102 [1] : vector<8x128xf32> to vector<8xf32>
    %535 = vector.shape_cast %534 : vector<8xf32> to vector<8x1xf32>
    %cst_103 = arith.constant dense<0.000000e+00> : vector<1xf32>
    %536 = vector.multi_reduction <add>, %535, %cst_103 [0] : vector<8x1xf32> to vector<1xf32>
    %537 = vector.shape_cast %536 : vector<1xf32> to vector<1x1xf32>
    %cst_104 = arith.constant 9.765625E-4 : f32
    %538 = vector.broadcast %cst_104 : f32 to vector<1x1xf32>
    %539 = arith.mulf %537, %538 : vector<1x1xf32>
    %cst_105 = arith.constant 9.99999974E-6 : f32
    %540 = vector.broadcast %cst_105 : f32 to vector<1x1xf32>
    %541 = arith.addf %539, %540 : vector<1x1xf32>
    %542 = math.rsqrt %541 : vector<1x1xf32>
    %543 = vector.broadcast %523 : f32 to vector<1x1xf32>
    %544 = arith.mulf %543, %542 : vector<1x1xf32>
    %545 = vector.broadcast %544 : vector<1x1xf32> to vector<8x128xf32>
    %546 = arith.mulf %532, %545 : vector<8x128xf32>
    %547 = vector.broadcast %524 : f32 to vector<8x128xf32>
    %548 = arith.addf %546, %547 : vector<8x128xf32>
    %cst_106 = arith.constant 0.000000e+00 : f32
    %549 = vector.broadcast %cst_106 : f32 to vector<8x128xf32>
    %550 = arith.maximumf %548, %549 : vector<8x128xf32>
    %c50 = arith.constant 50 : index
    %551 = memref.load %arg4[%c50] : memref<100xf32, #tpu.memory_space<smem>>
    %552 = vector.broadcast %551 : f32 to vector<8x128xf32>
    %553 = arith.mulf %552, %35 : vector<8x128xf32>
    %c51 = arith.constant 51 : index
    %554 = memref.load %arg4[%c51] : memref<100xf32, #tpu.memory_space<smem>>
    %555 = vector.broadcast %554 : f32 to vector<8x128xf32>
    %556 = arith.mulf %555, %55 : vector<8x128xf32>
    %c52 = arith.constant 52 : index
    %557 = memref.load %arg4[%c52] : memref<100xf32, #tpu.memory_space<smem>>
    %558 = vector.broadcast %557 : f32 to vector<8x128xf32>
    %559 = arith.mulf %558, %75 : vector<8x128xf32>
    %c53 = arith.constant 53 : index
    %560 = memref.load %arg4[%c53] : memref<100xf32, #tpu.memory_space<smem>>
    %561 = vector.broadcast %560 : f32 to vector<8x128xf32>
    %562 = arith.mulf %561, %95 : vector<8x128xf32>
    %c54 = arith.constant 54 : index
    %563 = memref.load %arg4[%c54] : memref<100xf32, #tpu.memory_space<smem>>
    %564 = vector.broadcast %563 : f32 to vector<8x128xf32>
    %565 = arith.mulf %564, %115 : vector<8x128xf32>
    %c55 = arith.constant 55 : index
    %566 = memref.load %arg4[%c55] : memref<100xf32, #tpu.memory_space<smem>>
    %567 = vector.broadcast %566 : f32 to vector<8x128xf32>
    %568 = arith.mulf %567, %135 : vector<8x128xf32>
    %c56 = arith.constant 56 : index
    %569 = memref.load %arg4[%c56] : memref<100xf32, #tpu.memory_space<smem>>
    %570 = vector.broadcast %569 : f32 to vector<8x128xf32>
    %571 = arith.mulf %570, %155 : vector<8x128xf32>
    %c57 = arith.constant 57 : index
    %572 = memref.load %arg4[%c57] : memref<100xf32, #tpu.memory_space<smem>>
    %573 = vector.broadcast %572 : f32 to vector<8x128xf32>
    %574 = arith.mulf %573, %175 : vector<8x128xf32>
    %c58 = arith.constant 58 : index
    %575 = memref.load %arg4[%c58] : memref<100xf32, #tpu.memory_space<smem>>
    %576 = vector.broadcast %575 : f32 to vector<8x128xf32>
    %577 = arith.mulf %576, %195 : vector<8x128xf32>
    %c59 = arith.constant 59 : index
    %578 = memref.load %arg4[%c59] : memref<100xf32, #tpu.memory_space<smem>>
    %579 = vector.broadcast %578 : f32 to vector<8x128xf32>
    %580 = arith.mulf %579, %215 : vector<8x128xf32>
    %581 = arith.addf %553, %556 : vector<8x128xf32>
    %582 = arith.addf %559, %562 : vector<8x128xf32>
    %583 = arith.addf %565, %568 : vector<8x128xf32>
    %584 = arith.addf %571, %574 : vector<8x128xf32>
    %585 = arith.addf %577, %580 : vector<8x128xf32>
    %586 = arith.addf %581, %582 : vector<8x128xf32>
    %587 = arith.addf %583, %584 : vector<8x128xf32>
    %588 = arith.addf %586, %587 : vector<8x128xf32>
    %589 = arith.addf %588, %585 : vector<8x128xf32>
    %c5_107 = arith.constant 5 : index
    %590 = memref.load %arg5[%c5_107] : memref<10xf32, #tpu.memory_space<smem>>
    %c5_108 = arith.constant 5 : index
    %591 = memref.load %arg6[%c5_108] : memref<10xf32, #tpu.memory_space<smem>>
    %cst_109 = arith.constant dense<0.000000e+00> : vector<8xf32>
    %592 = vector.multi_reduction <add>, %589, %cst_109 [1] : vector<8x128xf32> to vector<8xf32>
    %593 = vector.shape_cast %592 : vector<8xf32> to vector<8x1xf32>
    %cst_110 = arith.constant dense<0.000000e+00> : vector<1xf32>
    %594 = vector.multi_reduction <add>, %593, %cst_110 [0] : vector<8x1xf32> to vector<1xf32>
    %595 = vector.shape_cast %594 : vector<1xf32> to vector<1x1xf32>
    %cst_111 = arith.constant 9.765625E-4 : f32
    %596 = vector.broadcast %cst_111 : f32 to vector<1x1xf32>
    %597 = arith.mulf %595, %596 : vector<1x1xf32>
    %598 = vector.broadcast %597 : vector<1x1xf32> to vector<8x128xf32>
    %599 = arith.subf %589, %598 : vector<8x128xf32>
    %600 = arith.mulf %599, %599 : vector<8x128xf32>
    %cst_112 = arith.constant dense<0.000000e+00> : vector<8xf32>
    %601 = vector.multi_reduction <add>, %600, %cst_112 [1] : vector<8x128xf32> to vector<8xf32>
    %602 = vector.shape_cast %601 : vector<8xf32> to vector<8x1xf32>
    %cst_113 = arith.constant dense<0.000000e+00> : vector<1xf32>
    %603 = vector.multi_reduction <add>, %602, %cst_113 [0] : vector<8x1xf32> to vector<1xf32>
    %604 = vector.shape_cast %603 : vector<1xf32> to vector<1x1xf32>
    %cst_114 = arith.constant 9.765625E-4 : f32
    %605 = vector.broadcast %cst_114 : f32 to vector<1x1xf32>
    %606 = arith.mulf %604, %605 : vector<1x1xf32>
    %cst_115 = arith.constant 9.99999974E-6 : f32
    %607 = vector.broadcast %cst_115 : f32 to vector<1x1xf32>
    %608 = arith.addf %606, %607 : vector<1x1xf32>
    %609 = math.rsqrt %608 : vector<1x1xf32>
    %610 = vector.broadcast %590 : f32 to vector<1x1xf32>
    %611 = arith.mulf %610, %609 : vector<1x1xf32>
    %612 = vector.broadcast %611 : vector<1x1xf32> to vector<8x128xf32>
    %613 = arith.mulf %599, %612 : vector<8x128xf32>
    %614 = vector.broadcast %591 : f32 to vector<8x128xf32>
    %615 = arith.addf %613, %614 : vector<8x128xf32>
    %cst_116 = arith.constant 0.000000e+00 : f32
    %616 = vector.broadcast %cst_116 : f32 to vector<8x128xf32>
    %617 = arith.maximumf %615, %616 : vector<8x128xf32>
    %c60 = arith.constant 60 : index
    %618 = memref.load %arg4[%c60] : memref<100xf32, #tpu.memory_space<smem>>
    %619 = vector.broadcast %618 : f32 to vector<8x128xf32>
    %620 = arith.mulf %619, %35 : vector<8x128xf32>
    %c61 = arith.constant 61 : index
    %621 = memref.load %arg4[%c61] : memref<100xf32, #tpu.memory_space<smem>>
    %622 = vector.broadcast %621 : f32 to vector<8x128xf32>
    %623 = arith.mulf %622, %55 : vector<8x128xf32>
    %c62 = arith.constant 62 : index
    %624 = memref.load %arg4[%c62] : memref<100xf32, #tpu.memory_space<smem>>
    %625 = vector.broadcast %624 : f32 to vector<8x128xf32>
    %626 = arith.mulf %625, %75 : vector<8x128xf32>
    %c63 = arith.constant 63 : index
    %627 = memref.load %arg4[%c63] : memref<100xf32, #tpu.memory_space<smem>>
    %628 = vector.broadcast %627 : f32 to vector<8x128xf32>
    %629 = arith.mulf %628, %95 : vector<8x128xf32>
    %c64 = arith.constant 64 : index
    %630 = memref.load %arg4[%c64] : memref<100xf32, #tpu.memory_space<smem>>
    %631 = vector.broadcast %630 : f32 to vector<8x128xf32>
    %632 = arith.mulf %631, %115 : vector<8x128xf32>
    %c65 = arith.constant 65 : index
    %633 = memref.load %arg4[%c65] : memref<100xf32, #tpu.memory_space<smem>>
    %634 = vector.broadcast %633 : f32 to vector<8x128xf32>
    %635 = arith.mulf %634, %135 : vector<8x128xf32>
    %c66 = arith.constant 66 : index
    %636 = memref.load %arg4[%c66] : memref<100xf32, #tpu.memory_space<smem>>
    %637 = vector.broadcast %636 : f32 to vector<8x128xf32>
    %638 = arith.mulf %637, %155 : vector<8x128xf32>
    %c67 = arith.constant 67 : index
    %639 = memref.load %arg4[%c67] : memref<100xf32, #tpu.memory_space<smem>>
    %640 = vector.broadcast %639 : f32 to vector<8x128xf32>
    %641 = arith.mulf %640, %175 : vector<8x128xf32>
    %c68 = arith.constant 68 : index
    %642 = memref.load %arg4[%c68] : memref<100xf32, #tpu.memory_space<smem>>
    %643 = vector.broadcast %642 : f32 to vector<8x128xf32>
    %644 = arith.mulf %643, %195 : vector<8x128xf32>
    %c69 = arith.constant 69 : index
    %645 = memref.load %arg4[%c69] : memref<100xf32, #tpu.memory_space<smem>>
    %646 = vector.broadcast %645 : f32 to vector<8x128xf32>
    %647 = arith.mulf %646, %215 : vector<8x128xf32>
    %648 = arith.addf %620, %623 : vector<8x128xf32>
    %649 = arith.addf %626, %629 : vector<8x128xf32>
    %650 = arith.addf %632, %635 : vector<8x128xf32>
    %651 = arith.addf %638, %641 : vector<8x128xf32>
    %652 = arith.addf %644, %647 : vector<8x128xf32>
    %653 = arith.addf %648, %649 : vector<8x128xf32>
    %654 = arith.addf %650, %651 : vector<8x128xf32>
    %655 = arith.addf %653, %654 : vector<8x128xf32>
    %656 = arith.addf %655, %652 : vector<8x128xf32>
    %c6_117 = arith.constant 6 : index
    %657 = memref.load %arg5[%c6_117] : memref<10xf32, #tpu.memory_space<smem>>
    %c6_118 = arith.constant 6 : index
    %658 = memref.load %arg6[%c6_118] : memref<10xf32, #tpu.memory_space<smem>>
    %cst_119 = arith.constant dense<0.000000e+00> : vector<8xf32>
    %659 = vector.multi_reduction <add>, %656, %cst_119 [1] : vector<8x128xf32> to vector<8xf32>
    %660 = vector.shape_cast %659 : vector<8xf32> to vector<8x1xf32>
    %cst_120 = arith.constant dense<0.000000e+00> : vector<1xf32>
    %661 = vector.multi_reduction <add>, %660, %cst_120 [0] : vector<8x1xf32> to vector<1xf32>
    %662 = vector.shape_cast %661 : vector<1xf32> to vector<1x1xf32>
    %cst_121 = arith.constant 9.765625E-4 : f32
    %663 = vector.broadcast %cst_121 : f32 to vector<1x1xf32>
    %664 = arith.mulf %662, %663 : vector<1x1xf32>
    %665 = vector.broadcast %664 : vector<1x1xf32> to vector<8x128xf32>
    %666 = arith.subf %656, %665 : vector<8x128xf32>
    %667 = arith.mulf %666, %666 : vector<8x128xf32>
    %cst_122 = arith.constant dense<0.000000e+00> : vector<8xf32>
    %668 = vector.multi_reduction <add>, %667, %cst_122 [1] : vector<8x128xf32> to vector<8xf32>
    %669 = vector.shape_cast %668 : vector<8xf32> to vector<8x1xf32>
    %cst_123 = arith.constant dense<0.000000e+00> : vector<1xf32>
    %670 = vector.multi_reduction <add>, %669, %cst_123 [0] : vector<8x1xf32> to vector<1xf32>
    %671 = vector.shape_cast %670 : vector<1xf32> to vector<1x1xf32>
    %cst_124 = arith.constant 9.765625E-4 : f32
    %672 = vector.broadcast %cst_124 : f32 to vector<1x1xf32>
    %673 = arith.mulf %671, %672 : vector<1x1xf32>
    %cst_125 = arith.constant 9.99999974E-6 : f32
    %674 = vector.broadcast %cst_125 : f32 to vector<1x1xf32>
    %675 = arith.addf %673, %674 : vector<1x1xf32>
    %676 = math.rsqrt %675 : vector<1x1xf32>
    %677 = vector.broadcast %657 : f32 to vector<1x1xf32>
    %678 = arith.mulf %677, %676 : vector<1x1xf32>
    %679 = vector.broadcast %678 : vector<1x1xf32> to vector<8x128xf32>
    %680 = arith.mulf %666, %679 : vector<8x128xf32>
    %681 = vector.broadcast %658 : f32 to vector<8x128xf32>
    %682 = arith.addf %680, %681 : vector<8x128xf32>
    %cst_126 = arith.constant 0.000000e+00 : f32
    %683 = vector.broadcast %cst_126 : f32 to vector<8x128xf32>
    %684 = arith.maximumf %682, %683 : vector<8x128xf32>
    %c70 = arith.constant 70 : index
    %685 = memref.load %arg4[%c70] : memref<100xf32, #tpu.memory_space<smem>>
    %686 = vector.broadcast %685 : f32 to vector<8x128xf32>
    %687 = arith.mulf %686, %35 : vector<8x128xf32>
    %c71 = arith.constant 71 : index
    %688 = memref.load %arg4[%c71] : memref<100xf32, #tpu.memory_space<smem>>
    %689 = vector.broadcast %688 : f32 to vector<8x128xf32>
    %690 = arith.mulf %689, %55 : vector<8x128xf32>
    %c72 = arith.constant 72 : index
    %691 = memref.load %arg4[%c72] : memref<100xf32, #tpu.memory_space<smem>>
    %692 = vector.broadcast %691 : f32 to vector<8x128xf32>
    %693 = arith.mulf %692, %75 : vector<8x128xf32>
    %c73 = arith.constant 73 : index
    %694 = memref.load %arg4[%c73] : memref<100xf32, #tpu.memory_space<smem>>
    %695 = vector.broadcast %694 : f32 to vector<8x128xf32>
    %696 = arith.mulf %695, %95 : vector<8x128xf32>
    %c74 = arith.constant 74 : index
    %697 = memref.load %arg4[%c74] : memref<100xf32, #tpu.memory_space<smem>>
    %698 = vector.broadcast %697 : f32 to vector<8x128xf32>
    %699 = arith.mulf %698, %115 : vector<8x128xf32>
    %c75 = arith.constant 75 : index
    %700 = memref.load %arg4[%c75] : memref<100xf32, #tpu.memory_space<smem>>
    %701 = vector.broadcast %700 : f32 to vector<8x128xf32>
    %702 = arith.mulf %701, %135 : vector<8x128xf32>
    %c76 = arith.constant 76 : index
    %703 = memref.load %arg4[%c76] : memref<100xf32, #tpu.memory_space<smem>>
    %704 = vector.broadcast %703 : f32 to vector<8x128xf32>
    %705 = arith.mulf %704, %155 : vector<8x128xf32>
    %c77 = arith.constant 77 : index
    %706 = memref.load %arg4[%c77] : memref<100xf32, #tpu.memory_space<smem>>
    %707 = vector.broadcast %706 : f32 to vector<8x128xf32>
    %708 = arith.mulf %707, %175 : vector<8x128xf32>
    %c78 = arith.constant 78 : index
    %709 = memref.load %arg4[%c78] : memref<100xf32, #tpu.memory_space<smem>>
    %710 = vector.broadcast %709 : f32 to vector<8x128xf32>
    %711 = arith.mulf %710, %195 : vector<8x128xf32>
    %c79 = arith.constant 79 : index
    %712 = memref.load %arg4[%c79] : memref<100xf32, #tpu.memory_space<smem>>
    %713 = vector.broadcast %712 : f32 to vector<8x128xf32>
    %714 = arith.mulf %713, %215 : vector<8x128xf32>
    %715 = arith.addf %687, %690 : vector<8x128xf32>
    %716 = arith.addf %693, %696 : vector<8x128xf32>
    %717 = arith.addf %699, %702 : vector<8x128xf32>
    %718 = arith.addf %705, %708 : vector<8x128xf32>
    %719 = arith.addf %711, %714 : vector<8x128xf32>
    %720 = arith.addf %715, %716 : vector<8x128xf32>
    %721 = arith.addf %717, %718 : vector<8x128xf32>
    %722 = arith.addf %720, %721 : vector<8x128xf32>
    %723 = arith.addf %722, %719 : vector<8x128xf32>
    %c7_127 = arith.constant 7 : index
    %724 = memref.load %arg5[%c7_127] : memref<10xf32, #tpu.memory_space<smem>>
    %c7_128 = arith.constant 7 : index
    %725 = memref.load %arg6[%c7_128] : memref<10xf32, #tpu.memory_space<smem>>
    %cst_129 = arith.constant dense<0.000000e+00> : vector<8xf32>
    %726 = vector.multi_reduction <add>, %723, %cst_129 [1] : vector<8x128xf32> to vector<8xf32>
    %727 = vector.shape_cast %726 : vector<8xf32> to vector<8x1xf32>
    %cst_130 = arith.constant dense<0.000000e+00> : vector<1xf32>
    %728 = vector.multi_reduction <add>, %727, %cst_130 [0] : vector<8x1xf32> to vector<1xf32>
    %729 = vector.shape_cast %728 : vector<1xf32> to vector<1x1xf32>
    %cst_131 = arith.constant 9.765625E-4 : f32
    %730 = vector.broadcast %cst_131 : f32 to vector<1x1xf32>
    %731 = arith.mulf %729, %730 : vector<1x1xf32>
    %732 = vector.broadcast %731 : vector<1x1xf32> to vector<8x128xf32>
    %733 = arith.subf %723, %732 : vector<8x128xf32>
    %734 = arith.mulf %733, %733 : vector<8x128xf32>
    %cst_132 = arith.constant dense<0.000000e+00> : vector<8xf32>
    %735 = vector.multi_reduction <add>, %734, %cst_132 [1] : vector<8x128xf32> to vector<8xf32>
    %736 = vector.shape_cast %735 : vector<8xf32> to vector<8x1xf32>
    %cst_133 = arith.constant dense<0.000000e+00> : vector<1xf32>
    %737 = vector.multi_reduction <add>, %736, %cst_133 [0] : vector<8x1xf32> to vector<1xf32>
    %738 = vector.shape_cast %737 : vector<1xf32> to vector<1x1xf32>
    %cst_134 = arith.constant 9.765625E-4 : f32
    %739 = vector.broadcast %cst_134 : f32 to vector<1x1xf32>
    %740 = arith.mulf %738, %739 : vector<1x1xf32>
    %cst_135 = arith.constant 9.99999974E-6 : f32
    %741 = vector.broadcast %cst_135 : f32 to vector<1x1xf32>
    %742 = arith.addf %740, %741 : vector<1x1xf32>
    %743 = math.rsqrt %742 : vector<1x1xf32>
    %744 = vector.broadcast %724 : f32 to vector<1x1xf32>
    %745 = arith.mulf %744, %743 : vector<1x1xf32>
    %746 = vector.broadcast %745 : vector<1x1xf32> to vector<8x128xf32>
    %747 = arith.mulf %733, %746 : vector<8x128xf32>
    %748 = vector.broadcast %725 : f32 to vector<8x128xf32>
    %749 = arith.addf %747, %748 : vector<8x128xf32>
    %cst_136 = arith.constant 0.000000e+00 : f32
    %750 = vector.broadcast %cst_136 : f32 to vector<8x128xf32>
    %751 = arith.maximumf %749, %750 : vector<8x128xf32>
    %c80 = arith.constant 80 : index
    %752 = memref.load %arg4[%c80] : memref<100xf32, #tpu.memory_space<smem>>
    %753 = vector.broadcast %752 : f32 to vector<8x128xf32>
    %754 = arith.mulf %753, %35 : vector<8x128xf32>
    %c81 = arith.constant 81 : index
    %755 = memref.load %arg4[%c81] : memref<100xf32, #tpu.memory_space<smem>>
    %756 = vector.broadcast %755 : f32 to vector<8x128xf32>
    %757 = arith.mulf %756, %55 : vector<8x128xf32>
    %c82 = arith.constant 82 : index
    %758 = memref.load %arg4[%c82] : memref<100xf32, #tpu.memory_space<smem>>
    %759 = vector.broadcast %758 : f32 to vector<8x128xf32>
    %760 = arith.mulf %759, %75 : vector<8x128xf32>
    %c83 = arith.constant 83 : index
    %761 = memref.load %arg4[%c83] : memref<100xf32, #tpu.memory_space<smem>>
    %762 = vector.broadcast %761 : f32 to vector<8x128xf32>
    %763 = arith.mulf %762, %95 : vector<8x128xf32>
    %c84 = arith.constant 84 : index
    %764 = memref.load %arg4[%c84] : memref<100xf32, #tpu.memory_space<smem>>
    %765 = vector.broadcast %764 : f32 to vector<8x128xf32>
    %766 = arith.mulf %765, %115 : vector<8x128xf32>
    %c85 = arith.constant 85 : index
    %767 = memref.load %arg4[%c85] : memref<100xf32, #tpu.memory_space<smem>>
    %768 = vector.broadcast %767 : f32 to vector<8x128xf32>
    %769 = arith.mulf %768, %135 : vector<8x128xf32>
    %c86 = arith.constant 86 : index
    %770 = memref.load %arg4[%c86] : memref<100xf32, #tpu.memory_space<smem>>
    %771 = vector.broadcast %770 : f32 to vector<8x128xf32>
    %772 = arith.mulf %771, %155 : vector<8x128xf32>
    %c87 = arith.constant 87 : index
    %773 = memref.load %arg4[%c87] : memref<100xf32, #tpu.memory_space<smem>>
    %774 = vector.broadcast %773 : f32 to vector<8x128xf32>
    %775 = arith.mulf %774, %175 : vector<8x128xf32>
    %c88 = arith.constant 88 : index
    %776 = memref.load %arg4[%c88] : memref<100xf32, #tpu.memory_space<smem>>
    %777 = vector.broadcast %776 : f32 to vector<8x128xf32>
    %778 = arith.mulf %777, %195 : vector<8x128xf32>
    %c89 = arith.constant 89 : index
    %779 = memref.load %arg4[%c89] : memref<100xf32, #tpu.memory_space<smem>>
    %780 = vector.broadcast %779 : f32 to vector<8x128xf32>
    %781 = arith.mulf %780, %215 : vector<8x128xf32>
    %782 = arith.addf %754, %757 : vector<8x128xf32>
    %783 = arith.addf %760, %763 : vector<8x128xf32>
    %784 = arith.addf %766, %769 : vector<8x128xf32>
    %785 = arith.addf %772, %775 : vector<8x128xf32>
    %786 = arith.addf %778, %781 : vector<8x128xf32>
    %787 = arith.addf %782, %783 : vector<8x128xf32>
    %788 = arith.addf %784, %785 : vector<8x128xf32>
    %789 = arith.addf %787, %788 : vector<8x128xf32>
    %790 = arith.addf %789, %786 : vector<8x128xf32>
    %c8_137 = arith.constant 8 : index
    %791 = memref.load %arg5[%c8_137] : memref<10xf32, #tpu.memory_space<smem>>
    %c8_138 = arith.constant 8 : index
    %792 = memref.load %arg6[%c8_138] : memref<10xf32, #tpu.memory_space<smem>>
    %cst_139 = arith.constant dense<0.000000e+00> : vector<8xf32>
    %793 = vector.multi_reduction <add>, %790, %cst_139 [1] : vector<8x128xf32> to vector<8xf32>
    %794 = vector.shape_cast %793 : vector<8xf32> to vector<8x1xf32>
    %cst_140 = arith.constant dense<0.000000e+00> : vector<1xf32>
    %795 = vector.multi_reduction <add>, %794, %cst_140 [0] : vector<8x1xf32> to vector<1xf32>
    %796 = vector.shape_cast %795 : vector<1xf32> to vector<1x1xf32>
    %cst_141 = arith.constant 9.765625E-4 : f32
    %797 = vector.broadcast %cst_141 : f32 to vector<1x1xf32>
    %798 = arith.mulf %796, %797 : vector<1x1xf32>
    %799 = vector.broadcast %798 : vector<1x1xf32> to vector<8x128xf32>
    %800 = arith.subf %790, %799 : vector<8x128xf32>
    %801 = arith.mulf %800, %800 : vector<8x128xf32>
    %cst_142 = arith.constant dense<0.000000e+00> : vector<8xf32>
    %802 = vector.multi_reduction <add>, %801, %cst_142 [1] : vector<8x128xf32> to vector<8xf32>
    %803 = vector.shape_cast %802 : vector<8xf32> to vector<8x1xf32>
    %cst_143 = arith.constant dense<0.000000e+00> : vector<1xf32>
    %804 = vector.multi_reduction <add>, %803, %cst_143 [0] : vector<8x1xf32> to vector<1xf32>
    %805 = vector.shape_cast %804 : vector<1xf32> to vector<1x1xf32>
    %cst_144 = arith.constant 9.765625E-4 : f32
    %806 = vector.broadcast %cst_144 : f32 to vector<1x1xf32>
    %807 = arith.mulf %805, %806 : vector<1x1xf32>
    %cst_145 = arith.constant 9.99999974E-6 : f32
    %808 = vector.broadcast %cst_145 : f32 to vector<1x1xf32>
    %809 = arith.addf %807, %808 : vector<1x1xf32>
    %810 = math.rsqrt %809 : vector<1x1xf32>
    %811 = vector.broadcast %791 : f32 to vector<1x1xf32>
    %812 = arith.mulf %811, %810 : vector<1x1xf32>
    %813 = vector.broadcast %812 : vector<1x1xf32> to vector<8x128xf32>
    %814 = arith.mulf %800, %813 : vector<8x128xf32>
    %815 = vector.broadcast %792 : f32 to vector<8x128xf32>
    %816 = arith.addf %814, %815 : vector<8x128xf32>
    %cst_146 = arith.constant 0.000000e+00 : f32
    %817 = vector.broadcast %cst_146 : f32 to vector<8x128xf32>
    %818 = arith.maximumf %816, %817 : vector<8x128xf32>
    %c90 = arith.constant 90 : index
    %819 = memref.load %arg4[%c90] : memref<100xf32, #tpu.memory_space<smem>>
    %820 = vector.broadcast %819 : f32 to vector<8x128xf32>
    %821 = arith.mulf %820, %35 : vector<8x128xf32>
    %c91 = arith.constant 91 : index
    %822 = memref.load %arg4[%c91] : memref<100xf32, #tpu.memory_space<smem>>
    %823 = vector.broadcast %822 : f32 to vector<8x128xf32>
    %824 = arith.mulf %823, %55 : vector<8x128xf32>
    %c92 = arith.constant 92 : index
    %825 = memref.load %arg4[%c92] : memref<100xf32, #tpu.memory_space<smem>>
    %826 = vector.broadcast %825 : f32 to vector<8x128xf32>
    %827 = arith.mulf %826, %75 : vector<8x128xf32>
    %c93 = arith.constant 93 : index
    %828 = memref.load %arg4[%c93] : memref<100xf32, #tpu.memory_space<smem>>
    %829 = vector.broadcast %828 : f32 to vector<8x128xf32>
    %830 = arith.mulf %829, %95 : vector<8x128xf32>
    %c94 = arith.constant 94 : index
    %831 = memref.load %arg4[%c94] : memref<100xf32, #tpu.memory_space<smem>>
    %832 = vector.broadcast %831 : f32 to vector<8x128xf32>
    %833 = arith.mulf %832, %115 : vector<8x128xf32>
    %c95 = arith.constant 95 : index
    %834 = memref.load %arg4[%c95] : memref<100xf32, #tpu.memory_space<smem>>
    %835 = vector.broadcast %834 : f32 to vector<8x128xf32>
    %836 = arith.mulf %835, %135 : vector<8x128xf32>
    %c96 = arith.constant 96 : index
    %837 = memref.load %arg4[%c96] : memref<100xf32, #tpu.memory_space<smem>>
    %838 = vector.broadcast %837 : f32 to vector<8x128xf32>
    %839 = arith.mulf %838, %155 : vector<8x128xf32>
    %c97 = arith.constant 97 : index
    %840 = memref.load %arg4[%c97] : memref<100xf32, #tpu.memory_space<smem>>
    %841 = vector.broadcast %840 : f32 to vector<8x128xf32>
    %842 = arith.mulf %841, %175 : vector<8x128xf32>
    %c98 = arith.constant 98 : index
    %843 = memref.load %arg4[%c98] : memref<100xf32, #tpu.memory_space<smem>>
    %844 = vector.broadcast %843 : f32 to vector<8x128xf32>
    %845 = arith.mulf %844, %195 : vector<8x128xf32>
    %c99 = arith.constant 99 : index
    %846 = memref.load %arg4[%c99] : memref<100xf32, #tpu.memory_space<smem>>
    %847 = vector.broadcast %846 : f32 to vector<8x128xf32>
    %848 = arith.mulf %847, %215 : vector<8x128xf32>
    %849 = arith.addf %821, %824 : vector<8x128xf32>
    %850 = arith.addf %827, %830 : vector<8x128xf32>
    %851 = arith.addf %833, %836 : vector<8x128xf32>
    %852 = arith.addf %839, %842 : vector<8x128xf32>
    %853 = arith.addf %845, %848 : vector<8x128xf32>
    %854 = arith.addf %849, %850 : vector<8x128xf32>
    %855 = arith.addf %851, %852 : vector<8x128xf32>
    %856 = arith.addf %854, %855 : vector<8x128xf32>
    %857 = arith.addf %856, %853 : vector<8x128xf32>
    %c9_147 = arith.constant 9 : index
    %858 = memref.load %arg5[%c9_147] : memref<10xf32, #tpu.memory_space<smem>>
    %c9_148 = arith.constant 9 : index
    %859 = memref.load %arg6[%c9_148] : memref<10xf32, #tpu.memory_space<smem>>
    %cst_149 = arith.constant dense<0.000000e+00> : vector<8xf32>
    %860 = vector.multi_reduction <add>, %857, %cst_149 [1] : vector<8x128xf32> to vector<8xf32>
    %861 = vector.shape_cast %860 : vector<8xf32> to vector<8x1xf32>
    %cst_150 = arith.constant dense<0.000000e+00> : vector<1xf32>
    %862 = vector.multi_reduction <add>, %861, %cst_150 [0] : vector<8x1xf32> to vector<1xf32>
    %863 = vector.shape_cast %862 : vector<1xf32> to vector<1x1xf32>
    %cst_151 = arith.constant 9.765625E-4 : f32
    %864 = vector.broadcast %cst_151 : f32 to vector<1x1xf32>
    %865 = arith.mulf %863, %864 : vector<1x1xf32>
    %866 = vector.broadcast %865 : vector<1x1xf32> to vector<8x128xf32>
    %867 = arith.subf %857, %866 : vector<8x128xf32>
    %868 = arith.mulf %867, %867 : vector<8x128xf32>
    %cst_152 = arith.constant dense<0.000000e+00> : vector<8xf32>
    %869 = vector.multi_reduction <add>, %868, %cst_152 [1] : vector<8x128xf32> to vector<8xf32>
    %870 = vector.shape_cast %869 : vector<8xf32> to vector<8x1xf32>
    %cst_153 = arith.constant dense<0.000000e+00> : vector<1xf32>
    %871 = vector.multi_reduction <add>, %870, %cst_153 [0] : vector<8x1xf32> to vector<1xf32>
    %872 = vector.shape_cast %871 : vector<1xf32> to vector<1x1xf32>
    %cst_154 = arith.constant 9.765625E-4 : f32
    %873 = vector.broadcast %cst_154 : f32 to vector<1x1xf32>
    %874 = arith.mulf %872, %873 : vector<1x1xf32>
    %cst_155 = arith.constant 9.99999974E-6 : f32
    %875 = vector.broadcast %cst_155 : f32 to vector<1x1xf32>
    %876 = arith.addf %874, %875 : vector<1x1xf32>
    %877 = math.rsqrt %876 : vector<1x1xf32>
    %878 = vector.broadcast %858 : f32 to vector<1x1xf32>
    %879 = arith.mulf %878, %877 : vector<1x1xf32>
    %880 = vector.broadcast %879 : vector<1x1xf32> to vector<8x128xf32>
    %881 = arith.mulf %867, %880 : vector<8x128xf32>
    %882 = vector.broadcast %859 : f32 to vector<8x128xf32>
    %883 = arith.addf %881, %882 : vector<8x128xf32>
    %cst_156 = arith.constant 0.000000e+00 : f32
    %884 = vector.broadcast %cst_156 : f32 to vector<8x128xf32>
    %885 = arith.maximumf %883, %884 : vector<8x128xf32>
    %c0_157 = arith.constant 0 : index
    %886 = memref.load %arg7[%c0_157] : memref<50xf32, #tpu.memory_space<smem>>
    %887 = vector.broadcast %886 : f32 to vector<8x128xf32>
    %888 = arith.mulf %887, %282 : vector<8x128xf32>
    %c1_158 = arith.constant 1 : index
    %889 = memref.load %arg7[%c1_158] : memref<50xf32, #tpu.memory_space<smem>>
    %890 = vector.broadcast %889 : f32 to vector<8x128xf32>
    %891 = arith.mulf %890, %349 : vector<8x128xf32>
    %c2_159 = arith.constant 2 : index
    %892 = memref.load %arg7[%c2_159] : memref<50xf32, #tpu.memory_space<smem>>
    %893 = vector.broadcast %892 : f32 to vector<8x128xf32>
    %894 = arith.mulf %893, %416 : vector<8x128xf32>
    %c3_160 = arith.constant 3 : index
    %895 = memref.load %arg7[%c3_160] : memref<50xf32, #tpu.memory_space<smem>>
    %896 = vector.broadcast %895 : f32 to vector<8x128xf32>
    %897 = arith.mulf %896, %483 : vector<8x128xf32>
    %c4_161 = arith.constant 4 : index
    %898 = memref.load %arg7[%c4_161] : memref<50xf32, #tpu.memory_space<smem>>
    %899 = vector.broadcast %898 : f32 to vector<8x128xf32>
    %900 = arith.mulf %899, %550 : vector<8x128xf32>
    %c5_162 = arith.constant 5 : index
    %901 = memref.load %arg7[%c5_162] : memref<50xf32, #tpu.memory_space<smem>>
    %902 = vector.broadcast %901 : f32 to vector<8x128xf32>
    %903 = arith.mulf %902, %617 : vector<8x128xf32>
    %c6_163 = arith.constant 6 : index
    %904 = memref.load %arg7[%c6_163] : memref<50xf32, #tpu.memory_space<smem>>
    %905 = vector.broadcast %904 : f32 to vector<8x128xf32>
    %906 = arith.mulf %905, %684 : vector<8x128xf32>
    %c7_164 = arith.constant 7 : index
    %907 = memref.load %arg7[%c7_164] : memref<50xf32, #tpu.memory_space<smem>>
    %908 = vector.broadcast %907 : f32 to vector<8x128xf32>
    %909 = arith.mulf %908, %751 : vector<8x128xf32>
    %c8_165 = arith.constant 8 : index
    %910 = memref.load %arg7[%c8_165] : memref<50xf32, #tpu.memory_space<smem>>
    %911 = vector.broadcast %910 : f32 to vector<8x128xf32>
    %912 = arith.mulf %911, %818 : vector<8x128xf32>
    %c9_166 = arith.constant 9 : index
    %913 = memref.load %arg7[%c9_166] : memref<50xf32, #tpu.memory_space<smem>>
    %914 = vector.broadcast %913 : f32 to vector<8x128xf32>
    %915 = arith.mulf %914, %885 : vector<8x128xf32>
    %916 = arith.addf %888, %891 : vector<8x128xf32>
    %917 = arith.addf %894, %897 : vector<8x128xf32>
    %918 = arith.addf %900, %903 : vector<8x128xf32>
    %919 = arith.addf %906, %909 : vector<8x128xf32>
    %920 = arith.addf %912, %915 : vector<8x128xf32>
    %921 = arith.addf %916, %917 : vector<8x128xf32>
    %922 = arith.addf %918, %919 : vector<8x128xf32>
    %923 = arith.addf %921, %922 : vector<8x128xf32>
    %924 = arith.addf %923, %920 : vector<8x128xf32>
    %c0_167 = arith.constant 0 : index
    %925 = memref.load %arg8[%c0_167] : memref<5xf32, #tpu.memory_space<smem>>
    %c0_168 = arith.constant 0 : index
    %926 = memref.load %arg9[%c0_168] : memref<5xf32, #tpu.memory_space<smem>>
    %cst_169 = arith.constant dense<0.000000e+00> : vector<8xf32>
    %927 = vector.multi_reduction <add>, %924, %cst_169 [1] : vector<8x128xf32> to vector<8xf32>
    %928 = vector.shape_cast %927 : vector<8xf32> to vector<8x1xf32>
    %cst_170 = arith.constant dense<0.000000e+00> : vector<1xf32>
    %929 = vector.multi_reduction <add>, %928, %cst_170 [0] : vector<8x1xf32> to vector<1xf32>
    %930 = vector.shape_cast %929 : vector<1xf32> to vector<1x1xf32>
    %cst_171 = arith.constant 9.765625E-4 : f32
    %931 = vector.broadcast %cst_171 : f32 to vector<1x1xf32>
    %932 = arith.mulf %930, %931 : vector<1x1xf32>
    %933 = vector.broadcast %932 : vector<1x1xf32> to vector<8x128xf32>
    %934 = arith.subf %924, %933 : vector<8x128xf32>
    %935 = arith.mulf %934, %934 : vector<8x128xf32>
    %cst_172 = arith.constant dense<0.000000e+00> : vector<8xf32>
    %936 = vector.multi_reduction <add>, %935, %cst_172 [1] : vector<8x128xf32> to vector<8xf32>
    %937 = vector.shape_cast %936 : vector<8xf32> to vector<8x1xf32>
    %cst_173 = arith.constant dense<0.000000e+00> : vector<1xf32>
    %938 = vector.multi_reduction <add>, %937, %cst_173 [0] : vector<8x1xf32> to vector<1xf32>
    %939 = vector.shape_cast %938 : vector<1xf32> to vector<1x1xf32>
    %cst_174 = arith.constant 9.765625E-4 : f32
    %940 = vector.broadcast %cst_174 : f32 to vector<1x1xf32>
    %941 = arith.mulf %939, %940 : vector<1x1xf32>
    %cst_175 = arith.constant 9.99999974E-6 : f32
    %942 = vector.broadcast %cst_175 : f32 to vector<1x1xf32>
    %943 = arith.addf %941, %942 : vector<1x1xf32>
    %944 = math.rsqrt %943 : vector<1x1xf32>
    %945 = vector.broadcast %925 : f32 to vector<1x1xf32>
    %946 = arith.mulf %945, %944 : vector<1x1xf32>
    %947 = vector.broadcast %946 : vector<1x1xf32> to vector<8x128xf32>
    %948 = arith.mulf %934, %947 : vector<8x128xf32>
    %949 = vector.broadcast %926 : f32 to vector<8x128xf32>
    %950 = arith.addf %948, %949 : vector<8x128xf32>
    %cst_176 = arith.constant 0.000000e+00 : f32
    %951 = vector.broadcast %cst_176 : f32 to vector<8x128xf32>
    %952 = arith.maximumf %950, %951 : vector<8x128xf32>
    %c10_177 = arith.constant 10 : index
    %953 = memref.load %arg7[%c10_177] : memref<50xf32, #tpu.memory_space<smem>>
    %954 = vector.broadcast %953 : f32 to vector<8x128xf32>
    %955 = arith.mulf %954, %282 : vector<8x128xf32>
    %c11_178 = arith.constant 11 : index
    %956 = memref.load %arg7[%c11_178] : memref<50xf32, #tpu.memory_space<smem>>
    %957 = vector.broadcast %956 : f32 to vector<8x128xf32>
    %958 = arith.mulf %957, %349 : vector<8x128xf32>
    %c12_179 = arith.constant 12 : index
    %959 = memref.load %arg7[%c12_179] : memref<50xf32, #tpu.memory_space<smem>>
    %960 = vector.broadcast %959 : f32 to vector<8x128xf32>
    %961 = arith.mulf %960, %416 : vector<8x128xf32>
    %c13_180 = arith.constant 13 : index
    %962 = memref.load %arg7[%c13_180] : memref<50xf32, #tpu.memory_space<smem>>
    %963 = vector.broadcast %962 : f32 to vector<8x128xf32>
    %964 = arith.mulf %963, %483 : vector<8x128xf32>
    %c14_181 = arith.constant 14 : index
    %965 = memref.load %arg7[%c14_181] : memref<50xf32, #tpu.memory_space<smem>>
    %966 = vector.broadcast %965 : f32 to vector<8x128xf32>
    %967 = arith.mulf %966, %550 : vector<8x128xf32>
    %c15_182 = arith.constant 15 : index
    %968 = memref.load %arg7[%c15_182] : memref<50xf32, #tpu.memory_space<smem>>
    %969 = vector.broadcast %968 : f32 to vector<8x128xf32>
    %970 = arith.mulf %969, %617 : vector<8x128xf32>
    %c16_183 = arith.constant 16 : index
    %971 = memref.load %arg7[%c16_183] : memref<50xf32, #tpu.memory_space<smem>>
    %972 = vector.broadcast %971 : f32 to vector<8x128xf32>
    %973 = arith.mulf %972, %684 : vector<8x128xf32>
    %c17_184 = arith.constant 17 : index
    %974 = memref.load %arg7[%c17_184] : memref<50xf32, #tpu.memory_space<smem>>
    %975 = vector.broadcast %974 : f32 to vector<8x128xf32>
    %976 = arith.mulf %975, %751 : vector<8x128xf32>
    %c18_185 = arith.constant 18 : index
    %977 = memref.load %arg7[%c18_185] : memref<50xf32, #tpu.memory_space<smem>>
    %978 = vector.broadcast %977 : f32 to vector<8x128xf32>
    %979 = arith.mulf %978, %818 : vector<8x128xf32>
    %c19_186 = arith.constant 19 : index
    %980 = memref.load %arg7[%c19_186] : memref<50xf32, #tpu.memory_space<smem>>
    %981 = vector.broadcast %980 : f32 to vector<8x128xf32>
    %982 = arith.mulf %981, %885 : vector<8x128xf32>
    %983 = arith.addf %955, %958 : vector<8x128xf32>
    %984 = arith.addf %961, %964 : vector<8x128xf32>
    %985 = arith.addf %967, %970 : vector<8x128xf32>
    %986 = arith.addf %973, %976 : vector<8x128xf32>
    %987 = arith.addf %979, %982 : vector<8x128xf32>
    %988 = arith.addf %983, %984 : vector<8x128xf32>
    %989 = arith.addf %985, %986 : vector<8x128xf32>
    %990 = arith.addf %988, %989 : vector<8x128xf32>
    %991 = arith.addf %990, %987 : vector<8x128xf32>
    %c1_187 = arith.constant 1 : index
    %992 = memref.load %arg8[%c1_187] : memref<5xf32, #tpu.memory_space<smem>>
    %c1_188 = arith.constant 1 : index
    %993 = memref.load %arg9[%c1_188] : memref<5xf32, #tpu.memory_space<smem>>
    %cst_189 = arith.constant dense<0.000000e+00> : vector<8xf32>
    %994 = vector.multi_reduction <add>, %991, %cst_189 [1] : vector<8x128xf32> to vector<8xf32>
    %995 = vector.shape_cast %994 : vector<8xf32> to vector<8x1xf32>
    %cst_190 = arith.constant dense<0.000000e+00> : vector<1xf32>
    %996 = vector.multi_reduction <add>, %995, %cst_190 [0] : vector<8x1xf32> to vector<1xf32>
    %997 = vector.shape_cast %996 : vector<1xf32> to vector<1x1xf32>
    %cst_191 = arith.constant 9.765625E-4 : f32
    %998 = vector.broadcast %cst_191 : f32 to vector<1x1xf32>
    %999 = arith.mulf %997, %998 : vector<1x1xf32>
    %1000 = vector.broadcast %999 : vector<1x1xf32> to vector<8x128xf32>
    %1001 = arith.subf %991, %1000 : vector<8x128xf32>
    %1002 = arith.mulf %1001, %1001 : vector<8x128xf32>
    %cst_192 = arith.constant dense<0.000000e+00> : vector<8xf32>
    %1003 = vector.multi_reduction <add>, %1002, %cst_192 [1] : vector<8x128xf32> to vector<8xf32>
    %1004 = vector.shape_cast %1003 : vector<8xf32> to vector<8x1xf32>
    %cst_193 = arith.constant dense<0.000000e+00> : vector<1xf32>
    %1005 = vector.multi_reduction <add>, %1004, %cst_193 [0] : vector<8x1xf32> to vector<1xf32>
    %1006 = vector.shape_cast %1005 : vector<1xf32> to vector<1x1xf32>
    %cst_194 = arith.constant 9.765625E-4 : f32
    %1007 = vector.broadcast %cst_194 : f32 to vector<1x1xf32>
    %1008 = arith.mulf %1006, %1007 : vector<1x1xf32>
    %cst_195 = arith.constant 9.99999974E-6 : f32
    %1009 = vector.broadcast %cst_195 : f32 to vector<1x1xf32>
    %1010 = arith.addf %1008, %1009 : vector<1x1xf32>
    %1011 = math.rsqrt %1010 : vector<1x1xf32>
    %1012 = vector.broadcast %992 : f32 to vector<1x1xf32>
    %1013 = arith.mulf %1012, %1011 : vector<1x1xf32>
    %1014 = vector.broadcast %1013 : vector<1x1xf32> to vector<8x128xf32>
    %1015 = arith.mulf %1001, %1014 : vector<8x128xf32>
    %1016 = vector.broadcast %993 : f32 to vector<8x128xf32>
    %1017 = arith.addf %1015, %1016 : vector<8x128xf32>
    %cst_196 = arith.constant 0.000000e+00 : f32
    %1018 = vector.broadcast %cst_196 : f32 to vector<8x128xf32>
    %1019 = arith.maximumf %1017, %1018 : vector<8x128xf32>
    %c20_197 = arith.constant 20 : index
    %1020 = memref.load %arg7[%c20_197] : memref<50xf32, #tpu.memory_space<smem>>
    %1021 = vector.broadcast %1020 : f32 to vector<8x128xf32>
    %1022 = arith.mulf %1021, %282 : vector<8x128xf32>
    %c21_198 = arith.constant 21 : index
    %1023 = memref.load %arg7[%c21_198] : memref<50xf32, #tpu.memory_space<smem>>
    %1024 = vector.broadcast %1023 : f32 to vector<8x128xf32>
    %1025 = arith.mulf %1024, %349 : vector<8x128xf32>
    %c22_199 = arith.constant 22 : index
    %1026 = memref.load %arg7[%c22_199] : memref<50xf32, #tpu.memory_space<smem>>
    %1027 = vector.broadcast %1026 : f32 to vector<8x128xf32>
    %1028 = arith.mulf %1027, %416 : vector<8x128xf32>
    %c23_200 = arith.constant 23 : index
    %1029 = memref.load %arg7[%c23_200] : memref<50xf32, #tpu.memory_space<smem>>
    %1030 = vector.broadcast %1029 : f32 to vector<8x128xf32>
    %1031 = arith.mulf %1030, %483 : vector<8x128xf32>
    %c24_201 = arith.constant 24 : index
    %1032 = memref.load %arg7[%c24_201] : memref<50xf32, #tpu.memory_space<smem>>
    %1033 = vector.broadcast %1032 : f32 to vector<8x128xf32>
    %1034 = arith.mulf %1033, %550 : vector<8x128xf32>
    %c25_202 = arith.constant 25 : index
    %1035 = memref.load %arg7[%c25_202] : memref<50xf32, #tpu.memory_space<smem>>
    %1036 = vector.broadcast %1035 : f32 to vector<8x128xf32>
    %1037 = arith.mulf %1036, %617 : vector<8x128xf32>
    %c26_203 = arith.constant 26 : index
    %1038 = memref.load %arg7[%c26_203] : memref<50xf32, #tpu.memory_space<smem>>
    %1039 = vector.broadcast %1038 : f32 to vector<8x128xf32>
    %1040 = arith.mulf %1039, %684 : vector<8x128xf32>
    %c27_204 = arith.constant 27 : index
    %1041 = memref.load %arg7[%c27_204] : memref<50xf32, #tpu.memory_space<smem>>
    %1042 = vector.broadcast %1041 : f32 to vector<8x128xf32>
    %1043 = arith.mulf %1042, %751 : vector<8x128xf32>
    %c28_205 = arith.constant 28 : index
    %1044 = memref.load %arg7[%c28_205] : memref<50xf32, #tpu.memory_space<smem>>
    %1045 = vector.broadcast %1044 : f32 to vector<8x128xf32>
    %1046 = arith.mulf %1045, %818 : vector<8x128xf32>
    %c29_206 = arith.constant 29 : index
    %1047 = memref.load %arg7[%c29_206] : memref<50xf32, #tpu.memory_space<smem>>
    %1048 = vector.broadcast %1047 : f32 to vector<8x128xf32>
    %1049 = arith.mulf %1048, %885 : vector<8x128xf32>
    %1050 = arith.addf %1022, %1025 : vector<8x128xf32>
    %1051 = arith.addf %1028, %1031 : vector<8x128xf32>
    %1052 = arith.addf %1034, %1037 : vector<8x128xf32>
    %1053 = arith.addf %1040, %1043 : vector<8x128xf32>
    %1054 = arith.addf %1046, %1049 : vector<8x128xf32>
    %1055 = arith.addf %1050, %1051 : vector<8x128xf32>
    %1056 = arith.addf %1052, %1053 : vector<8x128xf32>
    %1057 = arith.addf %1055, %1056 : vector<8x128xf32>
    %1058 = arith.addf %1057, %1054 : vector<8x128xf32>
    %c2_207 = arith.constant 2 : index
    %1059 = memref.load %arg8[%c2_207] : memref<5xf32, #tpu.memory_space<smem>>
    %c2_208 = arith.constant 2 : index
    %1060 = memref.load %arg9[%c2_208] : memref<5xf32, #tpu.memory_space<smem>>
    %cst_209 = arith.constant dense<0.000000e+00> : vector<8xf32>
    %1061 = vector.multi_reduction <add>, %1058, %cst_209 [1] : vector<8x128xf32> to vector<8xf32>
    %1062 = vector.shape_cast %1061 : vector<8xf32> to vector<8x1xf32>
    %cst_210 = arith.constant dense<0.000000e+00> : vector<1xf32>
    %1063 = vector.multi_reduction <add>, %1062, %cst_210 [0] : vector<8x1xf32> to vector<1xf32>
    %1064 = vector.shape_cast %1063 : vector<1xf32> to vector<1x1xf32>
    %cst_211 = arith.constant 9.765625E-4 : f32
    %1065 = vector.broadcast %cst_211 : f32 to vector<1x1xf32>
    %1066 = arith.mulf %1064, %1065 : vector<1x1xf32>
    %1067 = vector.broadcast %1066 : vector<1x1xf32> to vector<8x128xf32>
    %1068 = arith.subf %1058, %1067 : vector<8x128xf32>
    %1069 = arith.mulf %1068, %1068 : vector<8x128xf32>
    %cst_212 = arith.constant dense<0.000000e+00> : vector<8xf32>
    %1070 = vector.multi_reduction <add>, %1069, %cst_212 [1] : vector<8x128xf32> to vector<8xf32>
    %1071 = vector.shape_cast %1070 : vector<8xf32> to vector<8x1xf32>
    %cst_213 = arith.constant dense<0.000000e+00> : vector<1xf32>
    %1072 = vector.multi_reduction <add>, %1071, %cst_213 [0] : vector<8x1xf32> to vector<1xf32>
    %1073 = vector.shape_cast %1072 : vector<1xf32> to vector<1x1xf32>
    %cst_214 = arith.constant 9.765625E-4 : f32
    %1074 = vector.broadcast %cst_214 : f32 to vector<1x1xf32>
    %1075 = arith.mulf %1073, %1074 : vector<1x1xf32>
    %cst_215 = arith.constant 9.99999974E-6 : f32
    %1076 = vector.broadcast %cst_215 : f32 to vector<1x1xf32>
    %1077 = arith.addf %1075, %1076 : vector<1x1xf32>
    %1078 = math.rsqrt %1077 : vector<1x1xf32>
    %1079 = vector.broadcast %1059 : f32 to vector<1x1xf32>
    %1080 = arith.mulf %1079, %1078 : vector<1x1xf32>
    %1081 = vector.broadcast %1080 : vector<1x1xf32> to vector<8x128xf32>
    %1082 = arith.mulf %1068, %1081 : vector<8x128xf32>
    %1083 = vector.broadcast %1060 : f32 to vector<8x128xf32>
    %1084 = arith.addf %1082, %1083 : vector<8x128xf32>
    %cst_216 = arith.constant 0.000000e+00 : f32
    %1085 = vector.broadcast %cst_216 : f32 to vector<8x128xf32>
    %1086 = arith.maximumf %1084, %1085 : vector<8x128xf32>
    %c30_217 = arith.constant 30 : index
    %1087 = memref.load %arg7[%c30_217] : memref<50xf32, #tpu.memory_space<smem>>
    %1088 = vector.broadcast %1087 : f32 to vector<8x128xf32>
    %1089 = arith.mulf %1088, %282 : vector<8x128xf32>
    %c31_218 = arith.constant 31 : index
    %1090 = memref.load %arg7[%c31_218] : memref<50xf32, #tpu.memory_space<smem>>
    %1091 = vector.broadcast %1090 : f32 to vector<8x128xf32>
    %1092 = arith.mulf %1091, %349 : vector<8x128xf32>
    %c32_219 = arith.constant 32 : index
    %1093 = memref.load %arg7[%c32_219] : memref<50xf32, #tpu.memory_space<smem>>
    %1094 = vector.broadcast %1093 : f32 to vector<8x128xf32>
    %1095 = arith.mulf %1094, %416 : vector<8x128xf32>
    %c33_220 = arith.constant 33 : index
    %1096 = memref.load %arg7[%c33_220] : memref<50xf32, #tpu.memory_space<smem>>
    %1097 = vector.broadcast %1096 : f32 to vector<8x128xf32>
    %1098 = arith.mulf %1097, %483 : vector<8x128xf32>
    %c34_221 = arith.constant 34 : index
    %1099 = memref.load %arg7[%c34_221] : memref<50xf32, #tpu.memory_space<smem>>
    %1100 = vector.broadcast %1099 : f32 to vector<8x128xf32>
    %1101 = arith.mulf %1100, %550 : vector<8x128xf32>
    %c35_222 = arith.constant 35 : index
    %1102 = memref.load %arg7[%c35_222] : memref<50xf32, #tpu.memory_space<smem>>
    %1103 = vector.broadcast %1102 : f32 to vector<8x128xf32>
    %1104 = arith.mulf %1103, %617 : vector<8x128xf32>
    %c36_223 = arith.constant 36 : index
    %1105 = memref.load %arg7[%c36_223] : memref<50xf32, #tpu.memory_space<smem>>
    %1106 = vector.broadcast %1105 : f32 to vector<8x128xf32>
    %1107 = arith.mulf %1106, %684 : vector<8x128xf32>
    %c37_224 = arith.constant 37 : index
    %1108 = memref.load %arg7[%c37_224] : memref<50xf32, #tpu.memory_space<smem>>
    %1109 = vector.broadcast %1108 : f32 to vector<8x128xf32>
    %1110 = arith.mulf %1109, %751 : vector<8x128xf32>
    %c38_225 = arith.constant 38 : index
    %1111 = memref.load %arg7[%c38_225] : memref<50xf32, #tpu.memory_space<smem>>
    %1112 = vector.broadcast %1111 : f32 to vector<8x128xf32>
    %1113 = arith.mulf %1112, %818 : vector<8x128xf32>
    %c39_226 = arith.constant 39 : index
    %1114 = memref.load %arg7[%c39_226] : memref<50xf32, #tpu.memory_space<smem>>
    %1115 = vector.broadcast %1114 : f32 to vector<8x128xf32>
    %1116 = arith.mulf %1115, %885 : vector<8x128xf32>
    %1117 = arith.addf %1089, %1092 : vector<8x128xf32>
    %1118 = arith.addf %1095, %1098 : vector<8x128xf32>
    %1119 = arith.addf %1101, %1104 : vector<8x128xf32>
    %1120 = arith.addf %1107, %1110 : vector<8x128xf32>
    %1121 = arith.addf %1113, %1116 : vector<8x128xf32>
    %1122 = arith.addf %1117, %1118 : vector<8x128xf32>
    %1123 = arith.addf %1119, %1120 : vector<8x128xf32>
    %1124 = arith.addf %1122, %1123 : vector<8x128xf32>
    %1125 = arith.addf %1124, %1121 : vector<8x128xf32>
    %c3_227 = arith.constant 3 : index
    %1126 = memref.load %arg8[%c3_227] : memref<5xf32, #tpu.memory_space<smem>>
    %c3_228 = arith.constant 3 : index
    %1127 = memref.load %arg9[%c3_228] : memref<5xf32, #tpu.memory_space<smem>>
    %cst_229 = arith.constant dense<0.000000e+00> : vector<8xf32>
    %1128 = vector.multi_reduction <add>, %1125, %cst_229 [1] : vector<8x128xf32> to vector<8xf32>
    %1129 = vector.shape_cast %1128 : vector<8xf32> to vector<8x1xf32>
    %cst_230 = arith.constant dense<0.000000e+00> : vector<1xf32>
    %1130 = vector.multi_reduction <add>, %1129, %cst_230 [0] : vector<8x1xf32> to vector<1xf32>
    %1131 = vector.shape_cast %1130 : vector<1xf32> to vector<1x1xf32>
    %cst_231 = arith.constant 9.765625E-4 : f32
    %1132 = vector.broadcast %cst_231 : f32 to vector<1x1xf32>
    %1133 = arith.mulf %1131, %1132 : vector<1x1xf32>
    %1134 = vector.broadcast %1133 : vector<1x1xf32> to vector<8x128xf32>
    %1135 = arith.subf %1125, %1134 : vector<8x128xf32>
    %1136 = arith.mulf %1135, %1135 : vector<8x128xf32>
    %cst_232 = arith.constant dense<0.000000e+00> : vector<8xf32>
    %1137 = vector.multi_reduction <add>, %1136, %cst_232 [1] : vector<8x128xf32> to vector<8xf32>
    %1138 = vector.shape_cast %1137 : vector<8xf32> to vector<8x1xf32>
    %cst_233 = arith.constant dense<0.000000e+00> : vector<1xf32>
    %1139 = vector.multi_reduction <add>, %1138, %cst_233 [0] : vector<8x1xf32> to vector<1xf32>
    %1140 = vector.shape_cast %1139 : vector<1xf32> to vector<1x1xf32>
    %cst_234 = arith.constant 9.765625E-4 : f32
    %1141 = vector.broadcast %cst_234 : f32 to vector<1x1xf32>
    %1142 = arith.mulf %1140, %1141 : vector<1x1xf32>
    %cst_235 = arith.constant 9.99999974E-6 : f32
    %1143 = vector.broadcast %cst_235 : f32 to vector<1x1xf32>
    %1144 = arith.addf %1142, %1143 : vector<1x1xf32>
    %1145 = math.rsqrt %1144 : vector<1x1xf32>
    %1146 = vector.broadcast %1126 : f32 to vector<1x1xf32>
    %1147 = arith.mulf %1146, %1145 : vector<1x1xf32>
    %1148 = vector.broadcast %1147 : vector<1x1xf32> to vector<8x128xf32>
    %1149 = arith.mulf %1135, %1148 : vector<8x128xf32>
    %1150 = vector.broadcast %1127 : f32 to vector<8x128xf32>
    %1151 = arith.addf %1149, %1150 : vector<8x128xf32>
    %cst_236 = arith.constant 0.000000e+00 : f32
    %1152 = vector.broadcast %cst_236 : f32 to vector<8x128xf32>
    %1153 = arith.maximumf %1151, %1152 : vector<8x128xf32>
    %c40_237 = arith.constant 40 : index
    %1154 = memref.load %arg7[%c40_237] : memref<50xf32, #tpu.memory_space<smem>>
    %1155 = vector.broadcast %1154 : f32 to vector<8x128xf32>
    %1156 = arith.mulf %1155, %282 : vector<8x128xf32>
    %c41_238 = arith.constant 41 : index
    %1157 = memref.load %arg7[%c41_238] : memref<50xf32, #tpu.memory_space<smem>>
    %1158 = vector.broadcast %1157 : f32 to vector<8x128xf32>
    %1159 = arith.mulf %1158, %349 : vector<8x128xf32>
    %c42_239 = arith.constant 42 : index
    %1160 = memref.load %arg7[%c42_239] : memref<50xf32, #tpu.memory_space<smem>>
    %1161 = vector.broadcast %1160 : f32 to vector<8x128xf32>
    %1162 = arith.mulf %1161, %416 : vector<8x128xf32>
    %c43_240 = arith.constant 43 : index
    %1163 = memref.load %arg7[%c43_240] : memref<50xf32, #tpu.memory_space<smem>>
    %1164 = vector.broadcast %1163 : f32 to vector<8x128xf32>
    %1165 = arith.mulf %1164, %483 : vector<8x128xf32>
    %c44_241 = arith.constant 44 : index
    %1166 = memref.load %arg7[%c44_241] : memref<50xf32, #tpu.memory_space<smem>>
    %1167 = vector.broadcast %1166 : f32 to vector<8x128xf32>
    %1168 = arith.mulf %1167, %550 : vector<8x128xf32>
    %c45_242 = arith.constant 45 : index
    %1169 = memref.load %arg7[%c45_242] : memref<50xf32, #tpu.memory_space<smem>>
    %1170 = vector.broadcast %1169 : f32 to vector<8x128xf32>
    %1171 = arith.mulf %1170, %617 : vector<8x128xf32>
    %c46_243 = arith.constant 46 : index
    %1172 = memref.load %arg7[%c46_243] : memref<50xf32, #tpu.memory_space<smem>>
    %1173 = vector.broadcast %1172 : f32 to vector<8x128xf32>
    %1174 = arith.mulf %1173, %684 : vector<8x128xf32>
    %c47_244 = arith.constant 47 : index
    %1175 = memref.load %arg7[%c47_244] : memref<50xf32, #tpu.memory_space<smem>>
    %1176 = vector.broadcast %1175 : f32 to vector<8x128xf32>
    %1177 = arith.mulf %1176, %751 : vector<8x128xf32>
    %c48_245 = arith.constant 48 : index
    %1178 = memref.load %arg7[%c48_245] : memref<50xf32, #tpu.memory_space<smem>>
    %1179 = vector.broadcast %1178 : f32 to vector<8x128xf32>
    %1180 = arith.mulf %1179, %818 : vector<8x128xf32>
    %c49_246 = arith.constant 49 : index
    %1181 = memref.load %arg7[%c49_246] : memref<50xf32, #tpu.memory_space<smem>>
    %1182 = vector.broadcast %1181 : f32 to vector<8x128xf32>
    %1183 = arith.mulf %1182, %885 : vector<8x128xf32>
    %1184 = arith.addf %1156, %1159 : vector<8x128xf32>
    %1185 = arith.addf %1162, %1165 : vector<8x128xf32>
    %1186 = arith.addf %1168, %1171 : vector<8x128xf32>
    %1187 = arith.addf %1174, %1177 : vector<8x128xf32>
    %1188 = arith.addf %1180, %1183 : vector<8x128xf32>
    %1189 = arith.addf %1184, %1185 : vector<8x128xf32>
    %1190 = arith.addf %1186, %1187 : vector<8x128xf32>
    %1191 = arith.addf %1189, %1190 : vector<8x128xf32>
    %1192 = arith.addf %1191, %1188 : vector<8x128xf32>
    %c4_247 = arith.constant 4 : index
    %1193 = memref.load %arg8[%c4_247] : memref<5xf32, #tpu.memory_space<smem>>
    %c4_248 = arith.constant 4 : index
    %1194 = memref.load %arg9[%c4_248] : memref<5xf32, #tpu.memory_space<smem>>
    %cst_249 = arith.constant dense<0.000000e+00> : vector<8xf32>
    %1195 = vector.multi_reduction <add>, %1192, %cst_249 [1] : vector<8x128xf32> to vector<8xf32>
    %1196 = vector.shape_cast %1195 : vector<8xf32> to vector<8x1xf32>
    %cst_250 = arith.constant dense<0.000000e+00> : vector<1xf32>
    %1197 = vector.multi_reduction <add>, %1196, %cst_250 [0] : vector<8x1xf32> to vector<1xf32>
    %1198 = vector.shape_cast %1197 : vector<1xf32> to vector<1x1xf32>
    %cst_251 = arith.constant 9.765625E-4 : f32
    %1199 = vector.broadcast %cst_251 : f32 to vector<1x1xf32>
    %1200 = arith.mulf %1198, %1199 : vector<1x1xf32>
    %1201 = vector.broadcast %1200 : vector<1x1xf32> to vector<8x128xf32>
    %1202 = arith.subf %1192, %1201 : vector<8x128xf32>
    %1203 = arith.mulf %1202, %1202 : vector<8x128xf32>
    %cst_252 = arith.constant dense<0.000000e+00> : vector<8xf32>
    %1204 = vector.multi_reduction <add>, %1203, %cst_252 [1] : vector<8x128xf32> to vector<8xf32>
    %1205 = vector.shape_cast %1204 : vector<8xf32> to vector<8x1xf32>
    %cst_253 = arith.constant dense<0.000000e+00> : vector<1xf32>
    %1206 = vector.multi_reduction <add>, %1205, %cst_253 [0] : vector<8x1xf32> to vector<1xf32>
    %1207 = vector.shape_cast %1206 : vector<1xf32> to vector<1x1xf32>
    %cst_254 = arith.constant 9.765625E-4 : f32
    %1208 = vector.broadcast %cst_254 : f32 to vector<1x1xf32>
    %1209 = arith.mulf %1207, %1208 : vector<1x1xf32>
    %cst_255 = arith.constant 9.99999974E-6 : f32
    %1210 = vector.broadcast %cst_255 : f32 to vector<1x1xf32>
    %1211 = arith.addf %1209, %1210 : vector<1x1xf32>
    %1212 = math.rsqrt %1211 : vector<1x1xf32>
    %1213 = vector.broadcast %1193 : f32 to vector<1x1xf32>
    %1214 = arith.mulf %1213, %1212 : vector<1x1xf32>
    %1215 = vector.broadcast %1214 : vector<1x1xf32> to vector<8x128xf32>
    %1216 = arith.mulf %1202, %1215 : vector<8x128xf32>
    %1217 = vector.broadcast %1194 : f32 to vector<8x128xf32>
    %1218 = arith.addf %1216, %1217 : vector<8x128xf32>
    %cst_256 = arith.constant 0.000000e+00 : f32
    %1219 = vector.broadcast %cst_256 : f32 to vector<8x128xf32>
    %1220 = arith.maximumf %1218, %1219 : vector<8x128xf32>
    %c0_257 = arith.constant 0 : index
    %1221 = memref.load %arg10[%c0_257] : memref<5xf32, #tpu.memory_space<smem>>
    %1222 = vector.broadcast %1221 : f32 to vector<8x128xf32>
    %1223 = arith.mulf %1222, %952 : vector<8x128xf32>
    %c1_258 = arith.constant 1 : index
    %1224 = memref.load %arg10[%c1_258] : memref<5xf32, #tpu.memory_space<smem>>
    %1225 = vector.broadcast %1224 : f32 to vector<8x128xf32>
    %1226 = arith.mulf %1225, %1019 : vector<8x128xf32>
    %c2_259 = arith.constant 2 : index
    %1227 = memref.load %arg10[%c2_259] : memref<5xf32, #tpu.memory_space<smem>>
    %1228 = vector.broadcast %1227 : f32 to vector<8x128xf32>
    %1229 = arith.mulf %1228, %1086 : vector<8x128xf32>
    %c3_260 = arith.constant 3 : index
    %1230 = memref.load %arg10[%c3_260] : memref<5xf32, #tpu.memory_space<smem>>
    %1231 = vector.broadcast %1230 : f32 to vector<8x128xf32>
    %1232 = arith.mulf %1231, %1153 : vector<8x128xf32>
    %c4_261 = arith.constant 4 : index
    %1233 = memref.load %arg10[%c4_261] : memref<5xf32, #tpu.memory_space<smem>>
    %1234 = vector.broadcast %1233 : f32 to vector<8x128xf32>
    %1235 = arith.mulf %1234, %1220 : vector<8x128xf32>
    %1236 = arith.addf %1223, %1226 : vector<8x128xf32>
    %1237 = arith.addf %1229, %1232 : vector<8x128xf32>
    %1238 = arith.addf %1236, %1237 : vector<8x128xf32>
    %1239 = arith.addf %1238, %1235 : vector<8x128xf32>
    %c0_262 = arith.constant 0 : index
    %1240 = memref.load %arg11[%c0_262] : memref<1xf32, #tpu.memory_space<smem>>
    %1241 = vector.broadcast %1240 : f32 to vector<8x128xf32>
    %1242 = arith.addf %1239, %1241 : vector<8x128xf32>
    %cst_263 = arith.constant 5.000000e-01 : f32
    %1243 = vector.broadcast %cst_263 : f32 to vector<8x128xf32>
    %1244 = arith.mulf %1243, %1242 : vector<8x128xf32>
    %1245 = math.tanh %1244 : vector<8x128xf32>
    %cst_264 = arith.constant 5.000000e-01 : f32
    %1246 = vector.broadcast %cst_264 : f32 to vector<8x128xf32>
    %1247 = arith.mulf %1246, %1245 : vector<8x128xf32>
    %cst_265 = arith.constant 5.000000e-01 : f32
    %1248 = vector.broadcast %cst_265 : f32 to vector<8x128xf32>
    %1249 = arith.addf %1248, %1247 : vector<8x128xf32>
    %c0_266 = arith.constant 0 : index
    %c0_267 = arith.constant 0 : index
    %1250 = vector.load %arg12[%c0_266, %c0_267] : memref<8x128xf32, #tpu.memory_space<vmem>>, vector<8x128xf32>
    tpu.vector_store %arg12[%c0_266, %c0_267], %1249 {strides = array<i32>} : memref<8x128xf32, #tpu.memory_space<vmem>>, vector<8x128xf32>,
    return
  }
}

</mosaic_0001>

<bundles_post_ra>
// kernel: tpu_custom_call.1
= control target key start
LH: loop header
LB: loop body
LE: loop exit
PB: predicated region body
PF: predicated region fallthrough
CT: control target
= control target key end

     0   :  { %s3297_s0 = inlined_call_operand.hbm [shape: f32[8,128], index: 0, kind: input, shape index: {}]   ;;  %s3298_s1 = inlined_call_operand.vmem [shape: f32[10], index: 1, kind: input, shape index: {}]   ;;  %s3299_s2 = inlined_call_operand.vmem [shape: f32[10], index: 2, kind: input, shape index: {}]   ;;  %s3300_s3 = inlined_call_operand.vmem [shape: f32[10], index: 3, kind: input, shape index: {}]   ;;  %s3301_s4 = inlined_call_operand.vmem [shape: f32[100], index: 4, kind: input, shape index: {}]   ;;  %s3302_s5 = inlined_call_operand.vmem [shape: f32[10], index: 5, kind: input, shape index: {}]   ;;  %s3303_s6 = inlined_call_operand.vmem [shape: f32[10], index: 6, kind: input, shape index: {}]   ;;  %s3304_s7 = inlined_call_operand.vmem [shape: f32[50], index: 7, kind: input, shape index: {}]   ;;  %s3305_s8 = inlined_call_operand.vmem [shape: f32[5], index: 8, kind: input, shape index: {}]   ;;  %s3306_s9 = inlined_call_operand.vmem [shape: f32[5], index: 9, kind: input, shape index: {}]   ;;  %s3307_s10 = inlined_call_operand.vmem [shape: f32[5], index: 10, kind: input, shape index: {}]   ;;  %s3308_s11 = inlined_call_operand.<no memory space> [shape: f32[1], index: 11, kind: input, shape index: {}]   ;;  %s3309_s12 = inlined_call_operand.hbm [shape: f32[8,128], index: 12, kind: output, shape index: {}]  }
   0x1   :  { %3461 = sst [smem:[#allocation134_spill]] %s3308_s11 }
   0x2   :  { %3462 = sst [smem:[#allocation135_spill]] %s3309_s12 }
   0x3   :  { %18 = vsyncpa [#allocation4], 0 }
   0x4   :  { %19 = vsyncpa [#allocation6], 0 }
   0x5   :  { %20 = vsyncpa [#allocation9], 0 }
   0x6   :  { %21 = vsyncpa [#allocation12], 0 }
   0x7   :  { %22 = vsyncpa [#allocation15], 0 }
   0x8   :  { %23 = vsyncpa [#allocation18], 0 }
   0x9   :  { %24 = vsyncpa [#allocation21], 0  ;;  %s52_s23 = sshll.u32 %s3299_s2, 4  ;;  %s53_s23 = int_to_ptr.vmem [resolvable:$true] %s52_s23 }
   0xa   :  { %25 = vsyncpa [#allocation5], 0  ;;  %s72_s26 = sshll.u32 %s3301_s4, 4  ;;  %s1695_s27 = scalar_lea.vmem %s53_s23, 16  ;;  %s73_s26 = int_to_ptr.vmem [resolvable:$true] %s72_s26 }
   0xb   :  { %p1696_p0 = scmp.ne.s32.totalorder %s53_s23, %s1695_s27  ;;  %p1700_p1 = scmp.lt.s32.totalorder %s53_s23, %s53_s23 }
   0xc   :  { %p1701_p2 = scmp.lt.s32.totalorder %s1695_s27, %s1695_s27 }
   0xe   :  { %p1702_p3 = por %p1701_p2, %p1700_p1 }
  0x10   :  { %p1703_p4 = pnand %p1702_p3, %p1696_p0 }
  0x12   :  { %1706 = shalt.err (!%p1703_p4)
}
  0x13   :  { %s1871_s28 = smov [#allocation8]   ;;  %s1707_s29 = scalar_lea.vmem %s73_s26, 16 }
  0x14   :  { %55 = dma.vmem_to_smem %s53_s23, 16, %s1871_s28, [#allocation9]  }
  0x15   :  { %p1708_p5 = scmp.ne.s32.totalorder %s73_s26, %s1707_s29  ;;  %p1712_p6 = scmp.lt.s32.totalorder %s73_s26, %s73_s26 }
  0x16   :  { %p1713_p7 = scmp.lt.s32.totalorder %s1707_s29, %s1707_s29 }
  0x18   :  { %p1714_p8 = por %p1713_p7, %p1712_p6 }
  0x1a   :  { %p1715_p9 = pnand %p1714_p8, %p1708_p5 }
  0x1c   :  { %1718 = shalt.err (!%p1715_p9)
}
  0x1d   :  { %s1872_s2 = smov [#allocation11]   ;;  %s92_s13 = sshll.u32 %s3303_s6, 4  ;;  %s93_s13 = int_to_ptr.vmem [resolvable:$true] %s92_s13 }
  0x1e   :  { %75 = dma.vmem_to_smem %s73_s26, 16, %s1872_s2, [#allocation12]  }
  0x1f   :  { %s112_s16 = sshll.u32 %s3305_s8, 4  ;;  %s1719_s17 = scalar_lea.vmem %s93_s13, 16  ;;  %s113_s16 = int_to_ptr.vmem [resolvable:$true] %s112_s16 }
  0x20   :  { %p1720_p10 = scmp.ne.s32.totalorder %s93_s13, %s1719_s17  ;;  %p1724_p11 = scmp.lt.s32.totalorder %s93_s13, %s93_s13 }
  0x21   :  { %p1725_p12 = scmp.lt.s32.totalorder %s1719_s17, %s1719_s17 }
  0x23   :  { %p1726_p13 = por %p1725_p12, %p1724_p11 }
  0x25   :  { %p1727_p0 = pnand %p1726_p13, %p1720_p10 }
  0x27   :  { %1730 = shalt.err (!%p1727_p0)
}
  0x28   :  { %s1873_s18 = smov [#allocation14]   ;;  %s1731_s19 = scalar_lea.vmem %s113_s16, 16 }
  0x29   :  { %95 = dma.vmem_to_smem %s93_s13, 16, %s1873_s18, [#allocation15]  }
  0x2a   :  { %p1732_p1 = scmp.ne.s32.totalorder %s113_s16, %s1731_s19  ;;  %p1736_p2 = scmp.lt.s32.totalorder %s113_s16, %s113_s16 }
  0x2b   :  { %p1737_p3 = scmp.lt.s32.totalorder %s1731_s19, %s1731_s19 }
  0x2d   :  { %p1738_p4 = por %p1737_p3, %p1736_p2 }
  0x2f   :  { %p1739_p5 = pnand %p1738_p4, %p1732_p1 }
  0x31   :  { %1742 = shalt.err (!%p1739_p5)
}
  0x32   :  { %s1874_s6 = smov [#allocation17]   ;;  %s42_s21 = sshll.u32 %s3298_s1, 4  ;;  %s43_s21 = int_to_ptr.vmem [resolvable:$true] %s42_s21 }
  0x33   :  { %115 = dma.vmem_to_smem %s113_s16, 16, %s1874_s6, [#allocation18]  }
  0x34   :  { %s1875_s22 = smov [#allocation3]  }
  0x35   :  { %s32_s23 = sshll.u32 %s1875_s22, 4  ;;  %s33_s23 = int_to_ptr.vmem [resolvable:$true] %s32_s23 }
  0x36   :  { %s1751_s24 = scalar_lea.vmem %s33_s23, 128  ;;  %p1756_p7 = scmp.lt.s32.totalorder %s33_s23, %s33_s23 }
  0x37   :  { %p1752_p6 = scmp.ne.s32.totalorder %s33_s23, %s1751_s24  ;;  %p1757_p8 = scmp.lt.s32.totalorder %s1751_s24, %s1751_s24 }
  0x39   :  { %p1758_p9 = por %p1757_p8, %p1756_p7 }
  0x3b   :  { %p1759_p10 = pnand %p1758_p9, %p1752_p6 }
  0x3d   :  { %1762 = shalt.err (!%p1759_p10)
}
  0x3e   :  { %35 = dma.hbm_to_vmem [thread:$0]  %s3297_s0, 128, %s33_s23, [#allocation4]  }
  0x3f   :  { %s1763_s27 = scalar_lea.vmem %s43_s21, 16  ;;  %p1768_p12 = scmp.lt.s32.totalorder %s43_s21, %s43_s21 }
  0x40   :  { %p1764_p11 = scmp.ne.s32.totalorder %s43_s21, %s1763_s27  ;;  %p1769_p13 = scmp.lt.s32.totalorder %s1763_s27, %s1763_s27 }
  0x42   :  { %p1770_p0 = por %p1769_p13, %p1768_p12 }
  0x44   :  { %p1771_p1 = pnand %p1770_p0, %p1764_p11 }
  0x46   :  { %1774 = shalt.err (!%p1771_p1)
}
  0x47   :  { %s1876_s1 = smov [#allocation7]   ;;  %s62_s2 = sshll.u32 %s3300_s3, 4  ;;  %s63_s2 = int_to_ptr.vmem [resolvable:$true] %s62_s2 }
  0x48   :  { %45 = dma.vmem_to_smem %s43_s21, 16, %s1876_s1, [#allocation6]  }
  0x49   :  { %s82_s13 = sshll.u32 %s3302_s5, 4  ;;  %s1775_s14 = scalar_lea.vmem %s63_s2, 16  ;;  %s83_s13 = int_to_ptr.vmem [resolvable:$true] %s82_s13 }
  0x4a   :  { %p1776_p2 = scmp.ne.s32.totalorder %s63_s2, %s1775_s14  ;;  %p1780_p3 = scmp.lt.s32.totalorder %s63_s2, %s63_s2 }
  0x4b   :  { %p1781_p4 = scmp.lt.s32.totalorder %s1775_s14, %s1775_s14 }
  0x4d   :  { %p1782_p5 = por %p1781_p4, %p1780_p3 }
  0x4f   :  { %p1783_p6 = pnand %p1782_p5, %p1776_p2 }
  0x51   :  { %1786 = shalt.err (!%p1783_p6)
}
  0x52   :  { %s1877_s0 = smov [#allocation10]   ;;  %s1787_s15 = scalar_lea.vmem %s83_s13, 16 }
  0x53   :  { %65 = dma.vmem_to_smem %s63_s2, 16, %s1877_s0, [#allocation9]  }
  0x54   :  { %p1788_p7 = scmp.ne.s32.totalorder %s83_s13, %s1787_s15  ;;  %p1792_p8 = scmp.lt.s32.totalorder %s83_s13, %s83_s13 }
  0x55   :  { %p1793_p9 = scmp.lt.s32.totalorder %s1787_s15, %s1787_s15 }
  0x57   :  { %p1794_p10 = por %p1793_p9, %p1792_p8 }
  0x59   :  { %p1795_p11 = pnand %p1794_p10, %p1788_p7 }
  0x5b   :  { %1798 = shalt.err (!%p1795_p11)
}
  0x5c   :  { %s1878_s3 = smov [#allocation13]   ;;  %s102_s17 = sshll.u32 %s3304_s7, 4  ;;  %s103_s17 = int_to_ptr.vmem [resolvable:$true] %s102_s17 }
  0x5d   :  { %85 = dma.vmem_to_smem %s83_s13, 16, %s1878_s3, [#allocation12]  }
  0x5e   :  { %s122_s6 = sshll.u32 %s3306_s9, 4  ;;  %s1799_s8 = scalar_lea.vmem %s103_s17, 16  ;;  %s123_s6 = int_to_ptr.vmem [resolvable:$true] %s122_s6 }
  0x5f   :  { %p1800_p12 = scmp.ne.s32.totalorder %s103_s17, %s1799_s8  ;;  %p1804_p13 = scmp.lt.s32.totalorder %s103_s17, %s103_s17 }
  0x60   :  { %p1805_p0 = scmp.lt.s32.totalorder %s1799_s8, %s1799_s8 }
  0x62   :  { %p1806_p1 = por %p1805_p0, %p1804_p13 }
  0x64   :  { %p1807_p2 = pnand %p1806_p1, %p1800_p12 }
  0x66   :  { %1810 = shalt.err (!%p1807_p2)
}
  0x67   :  { %s1879_s20 = smov [#allocation16]   ;;  %s1811_s21 = scalar_lea.vmem %s123_s6, 16 }
  0x68   :  { %105 = dma.vmem_to_smem %s103_s17, 16, %s1879_s20, [#allocation15]  }
  0x69   :  { %p1812_p3 = scmp.ne.s32.totalorder %s123_s6, %s1811_s21  ;;  %p1816_p4 = scmp.lt.s32.totalorder %s123_s6, %s123_s6 }
  0x6a   :  { %p1817_p5 = scmp.lt.s32.totalorder %s1811_s21, %s1811_s21 }
  0x6c   :  { %p1818_p6 = por %p1817_p5, %p1816_p4 }
  0x6e   :  { %p1819_p7 = pnand %p1818_p6, %p1812_p3 }
  0x70   :  { %1822 = shalt.err (!%p1819_p7)
}
  0x71   :  { %s1880_s7 = smov [#allocation19]   ;;  %s132_s23 = sshll.u32 %s3307_s10, 4  ;;  %s133_s23 = int_to_ptr.vmem [resolvable:$true] %s132_s23 }
  0x72   :  { %125 = dma.vmem_to_smem %s123_s6, 16, %s1880_s7, [#allocation18]  }
  0x73   :  { %s1823_s24 = scalar_lea.vmem %s133_s23, 16  ;;  %p1828_p9 = scmp.lt.s32.totalorder %s133_s23, %s133_s23 }
  0x74   :  { %p1824_p8 = scmp.ne.s32.totalorder %s133_s23, %s1823_s24  ;;  %p1829_p10 = scmp.lt.s32.totalorder %s1823_s24, %s1823_s24 }
  0x76   :  { %p1830_p11 = por %p1829_p10, %p1828_p9 }
  0x78   :  { %p1831_p12 = pnand %p1830_p11, %p1824_p8 }
  0x7a   :  { %1834 = shalt.err (!%p1831_p12)
}
  0x7b   :  { %s1881_s25 = smov [#allocation20]  }
  0x7c   :  { %135 = dma.vmem_to_smem %s133_s23, 16, %s1881_s25, [#allocation21]  }
  0x7d   :  { %1855 = dma.done.wait [#allocation4], 128  }
  0x7e   :  { %1856 = vsyncadd [#allocation4], 4294967168 }
  0x7f   :  { %1857 = dma.done.wait [#allocation6], 16  }
  0x80   :  { %1858 = vsyncadd [#allocation6], 4294967280 }
  0x81   :  { %1859 = dma.done.wait [#allocation9], 32  }
  0x82   :  { %1860 = vsyncadd [#allocation9], 4294967264 }
  0x83   :  { %1861 = dma.done.wait [#allocation12], 32  }
  0x84   :  { %1862 = vsyncadd [#allocation12], 4294967264 }
  0x85   :  { %1863 = dma.done.wait [#allocation15], 32  }
  0x86   :  { %1864 = vsyncadd [#allocation15], 4294967264 }
  0x87   :  { %1865 = dma.done.wait [#allocation18], 32  }
  0x88   :  { %1866 = vsyncadd [#allocation18], 4294967264 }
  0x89   :  { %1867 = dma.done.wait [#allocation21], 16  }
  0x8a   :  { %1868 = vsyncadd [#allocation21], 4294967280 }
  0x8b   :  { %171 = sfence }
  0x8c   :  { %v172_v0 = vld [vmem:[#allocation3] sm:$0xff]  ;;  %s1985_s10 = sld [smem:[#allocation7]] }
  0x8d   :  { %173 = vadd.xlane.f32.xlu0 %v172_v0  ;;  %s1987_s26 = sld [smem:[#allocation8]] }
  0x8e   :  { %s1989_s27 = sld [smem:[#allocation7 + $0x1]] }
  0x8f   :  { %s1991_s1 = sld [smem:[#allocation8 + $0x1]] }
  0x90   :  { %s1993_s28 = sld [smem:[#allocation7 + $0x2]] }
  0x91   :  { %s1995_s29 = sld [smem:[#allocation8 + $0x2]] }
  0x92   :  { %s1997_s2 = sld [smem:[#allocation7 + $0x3]]  ;;  %v2168_v11 = vstv %s1985_s10 }
  0x93   :  { %3463 = sst [smem:[#allocation31_spill]] %s1987_s26  ;;  %v201_v12 = vstv %s1987_s26 }
  0x94   :  { %s1999_s4 = sld [smem:[#allocation8 + $0x3]]  ;;  %v2172_v13 = vstv %s1989_s27 }
  0x95   :  { %3464 = sst [smem:[#allocation32_spill]] %s1991_s1  ;;  %v216_v14 = vstv %s1991_s1 }
  0x96   :  { %s2001_s30 = sld [smem:[#allocation7 + $0x4]]  ;;  %v2178_v15 = vstv %s1993_s28 }
  0x97   :  { %3465 = sst [smem:[#allocation33_spill]] %s1995_s29  ;;  %v231_v16 = vstv %s1995_s29 }
  0x98   :  { %s2003_s13 = sld [smem:[#allocation8 + $0x4]]  ;;  %v2182_v17 = vstv %s1997_s2 }
  0x99   :  { %s2005_s14 = sld [smem:[#allocation7 + $0x5]] }
  0x9a   :  { %3466 = sst [smem:[#allocation34_spill]] %s1999_s4  ;;  %v246_v18 = vstv %s1999_s4 }
  0x9b   :  { %s2007_s0 = sld [smem:[#allocation8 + $0x5]] }
  0x9c   :  { %s2009_s15 = sld [smem:[#allocation7 + $0x6]]  ;;  %v2188_v19 = vstv %s2001_s30 }
  0x9d   :  { %s2011_s3 = sld [smem:[#allocation8 + $0x6]] }
  0x9e   :  { %3467 = sst [smem:[#allocation35_spill]] %s2003_s13  ;;  %v261_v20 = vstv %s2003_s13 }
  0x9f   :  { %s2013_s5 = sld [smem:[#allocation7 + $0x7]]  ;;  %v2192_v21 = vstv %s2005_s14 }
  0xa0   :  { %s2015_s16 = sld [smem:[#allocation8 + $0x7]] }
  0xa1   :  { %3468 = sst [smem:[#allocation36_spill]] %s2007_s0  ;;  %v276_v22 = vstv %s2007_s0 }
  0xa2   :  { %s2017_s17 = sld [smem:[#allocation7 + $0x8]]  ;;  %v2198_v23 = vstv %s2009_s15 }
  0xa3   :  { %3469 = sst [smem:[#allocation37_spill]] %s2011_s3  ;;  %v291_v24 = vstv %s2011_s3 }
  0xa4   :  { %s2019_s18 = sld [smem:[#allocation7 + $0x9]] }
  0xa5   :  { %s2021_s19 = sld [smem:[#allocation8 + $0x8]]  ;;  %v2202_v25 = vstv %s2013_s5 }
  0xa6   :  { %3470 = sst [smem:[#allocation38_spill]] %s2015_s16  ;;  %v306_v26 = vstv %s2015_s16 }
  0xa7   :  { %s2023_s6 = sld [smem:[#allocation8 + $0x9]] }
  0xa8   :  { %s2025_s8 = sld [smem:[#allocation10]]  ;;  %v2208_v27 = vstv %s2017_s17 }
  0xa9   :  { %s2027_s20 = sld [smem:[#allocation10 + $0x1]] }
  0xaa   :  { %s2029_s21 = sld [smem:[#allocation10 + $0x2]]  ;;  %v2211_v28 = vstv %s2019_s18 }
  0xab   :  { %3471 = sst [smem:[#allocation39_spill]] %s2021_s19  ;;  %v321_v29 = vstv %s2021_s19 }
  0xac   :  { %s2031_s7 = sld [smem:[#allocation10 + $0x3]] }
  0xad   :  { %3472 = sst [smem:[#allocation40_spill]] %s2023_s6  ;;  %v336_v30 = vstv %s2023_s6 }
  0xae   :  { %3473 = sst [smem:[#allocation41_spill]] %s2025_s8 }
  0xaf   :  { %3474 = sst [smem:[#allocation42_spill]] %s2027_s20 }
  0xb0   :  { %3475 = sst [smem:[#allocation43_spill]] %s2029_s21 }
  0xb1   :  { %s2033_s9 = sld [smem:[#allocation10 + $0x4]] }
  0xb2   :  { %3476 = sst [smem:[#allocation44_spill]] %s2031_s7 }
  0xb3   :  { %s2035_s22 = sld [smem:[#allocation10 + $0x5]] }
  0xb4   :  { %s2037_s23 = sld [smem:[#allocation10 + $0x6]] }
  0xb5   :  { %s2039_s24 = sld [smem:[#allocation10 + $0x7]] }
  0xb6   :  { %s2041_s25 = sld [smem:[#allocation10 + $0x8]] }
  0xb7   :  { %3477 = sst [smem:[#allocation45_spill]] %s2033_s9 }
  0xb8   :  { %s2043_s12 = sld [smem:[#allocation10 + $0x9]] }
  0xb9   :  { %3478 = sst [smem:[#allocation46_spill]] %s2035_s22 }
  0xba   :  { %3479 = sst [smem:[#allocation47_spill]] %s2037_s23 }
  0xbb   :  { %3480 = sst [smem:[#allocation48_spill]] %s2039_s24 }
  0xbc   :  { %3481 = sst [smem:[#allocation49_spill]] %s2041_s25 }
  0xbd   :  { %s2045_s11 = sld [smem:[#allocation11 + $0x14]] }
  0xbe   :  { %3482 = sst [smem:[#allocation50_spill]] %s2043_s12 }
  0xbf   :  { %s2047_s8 = sld [smem:[#allocation11 + $0x15]] }
  0xc0   :  { %s2049_s20 = sld [smem:[#allocation11 + $0x16]] }
  0xc1   :  { %s2051_s21 = sld [smem:[#allocation11 + $0x17]] }
  0xc2   :  { %s2053_s7 = sld [smem:[#allocation11 + $0x18]] }
  0xc3   :  { %3483 = sst [smem:[#allocation51_spill]] %s2045_s11 }
  0xc4   :  { %s2055_s9 = sld [smem:[#allocation11 + $0x19]] }
  0xc5   :  { %3484 = sst [smem:[#allocation52_spill]] %s2047_s8 }
  0xc6   :  { %3485 = sst [smem:[#allocation53_spill]] %s2049_s20 }
  0xc7   :  { %3486 = sst [smem:[#allocation54_spill]] %s2051_s21 }
  0xc8   :  { %3487 = sst [smem:[#allocation55_spill]] %s2053_s7 }
  0xc9   :  { %s2057_s22 = sld [smem:[#allocation11 + $0x1a]] }
  0xca   :  { %3488 = sst [smem:[#allocation56_spill]] %s2055_s9 }
  0xcb   :  { %s2059_s23 = sld [smem:[#allocation11 + $0x1b]] }
  0xcc   :  { %s2061_s24 = sld [smem:[#allocation11 + $0x1c]] }
  0xcd   :  { %s2063_s25 = sld [smem:[#allocation11 + $0x1d]] }
  0xce   :  { %s2065_s12 = sld [smem:[#allocation11]] }
  0xcf   :  { %3489 = sst [smem:[#allocation57_spill]] %s2057_s22 }
  0xd0   :  { %s2067_s11 = sld [smem:[#allocation11 + $0x1]] }
  0xd1   :  { %3490 = sst [smem:[#allocation58_spill]] %s2059_s23 }
  0xd2   :  { %3491 = sst [smem:[#allocation59_spill]] %s2061_s24 }
  0xd3   :  { %3492 = sst [smem:[#allocation60_spill]] %s2063_s25 }
  0xd4   :  { %3493 = sst [smem:[#allocation61_spill]] %s2065_s12 }
  0xd5   :  { %s2069_s8 = sld [smem:[#allocation11 + $0x2]] }
  0xd6   :  { %3494 = sst [smem:[#allocation62_spill]] %s2067_s11 }
  0xd7   :  { %s2071_s20 = sld [smem:[#allocation11 + $0x3]] }
  0xd8   :  { %s2073_s21 = sld [smem:[#allocation11 + $0x4]] }
  0xd9   :  { %s2075_s7 = sld [smem:[#allocation11 + $0x5]] }
  0xda   :  { %s2077_s9 = sld [smem:[#allocation11 + $0x6]] }
  0xdb   :  { %3495 = sst [smem:[#allocation63_spill]] %s2069_s8 }
  0xdc   :  { %s2079_s22 = sld [smem:[#allocation11 + $0x7]] }
  0xdd   :  { %3496 = sst [smem:[#allocation64_spill]] %s2071_s20 }
  0xde   :  { %3497 = sst [smem:[#allocation65_spill]] %s2073_s21 }
  0xdf   :  { %3498 = sst [smem:[#allocation66_spill]] %s2075_s7 }
  0xe0   :  { %3499 = sst [smem:[#allocation67_spill]] %s2077_s9 }
  0xe1   :  { %s2081_s23 = sld [smem:[#allocation11 + $0x8]] }
  0xe2   :  { %3500 = sst [smem:[#allocation68_spill]] %s2079_s22 }
  0xe3   :  { %s2083_s24 = sld [smem:[#allocation11 + $0x9]] }
  0xe4   :  { %s2085_s25 = sld [smem:[#allocation11 + $0x28]] }
  0xe5   :  { %s2087_s12 = sld [smem:[#allocation11 + $0x29]] }
  0xe6   :  { %s2089_s11 = sld [smem:[#allocation11 + $0x2a]] }
  0xe7   :  { %3501 = sst [smem:[#allocation69_spill]] %s2081_s23 }
  0xe8   :  { %s2091_s8 = sld [smem:[#allocation11 + $0x2b]] }
  0xe9   :  { %3502 = sst [smem:[#allocation70_spill]] %s2083_s24 }
  0xea   :  { %3503 = sst [smem:[#allocation71_spill]] %s2085_s25 }
  0xeb   :  { %3504 = sst [smem:[#allocation72_spill]] %s2087_s12 }
  0xec   :  { %3505 = sst [smem:[#allocation73_spill]] %s2089_s11 }
  0xed   :  { %s2093_s20 = sld [smem:[#allocation11 + $0x2c]] }
  0xee   :  { %3506 = sst [smem:[#allocation74_spill]] %s2091_s8 }
  0xef   :  { %s2095_s21 = sld [smem:[#allocation11 + $0x2d]] }
  0xf0   :  { %s2097_s7 = sld [smem:[#allocation11 + $0x2e]] }
  0xf1   :  { %s2099_s9 = sld [smem:[#allocation11 + $0x2f]] }
  0xf2   :  { %s2101_s22 = sld [smem:[#allocation11 + $0x30]] }
  0xf3   :  { %3507 = sst [smem:[#allocation75_spill]] %s2093_s20 }
  0xf4   :  { %s2103_s23 = sld [smem:[#allocation11 + $0x31]] }
  0xf5   :  { %3508 = sst [smem:[#allocation76_spill]] %s2095_s21 }
  0xf6   :  { %3509 = sst [smem:[#allocation77_spill]] %s2097_s7 }
  0xf7   :  { %3510 = sst [smem:[#allocation78_spill]] %s2099_s9 }
  0xf8   :  { %3511 = sst [smem:[#allocation79_spill]] %s2101_s22 }
  0xf9   :  { %s2105_s24 = sld [smem:[#allocation11 + $0xa]] }
  0xfa   :  { %3512 = sst [smem:[#allocation80_spill]] %s2103_s23 }
  0xfb   :  { %s2107_s25 = sld [smem:[#allocation11 + $0xb]] }
  0xfc   :  { %s2109_s12 = sld [smem:[#allocation11 + $0xc]] }
  0xfd   :  { %s2111_s11 = sld [smem:[#allocation11 + $0xd]] }
  0xfe   :  { %s2113_s8 = sld [smem:[#allocation11 + $0xe]] }
  0xff   :  { %3513 = sst [smem:[#allocation81_spill]] %s2105_s24 }
 0x100   :  { %s2115_s20 = sld [smem:[#allocation11 + $0xf]] }
 0x101   :  { %3514 = sst [smem:[#allocation82_spill]] %s2107_s25 }
 0x102   :  { %3515 = sst [smem:[#allocation83_spill]] %s2109_s12 }
 0x103   :  { %3516 = sst [smem:[#allocation84_spill]] %s2111_s11 }
 0x104   :  { %3517 = sst [smem:[#allocation85_spill]] %s2113_s8 }
 0x105   :  { %s2117_s21 = sld [smem:[#allocation11 + $0x10]] }
 0x106   :  { %3518 = sst [smem:[#allocation86_spill]] %s2115_s20 }
 0x107   :  { %s2119_s7 = sld [smem:[#allocation11 + $0x11]] }
 0x108   :  { %s2121_s9 = sld [smem:[#allocation11 + $0x12]] }
 0x109   :  { %s2123_s22 = sld [smem:[#allocation11 + $0x13]] }
 0x10a   :  { %s2125_s23 = sld [smem:[#allocation11 + $0x3c]] }
 0x10b   :  { %3519 = sst [smem:[#allocation87_spill]] %s2117_s21 }
 0x10c   :  { %s2127_s24 = sld [smem:[#allocation11 + $0x3d]] }
 0x10d   :  { %3520 = sst [smem:[#allocation88_spill]] %s2119_s7 }
 0x10e   :  { %3521 = sst [smem:[#allocation89_spill]] %s2121_s9 }
 0x10f   :  { %3522 = sst [smem:[#allocation90_spill]] %s2123_s22 }
 0x110   :  { %3523 = sst [smem:[#allocation91_spill]] %s2125_s23 }
 0x111   :  { %s2129_s25 = sld [smem:[#allocation11 + $0x3e]] }
 0x112   :  { %3524 = sst [smem:[#allocation92_spill]] %s2127_s24 }
 0x113   :  { %s2131_s12 = sld [smem:[#allocation11 + $0x3f]] }
 0x114   :  { %s2133_s11 = sld [smem:[#allocation11 + $0x40]] }
 0x115   :  { %s2135_s8 = sld [smem:[#allocation11 + $0x41]] }
 0x116   :  { %v174_v1 = vpop.xlane.xlu0 %173  ;;  %s2137_s21 = sld [smem:[#allocation11 + $0x42]] }
 0x117   :  { %v175_v2 = vrot.slane %v174_v1, 4  ;;  %3525 = sst [smem:[#allocation93_spill]] %s2129_s25 }
 0x118   :  { %s2139_s7 = sld [smem:[#allocation11 + $0x43]] }
 0x119   :  { %v176_v3 = vadd.f32 %v175_v2, %v174_v1  ;;  %3526 = sst [smem:[#allocation94_spill]] %s2131_s12 }
 0x11a   :  { %3527 = sst [smem:[#allocation95_spill]] %s2133_s11 }
 0x11b   :  { %v177_v4 = vrot.slane %v176_v3, 2  ;;  %3528 = sst [smem:[#allocation96_spill]] %s2135_s8 }
 0x11c   :  { %3529 = sst [smem:[#allocation97_spill]] %s2137_s21 }
 0x11d   :  { %v178_v5 = vadd.f32 %v177_v4, %v176_v3  ;;  %s2141_s22 = sld [smem:[#allocation11 + $0x44]] }
 0x11e   :  { %3530 = sst [smem:[#allocation98_spill]] %s2139_s7 }
 0x11f   :  { %v179_v6 = vrot.slane %v178_v5, 1  ;;  %s2143_s23 = sld [smem:[#allocation11 + $0x45]] }
 0x120   :  { %s2145_s24 = sld [smem:[#allocation11 + $0x1e]] }
 0x121   :  { %v180_v7 = vadd.f32 %v179_v6, %v178_v5  ;;  %s2147_s12 = sld [smem:[#allocation11 + $0x1f]] }
 0x122   :  { %s2149_s11 = sld [smem:[#allocation11 + $0x20]] }
 0x123   :  { %v181_v8 = vmul.f32 0.0009765625, %v180_v7  ;;  %3531 = sst [smem:[#allocation99_spill]] %s2141_s22 }
 0x124   :  { %s2151_s8 = sld [smem:[#allocation11 + $0x21]] }
 0x125   :  { %v1981_v9 = vsub.f32 %v172_v0, %v181_v8  ;;  %3532 = sst [smem:[#allocation100_spill]] %s2143_s23 }
 0x126   :  { %3533 = sst [smem:[#allocation101_spill]] %s2145_s24 }
 0x127   :  { %v183_v10 = vmul.f32 %v1981_v9, %v1981_v9  ;;  %3534 = sst [smem:[#allocation102_spill]] %s2147_s12 }
 0x128   :  { %3535 = sst [smem:[#allocation103_spill]] %s2149_s11 }
 0x129   :  { %184 = vadd.xlane.f32.xlu0 %v183_v10  ;;  %s2153_s21 = sld [smem:[#allocation11 + $0x22]] }
 0x12a   :  { %3536 = sst [smem:[#allocation104_spill]] %s2151_s8 }
 0x12b   :  { %s2155_s7 = sld [smem:[#allocation11 + $0x23]] }
 0x12c   :  { %s2157_s22 = sld [smem:[#allocation11 + $0x24]] }
 0x12d   :  { %s2159_s23 = sld [smem:[#allocation11 + $0x25]] }
 0x12e   :  { %s2161_s24 = sld [smem:[#allocation11 + $0x26]] }
 0x12f   :  { %3537 = sst [smem:[#allocation105_spill]] %s2153_s21 }
 0x130   :  { %s2163_s12 = sld [smem:[#allocation11 + $0x27]] }
 0x131   :  { %3538 = sst [smem:[#allocation106_spill]] %s2155_s7 }
 0x132   :  { %3539 = sst [smem:[#allocation107_spill]] %s2157_s22 }
 0x133   :  { %s2165_s11 = sld [smem:[#allocation11 + $0x50]] }
 0x134   :  { %3540 = sst [smem:[#allocation108_spill]] %s2161_s24 }
 0x135   :  { %s2175_s22 = sld [smem:[#allocation11 + $0x51]] }
 0x136   :  { %s2185_s10 = sld [smem:[#allocation11 + $0x52]] }
 0x137   :  { %s3543_s26 = sld [smem:[#allocation41_spill]] }
 0x138   :  { %s3544_s27 = sld [smem:[#allocation42_spill]] }
 0x139   :  { %s3545_s1 = sld [smem:[#allocation43_spill]] }
 0x13a   :  { %s2195_s28 = sld [smem:[#allocation11 + $0x53]] }
 0x13b   :  { %3541 = sst [smem:[#allocation109_spill]] %s2175_s22 }
 0x13c   :  { %3542 = sst [smem:[#allocation110_spill]] %s2185_s10 }
 0x13d   :  { %s3546_s22 = sld [smem:[#allocation44_spill]]  ;;  %v205_v31 = vstv %s3543_s26 }
 0x13e   :  { %s3548_s2 = sld [smem:[#allocation45_spill]]  ;;  %v220_v32 = vstv %s3544_s27 }
 0x13f   :  { %s3549_s29 = sld [smem:[#allocation46_spill]]  ;;  %v235_v33 = vstv %s3545_s1 }
 0x140   :  { %3547 = sst [smem:[#allocation111_spill]] %s2195_s28 }
 0x141   :  { %s3550_s4 = sld [smem:[#allocation47_spill]] }
 0x142   :  { %s3551_s30 = sld [smem:[#allocation48_spill]] }
 0x143   :  { %s2205_s10 = sld [smem:[#allocation11 + $0x54]]  ;;  %v250_v34 = vstv %s3546_s22 }
 0x144   :  { %s3553_s14 = sld [smem:[#allocation49_spill]]  ;;  %v265_v36 = vstv %s3548_s2 }
 0x145   :  { %s3554_s0 = sld [smem:[#allocation50_spill]]  ;;  %v280_v37 = vstv %s3549_s29 }
 0x146   :  { %s3555_s15 = sld [smem:[#allocation51_spill]] }
 0x147   :  { %s2215_s13 = sld [smem:[#allocation11 + $0x55]]  ;;  %v295_v38 = vstv %s3550_s4 }
 0x148   :  { %s3557_s3 = sld [smem:[#allocation52_spill]]  ;;  %v310_v39 = vstv %s3551_s30 }
 0x149   :  { %3552 = sst [smem:[#allocation112_spill]] %s2205_s10 }
 0x14a   :  { %s3558_s5 = sld [smem:[#allocation53_spill]]  ;;  %v325_v41 = vstv %s3553_s14 }
 0x14b   :  { %s3559_s16 = sld [smem:[#allocation54_spill]]  ;;  %v340_v42 = vstv %s3554_s0 }
 0x14c   :  { %s3560_s28 = sld [smem:[#allocation55_spill]]  ;;  %v482_v43 = vstv %s3555_s15 }
 0x14d   :  { %3556 = sst [smem:[#allocation113_spill]] %s2215_s13 }
 0x14e   :  { %s2221_s10 = sld [smem:[#allocation11 + $0x56]]  ;;  %v485_v44 = vstv %s3557_s3 }
 0x14f   :  { %s3562_s17 = sld [smem:[#allocation56_spill]] }
 0x150   :  { %s3563_s18 = sld [smem:[#allocation57_spill]]  ;;  %v488_v45 = vstv %s3558_s5 }
 0x151   :  { %s3564_s6 = sld [smem:[#allocation58_spill]]  ;;  %v491_v46 = vstv %s3559_s16 }
 0x152   :  { %s2227_s19 = sld [smem:[#allocation11 + $0x57]]  ;;  %v494_v47 = vstv %s3560_s28 }
 0x153   :  { %s3566_s26 = sld [smem:[#allocation59_spill]] }
 0x154   :  { %3561 = sst [smem:[#allocation114_spill]] %s2221_s10 }
 0x155   :  { %s3567_s27 = sld [smem:[#allocation60_spill]]  ;;  %v497_v49 = vstv %s3562_s17 }
 0x156   :  { %s3568_s1 = sld [smem:[#allocation61_spill]]  ;;  %v500_v50 = vstv %s3563_s18 }
 0x157   :  { %s3569_s22 = sld [smem:[#allocation62_spill]]  ;;  %v503_v51 = vstv %s3564_s6 }
 0x158   :  { %3565 = sst [smem:[#allocation115_spill]] %s2227_s19 }
 0x159   :  { %s2232_s13 = sld [smem:[#allocation11 + $0x58]]  ;;  %v506_v52 = vstv %s3566_s26 }
 0x15a   :  { %s3571_s2 = sld [smem:[#allocation63_spill]] }
 0x15b   :  { %s3572_s29 = sld [smem:[#allocation64_spill]]  ;;  %v509_v53 = vstv %s3567_s27 }
 0x15c   :  { %s2238_s30 = sld [smem:[#allocation11 + $0x59]]  ;;  %v344_v54 = vstv %s3568_s1 }
 0x15d   :  { %s2243_s15 = sld [smem:[#allocation11 + $0x32]]  ;;  %v347_v55 = vstv %s3569_s22 }
 0x15e   :  { %s2249_s28 = sld [smem:[#allocation11 + $0x33]] }
 0x15f   :  { %3570 = sst [smem:[#allocation116_spill]] %s2232_s13 }
 0x160   :  { %v350_v57 = vstv %s3571_s2  ;;  %s2254_s6 = sld [smem:[#allocation11 + $0x34]] }
 0x161   :  { %v353_v58 = vstv %s3572_s29  ;;  %s2260_s22 = sld [smem:[#allocation11 + $0x35]] }
 0x162   :  { %3574 = sst [smem:[#allocation117_spill]] %s2238_s30 }
 0x163   :  { %3579 = sst [smem:[#allocation118_spill]] %s2243_s15 }
 0x164   :  { %3583 = sst [smem:[#allocation119_spill]] %s2249_s28 }
 0x165   :  { %s2265_s4 = sld [smem:[#allocation11 + $0x36]] }
 0x166   :  { %s2271_s0 = sld [smem:[#allocation11 + $0x37]] }
 0x167   :  { %3591 = sst [smem:[#allocation120_spill]] %s2260_s22 }
 0x168   :  { %s2276_s16 = sld [smem:[#allocation11 + $0x38]] }
 0x169   :  { %s2282_s18 = sld [smem:[#allocation11 + $0x39]] }
 0x16a   :  { %s2287_s1 = sld [smem:[#allocation11 + $0x3a]] }
 0x16b   :  { %3596 = sst [smem:[#allocation121_spill]] %s2265_s4 }
 0x16c   :  { %s2293_s15 = sld [smem:[#allocation11 + $0x3b]] }
 0x16d   :  { %s2298_s29 = sld [smem:[#allocation11 + $0x46]] }
 0x16e   :  { %s2304_s10 = sld [smem:[#allocation11 + $0x47]] }
 0x16f   :  { %s3609_s5 = sld [smem:[#allocation98_spill]] }
 0x170   :  { %3608 = sst [smem:[#allocation122_spill]] %s2287_s1 }
 0x171   :  { %s2310_s30 = sld [smem:[#allocation11 + $0x48]] }
 0x172   :  { %s2316_s27 = sld [smem:[#allocation11 + $0x49]] }
 0x173   :  { %s3611_s26 = sld [smem:[#allocation99_spill]] }
 0x174   :  { %s2322_s3 = sld [smem:[#allocation11 + $0x4a]] }
 0x175   :  { %s3612_s17 = sld [smem:[#allocation100_spill]]  ;;  %v779_v61 = vstv %s3609_s5 }
 0x176   :  { %s2328_s25 = sld [smem:[#allocation11 + $0x4b]] }
 0x177   :  { %3610 = sst [smem:[#allocation123_spill]] %s2310_s30 }
 0x178   :  { %s3613_s13 = sld [smem:[#allocation101_spill]] }
 0x179   :  { %s3614_s9 = sld [smem:[#allocation102_spill]] }
 0x17a   :  { %s2334_s14 = sld [smem:[#allocation11 + $0x4c]] }
 0x17b   :  { %s2338_s5 = sld [smem:[#allocation11 + $0x4d]] }
 0x17c   :  { %s2342_s19 = sld [smem:[#allocation11 + $0x4e]] }
 0x17d   :  { %s2350_s2 = sld [smem:[#allocation11 + $0x5a]] }
 0x17e   :  { %s2358_s8 = sld [smem:[#allocation11 + $0x5c]] }
 0x17f   :  { %s2363_s7 = sld [smem:[#allocation11 + $0x5d]] }
 0x180   :  { %3616 = sst [smem:[#allocation124_spill]] %s2334_s14 }
 0x181   :  { %3617 = sst [smem:[#allocation125_spill]] %s2338_s5 }
 0x182   :  { %3619 = sst [smem:[#allocation126_spill]] %s2342_s19 }
 0x183   :  { %3622 = sst [smem:[#allocation128_spill]] %s2350_s2 }
 0x184   :  { %3630 = sst [smem:[#allocation129_spill]] %s2358_s8 }
 0x185   :  { %3634 = sst [smem:[#allocation130_spill]] %s2363_s7 }
 0x186   :  { %s2368_s24 = sld [smem:[#allocation11 + $0x5e]] }
 0x187   :  { %s2378_s19 = sld [smem:[#allocation11 + $0x60]] }
 0x188   :  { %s2384_s5 = sld [smem:[#allocation11 + $0x61]] }
 0x189   :  { %s3642_s22 = sld [smem:[#allocation125_spill]] }
 0x18a   :  { %s2390_s14 = sld [smem:[#allocation11 + $0x62]] }
 0x18b   :  { %s3646_s28 = sld [smem:[#allocation128_spill]] }
 0x18c   :  { %s3682_s1 = sld [smem:[#allocation65_spill]] }
 0x18d   :  { %3639 = sst [smem:[#allocation132_spill]] %s2378_s19 }
 0x18e   :  { %3641 = sst [smem:[#allocation133_spill]] %s2384_s5 }
 0x18f   :  { %s3687_s20 = sld [smem:[#allocation70_spill]] }
 0x190   :  { %3645 = sst [smem:[#allocation125_spill]] %s2390_s14 }
 0x191   :  { %s3689_s30 = sld [smem:[#allocation72_spill]] }
 0x192   :  { %s3699_s2 = sld [smem:[#allocation76_spill]] }
 0x193   :  { %s3700_s21 = sld [smem:[#allocation77_spill]] }
 0x194   :  { %s3701_s8 = sld [smem:[#allocation78_spill]] }
 0x195   :  { %s3702_s4 = sld [smem:[#allocation79_spill]] }
 0x1b2   :  { %v185_v35 = vpop.xlane.xlu0 %184 }
 0x1b3   :  { %v186_v40 = vrot.slane %v185_v35, 4 }
 0x1b5   :  { %v187_v48 = vadd.f32 %v186_v40, %v185_v35 }
 0x1b7   :  { %v188_v56 = vrot.slane %v187_v48, 2 }
 0x1b9   :  { %v189_v0 = vadd.f32 %v188_v56, %v187_v48 }
 0x1bb   :  { %v190_v8 = vrot.slane %v189_v0, 1 }
 0x1bd   :  { %v191_v7 = vadd.f32 %v190_v8, %v189_v0 }
 0x1bf   :  { %v192_v5 = vmul.f32 0.0009765625, %v191_v7 }
 0x1c1   :  { %v195_v35 = vmul.f32 %v2168_v11, %v192_v5  ;;  %v210_v48 = vmul.f32 %v2172_v13, %v192_v5  ;;  %v225_v56 = vmul.f32 %v2178_v15, %v192_v5  ;;  %v240_v7 = vmul.f32 %v2182_v17, %v192_v5 }
 0x1c2   :  { %v255_v1 = vmul.f32 %v2188_v19, %v192_v5  ;;  %v270_v0 = vmul.f32 %v2192_v21, %v192_v5  ;;  %v285_v4 = vmul.f32 %v2198_v23, %v192_v5  ;;  %v300_v10 = vmul.f32 %v2202_v25, %v192_v5 }
 0x1c3   :  { %v196_v8 = vmul.f32 %v195_v35, %v2168_v11  ;;  %v211_v2 = vmul.f32 %v210_v48, %v2172_v13  ;;  %v226_v6 = vmul.f32 %v225_v56, %v2178_v15  ;;  %v241_v3 = vmul.f32 %v240_v7, %v2182_v17 }
 0x1c4   :  { %v256_v40 = vmul.f32 %v255_v1, %v2188_v19  ;;  %v271_v63 = vmul.f32 %v270_v0, %v2192_v21  ;;  %v286_v62 = vmul.f32 %v285_v4, %v2198_v23  ;;  %v315_v56 = vmul.f32 %v2208_v27, %v192_v5 }
 0x1c5   :  { %v197_v35 = vadd.f32 1e-05, %v196_v8  ;;  %v212_v60 = vadd.f32 1e-05, %v211_v2  ;;  %v227_v48 = vadd.f32 1e-05, %v226_v6  ;;  %v301_v7 = vmul.f32 %v300_v10, %v2202_v25 }
 0x1c6   :  { %v242_v59 = vadd.f32 1e-05, %v241_v3  ;;  %v330_v1 = vmul.f32 %v2211_v28, %v192_v5  ;;  %v782_v0 = vstv %s3611_s26  ;;  %v257_v4 = vadd.f32 1e-05, %v256_v40  ;;  %s2346_s26 = sld [smem:[#allocation11 + $0x4f]] }
 0x1c7   :  { %1643 = vrsqrt.f32 %v197_v35  ;;  %v316_v8 = vmul.f32 %v315_v56, %v2208_v27  ;;  %v785_v2 = vstv %s3612_s17  ;;  %v272_v3 = vadd.f32 1e-05, %v271_v63  ;;  %s2373_s17 = sld [smem:[#allocation11 + $0x5f]] }
 0x1c8   :  { %1645 = vrsqrt.f32 %v212_v60  ;;  %v331_v6 = vmul.f32 %v330_v1, %v2211_v28  ;;  %v551_v5 = vstv %s3613_s13  ;;  %v287_v10 = vadd.f32 1e-05, %v286_v62  ;;  %s3623_s13 = sld [smem:[#allocation110_spill]] }
 0x1c9   :  { %1647 = vrsqrt.f32 %v227_v48  ;;  %v554_v40 = vstv %s3614_s9  ;;  %v302_v56 = vadd.f32 1e-05, %v301_v7  ;;  %v317_v1 = vadd.f32 1e-05, %v316_v8  ;;  %s2354_s9 = sld [smem:[#allocation11 + $0x5b]] }
 0x1ca   :  { %1649 = vrsqrt.f32 %v242_v59  ;;  %v332_v59 = vadd.f32 1e-05, %v331_v6  ;;  %v965_v63 = vstv %s3646_s28  ;;  %s3688_s28 = sld [smem:[#allocation71_spill]] }
 0x1cb   :  { %1651 = vrsqrt.f32 %v257_v4 }
 0x1cc   :  { %3620 = sst [smem:[#allocation127_spill]] %s2346_s26  ;;  %1653 = vrsqrt.f32 %v272_v3 }
 0x1cd   :  { %1655 = vrsqrt.f32 %v287_v10  ;;  %3638 = sst [smem:[#allocation131_spill]] %s2373_s17 }
 0x1ce   :  { %1657 = vrsqrt.f32 %v302_v56  ;;  %s3693_s26 = sld [smem:[#allocation73_spill]] }
 0x1cf   :  { %3626 = sst [smem:[#allocation110_spill]] %s2354_s9  ;;  %1659 = vrsqrt.f32 %v317_v1 }
 0x1d0   :  { %s3636_s9 = sld [smem:[#allocation120_spill]]  ;;  %1661 = vrsqrt.f32 %v332_v59 }
 0x1d1   :  { %3637 = sst [smem:[#allocation120_spill]] %s2368_s24 }
 0x1d2   :  { %s3686_s24 = sld [smem:[#allocation69_spill]] }
 0x1d4   :  { %v1644_v4 = vpop.eup %1643 }
 0x1d5   :  { %v1646_v56 = vpop.eup %1645  ;;  %v200_v6 = vmul.f32 %v1644_v4, %v2168_v11  ;;  %v974_v11 = vstv %s2363_s7  ;;  %s3685_s7 = sld [smem:[#allocation68_spill]] }
 0x1d6   :  { %v1648_v10 = vpop.eup %1647  ;;  %v215_v8 = vmul.f32 %v1646_v56, %v2172_v13  ;;  %v980_v13 = vstv %s2373_s17  ;;  %v983_v56 = vstv %s2378_s19  ;;  %s3683_s17 = sld [smem:[#allocation66_spill]] }
 0x1d7   :  { %v1650_v3 = vpop.eup %1649  ;;  %v202_v59 = vmul.f32 %v201_v12, %v200_v6  ;;  %v230_v35 = vmul.f32 %v1648_v10, %v2178_v15  ;;  %v986_v6 = vstv %s2384_s5  ;;  %s3684_s19 = sld [smem:[#allocation67_spill]] }
 0x1d8   :  { %v1652_v7 = vpop.eup %1651  ;;  %v217_v1 = vmul.f32 %v216_v14, %v215_v8  ;;  %v245_v48 = vmul.f32 %v1650_v3, %v2182_v17  ;;  %v989_v8 = vstv %s2390_s14  ;;  %s3694_s14 = sld [smem:[#allocation74_spill]] }
 0x1d9   :  { %v1654_v62 = vpop.eup %1653  ;;  %v232_v60 = vmul.f32 %v231_v16, %v230_v35  ;;  %v260_v12 = vmul.f32 %v1652_v7, %v2188_v19  ;;  %v203_v15 = vmul.f32 %v202_v59, %v1981_v9  ;;  %s3697_s5 = sld [smem:[#allocation75_spill]] }
 0x1da   :  { %v1656_v10 = vpop.eup %1655  ;;  %v247_v4 = vmul.f32 %v246_v18, %v245_v48  ;;  %v275_v14 = vmul.f32 %v1654_v62, %v2192_v21  ;;  %v218_v17 = vmul.f32 %v217_v1, %v1981_v9 }
 0x1db   :  { %v1658_v3 = vpop.eup %1657  ;;  %v262_v16 = vmul.f32 %v261_v20, %v260_v12  ;;  %v290_v19 = vmul.f32 %v1656_v10, %v2198_v23  ;;  %v206_v35 = vadd.f32 %v205_v31, %v203_v15  ;;  %v233_v7 = vmul.f32 %v232_v60, %v1981_v9 }
 0x1dc   :  { %v1660_v59 = vpop.eup %1659  ;;  %v277_v18 = vmul.f32 %v276_v22, %v275_v14  ;;  %v305_v21 = vmul.f32 %v1658_v3, %v2202_v25  ;;  %v221_v62 = vadd.f32 %v220_v32, %v218_v17  ;;  %v248_v48 = vmul.f32 %v247_v4, %v1981_v9 }
 0x1dd   :  { %v1662_v1 = vpop.eup %1661  ;;  %v292_v20 = vmul.f32 %v291_v24, %v290_v19  ;;  %v320_v23 = vmul.f32 %v1660_v59, %v2208_v27  ;;  %v2443_v31 = vmax.f32 %v206_v35, 0.0  ;;  %v236_v22 = vadd.f32 %v235_v33, %v233_v7 }
 0x1de   :  { %v307_v25 = vmul.f32 %v306_v26, %v305_v21  ;;  %v335_v32 = vmul.f32 %v1662_v1, %v2211_v28  ;;  %v2450_v60 = vmax.f32 %v221_v62, 0.0  ;;  %v251_v4 = vadd.f32 %v250_v34, %v248_v48 }
 0x1df   :  { %v2454_v24 = vmax.f32 %v236_v22, 0.0  ;;  %v263_v27 = vmul.f32 %v262_v16, %v1981_v9  ;;  %v278_v12 = vmul.f32 %v277_v18, %v1981_v9  ;;  %v293_v15 = vmul.f32 %v292_v20, %v1981_v9 }
 0x1e0   :  { %v2459_v33 = vmax.f32 %v251_v4, 0.0  ;;  %v308_v26 = vmul.f32 %v307_v25, %v1981_v9  ;;  %v322_v28 = vmul.f32 %v321_v29, %v320_v23  ;;  %v337_v34 = vmul.f32 %v336_v30, %v335_v32 }
 0x1e1   :  { %v266_v10 = vadd.f32 %v265_v36, %v263_v27  ;;  %v281_v14 = vadd.f32 %v280_v37, %v278_v12  ;;  %v296_v17 = vadd.f32 %v295_v38, %v293_v15  ;;  %v483_v3 = vmul.f32 %v482_v43, %v2443_v31 }
 0x1e2   :  { %v311_v16 = vadd.f32 %v310_v39, %v308_v26  ;;  %v323_v29 = vmul.f32 %v322_v28, %v1981_v9  ;;  %v338_v19 = vmul.f32 %v337_v34, %v1981_v9  ;;  %v486_v30 = vmul.f32 %v485_v44, %v2450_v60 }
 0x1e3   :  { %v2482_v36 = vmax.f32 %v266_v10, 0.0  ;;  %v2484_v37 = vmax.f32 %v281_v14, 0.0  ;;  %v2486_v38 = vmax.f32 %v296_v17, 0.0  ;;  %v489_v43 = vmul.f32 %v488_v45, %v2454_v24 }
 0x1e4   :  { %v2491_v39 = vmax.f32 %v311_v16, 0.0  ;;  %v326_v9 = vadd.f32 %v325_v41, %v323_v29  ;;  %v341_v44 = vadd.f32 %v340_v42, %v338_v19  ;;  %v492_v35 = vmul.f32 %v491_v46, %v2459_v33 }
 0x1e5   :  { %v495_v7 = vmul.f32 %v494_v47, %v2482_v36  ;;  %v498_v59 = vmul.f32 %v497_v49, %v2484_v37  ;;  %v501_v45 = vmul.f32 %v500_v50, %v2486_v38  ;;  %v511_v18 = vadd.f32 %v486_v30, %v483_v3 }
 0x1e6   :  { %v2509_v41 = vmax.f32 %v326_v9, 0.0  ;;  %v2511_v42 = vmax.f32 %v341_v44, 0.0  ;;  %v504_v46 = vmul.f32 %v503_v51, %v2491_v39  ;;  %v512_v47 = vadd.f32 %v492_v35, %v489_v43 }
 0x1e7   :  { %v513_v21 = vadd.f32 %v498_v59, %v495_v7  ;;  %v345_v49 = vmul.f32 %v344_v54, %v2443_v31  ;;  %v348_v50 = vmul.f32 %v347_v55, %v2450_v60  ;;  %v351_v62 = vmul.f32 %v350_v57, %v2454_v24 }
 0x1e8   :  { %v507_v48 = vmul.f32 %v506_v52, %v2509_v41  ;;  %v510_v51 = vmul.f32 %v509_v53, %v2511_v42  ;;  %v514_v1 = vadd.f32 %v504_v46, %v501_v45  ;;  %v516_v20 = vadd.f32 %v512_v47, %v511_v18 }
 0x1e9   :  { %v354_v23 = vmul.f32 %v353_v58, %v2459_v33  ;;  %v3690_v54 = vstv %s3682_s1  ;;  %v3691_v55 = vstv %s3683_s17  ;;  %v3692_v57 = vstv %s3684_s19  ;;  %s3703_s1 = sld [smem:[#allocation80_spill]] }
 0x1ea   :  { %v357_v22 = vmul.f32 %v3690_v54, %v2482_v36  ;;  %v360_v25 = vmul.f32 %v3691_v55, %v2484_v37  ;;  %v363_v52 = vmul.f32 %v3692_v57, %v2486_v38  ;;  %v515_v32 = vadd.f32 %v510_v51, %v507_v48  ;;  %s3708_s17 = sld [smem:[#allocation81_spill]] }
 0x1eb   :  { %v517_v53 = vadd.f32 %v514_v1, %v513_v21  ;;  %v3695_v4 = vstv %s3685_s7  ;;  %v3696_v12 = vstv %s3686_s24  ;;  %v3698_v15 = vstv %s3687_s20  ;;  %s3709_s19 = sld [smem:[#allocation82_spill]] }
 0x1ec   :  { %v366_v27 = vmul.f32 %v3695_v4, %v2491_v39  ;;  %v369_v58 = vmul.f32 %v3696_v12, %v2509_v41  ;;  %v372_v26 = vmul.f32 %v3698_v15, %v2511_v42  ;;  %v373_v28 = vadd.f32 %v348_v50, %v345_v49  ;;  %s3713_s7 = sld [smem:[#allocation83_spill]] }
 0x1ed   :  { %v374_v34 = vadd.f32 %v354_v23, %v351_v62  ;;  %v375_v10 = vadd.f32 %v360_v25, %v357_v22  ;;  %v518_v14 = vadd.f32 %v517_v53, %v516_v20  ;;  %v3704_v3 = vstv %s3688_s28  ;;  %s3715_s24 = sld [smem:[#allocation84_spill]] }
 0x1ee   :  { %v376_v17 = vadd.f32 %v366_v27, %v363_v52  ;;  %v621_v16 = vmul.f32 %v3704_v3, %v2443_v31  ;;  %v3705_v29 = vstv %s3689_s30  ;;  %v377_v30 = vadd.f32 %v372_v26, %v369_v58  ;;  %s3718_s20 = sld [smem:[#allocation85_spill]] }
 0x1ef   :  { %v624_v19 = vmul.f32 %v3705_v29, %v2450_v60  ;;  %v378_v43 = vadd.f32 %v374_v34, %v373_v28  ;;  %v3706_v9 = vstv %s3693_s26  ;;  %v3707_v35 = vstv %s3694_s14  ;;  %s3719_s28 = sld [smem:[#allocation86_spill]] }
 0x1f0   :  { %v627_v44 = vmul.f32 %v3706_v9, %v2454_v24  ;;  %v630_v7 = vmul.f32 %v3707_v35, %v2459_v33  ;;  %v2564_v59 = vadd.f32 %v518_v14, %v515_v32  ;;  %v379_v45 = vadd.f32 %v376_v17, %v375_v10  ;;  %s3720_s30 = sld [smem:[#allocation87_spill]] }
 0x1f1   :  { %v3710_v18 = vstv %s3697_s5  ;;  %v3711_v47 = vstv %s3699_s2  ;;  %v3712_v49 = vstv %s3700_s21  ;;  %v3714_v62 = vstv %s3701_s8  ;;  %s3721_s26 = sld [smem:[#allocation88_spill]] }
 0x1f2   :  { %v633_v46 = vmul.f32 %v3710_v18, %v2482_v36  ;;  %v636_v21 = vmul.f32 %v3711_v47, %v2484_v37  ;;  %v639_v50 = vmul.f32 %v3712_v49, %v2486_v38  ;;  %v642_v48 = vmul.f32 %v3714_v62, %v2491_v39  ;;  %522 = vadd.xlane.f32.xlu0 %v2564_v59  ;;  %s3722_s14 = sld [smem:[#allocation89_spill]] }
 0x1f3   :  { %v3716_v51 = vstv %s3702_s4  ;;  %v3717_v20 = vstv %s3703_s1  ;;  %v380_v54 = vadd.f32 %v379_v45, %v378_v43  ;;  %v649_v22 = vadd.f32 %v624_v19, %v621_v16  ;;  %s3723_s5 = sld [smem:[#allocation90_spill]] }
 0x1f4   :  { %v645_v1 = vmul.f32 %v3716_v51, %v2509_v41  ;;  %v648_v23 = vmul.f32 %v3717_v20, %v2511_v42  ;;  %v650_v55 = vadd.f32 %v630_v7, %v627_v44  ;;  %v651_v25 = vadd.f32 %v636_v21, %v633_v46  ;;  %s3726_s2 = sld [smem:[#allocation91_spill]] }
 0x1f5   :  { %v652_v57 = vadd.f32 %v642_v48, %v639_v50  ;;  %v3724_v32 = vstv %s3708_s17  ;;  %v3725_v4 = vstv %s3709_s19  ;;  %v2591_v12 = vadd.f32 %v380_v54, %v377_v30  ;;  %s3729_s21 = sld [smem:[#allocation92_spill]] }
 0x1f6   :  { %v653_v52 = vadd.f32 %v648_v23, %v645_v1  ;;  %v414_v53 = vmul.f32 %v3724_v32, %v2443_v31  ;;  %v417_v27 = vmul.f32 %v3725_v4, %v2450_v60  ;;  %v654_v58 = vadd.f32 %v650_v55, %v649_v22  ;;  %s3731_s8 = sld [smem:[#allocation93_spill]] }
 0x1f7   :  { %v3727_v15 = vstv %s3713_s7  ;;  %v3728_v28 = vstv %s3715_s24  ;;  %v655_v10 = vadd.f32 %v652_v57, %v651_v25  ;;  %v3730_v14 = vstv %s3718_s20  ;;  %s3734_s4 = sld [smem:[#allocation94_spill]]  ;;  %384 = vadd.xlane.f32.xlu1 %v2591_v12 }
 0x1f8   :  { %v420_v26 = vmul.f32 %v3727_v15, %v2454_v24  ;;  %v423_v34 = vmul.f32 %v3728_v28, %v2459_v33  ;;  %v426_v17 = vmul.f32 %v3730_v14, %v2482_v36  ;;  %v3732_v3 = vstv %s3719_s28  ;;  %s3736_s1 = sld [smem:[#allocation95_spill]] }
 0x1f9   :  { %v429_v16 = vmul.f32 %v3732_v3, %v2484_v37  ;;  %v3733_v29 = vstv %s3720_s30  ;;  %v3735_v30 = vstv %s3721_s26  ;;  %v3737_v9 = vstv %s3722_s14  ;;  %s3739_s17 = sld [smem:[#allocation96_spill]] }
 0x1fa   :  { %v432_v19 = vmul.f32 %v3733_v29, %v2486_v38  ;;  %v435_v43 = vmul.f32 %v3735_v30, %v2491_v39  ;;  %v438_v44 = vmul.f32 %v3737_v9, %v2509_v41  ;;  %v3738_v35 = vstv %s3723_s5  ;;  %s3740_s19 = sld [smem:[#allocation97_spill]] }
 0x1fb   :  { %v441_v7 = vmul.f32 %v3738_v35, %v2511_v42  ;;  %v442_v45 = vadd.f32 %v417_v27, %v414_v53  ;;  %v656_v18 = vadd.f32 %v655_v10, %v654_v58  ;;  %v443_v46 = vadd.f32 %v423_v34, %v420_v26  ;;  %s3752_s26 = sld [smem:[#allocation103_spill]] }
 0x1fc   :  { %v444_v47 = vadd.f32 %v429_v16, %v426_v17  ;;  %v3743_v21 = vstv %s3726_s2  ;;  %v445_v50 = vadd.f32 %v435_v43, %v432_v19  ;;  %v3745_v48 = vstv %s3729_s21  ;;  %s3754_s14 = sld [smem:[#allocation104_spill]] }
 0x1fd   :  { %v759_v49 = vmul.f32 %v3743_v21, %v2443_v31  ;;  %v446_v62 = vadd.f32 %v441_v7, %v438_v44  ;;  %v762_v51 = vmul.f32 %v3745_v48, %v2450_v60  ;;  %v3746_v1 = vstv %s3731_s8  ;;  %s3755_s5 = sld [smem:[#allocation105_spill]] }
 0x1fe   :  { %v765_v20 = vmul.f32 %v3746_v1, %v2454_v24  ;;  %v2627_v23 = vadd.f32 %v656_v18, %v653_v52  ;;  %v447_v54 = vadd.f32 %v443_v46, %v442_v45  ;;  %v3748_v22 = vstv %s3734_s4  ;;  %s3756_s2 = sld [smem:[#allocation106_spill]] }
 0x1ff   :  { %v768_v55 = vmul.f32 %v3748_v22, %v2459_v33  ;;  %v3749_v25 = vstv %s3736_s1  ;;  %v448_v32 = vadd.f32 %v445_v50, %v444_v47  ;;  %v3751_v53 = vstv %s3739_s17  ;;  %s3757_s21 = sld [smem:[#allocation107_spill]] }
 0x200   :  { %v771_v57 = vmul.f32 %v3749_v25, %v2482_v36  ;;  %v774_v4 = vmul.f32 %v3751_v53, %v2484_v37  ;;  %v3753_v27 = vstv %s3740_s19  ;;  %v780_v52 = vmul.f32 %v779_v61, %v2491_v39  ;;  %660 = vadd.xlane.f32.xlu0 %v2627_v23  ;;  %s3758_s8 = sld [smem:[#allocation108_spill]] }
 0x201   :  { %v777_v58 = vmul.f32 %v3753_v27, %v2486_v38  ;;  %v783_v15 = vmul.f32 %v782_v0, %v2509_v41  ;;  %v786_v26 = vmul.f32 %v785_v2, %v2511_v42  ;;  %v787_v28 = vadd.f32 %v762_v51, %v759_v49  ;;  %s3760_s4 = sld [smem:[#allocation109_spill]] }
 0x202   :  { %v788_v34 = vadd.f32 %v768_v55, %v765_v20  ;;  %v449_v10 = vadd.f32 %v448_v32, %v447_v54  ;;  %v789_v14 = vadd.f32 %v774_v4, %v771_v57  ;;  %v552_v61 = vmul.f32 %v551_v5, %v2443_v31  ;;  %s3767_s1 = sld [smem:[#allocation111_spill]] }
 0x203   :  { %v790_v17 = vadd.f32 %v780_v52, %v777_v58  ;;  %v791_v3 = vadd.f32 %v786_v26, %v783_v15  ;;  %v555_v0 = vmul.f32 %v554_v40, %v2450_v60  ;;  %v3759_v29 = vstv %s3752_s26  ;;  %s3768_s17 = sld [smem:[#allocation112_spill]] }
 0x204   :  { %v792_v16 = vadd.f32 %v788_v34, %v787_v28  ;;  %v558_v2 = vmul.f32 %v3759_v29, %v2454_v24  ;;  %v2660_v19 = vadd.f32 %v449_v10, %v446_v62  ;;  %v3761_v43 = vstv %s3754_s14  ;;  %s3769_s19 = sld [smem:[#allocation113_spill]] }
 0x205   :  { %v793_v30 = vadd.f32 %v790_v17, %v789_v14  ;;  %v561_v9 = vmul.f32 %v3761_v43, %v2459_v33  ;;  %v3762_v44 = vstv %s3755_s5  ;;  %v3763_v5 = vstv %s3756_s2  ;;  %s3771_s7 = sld [smem:[#allocation114_spill]] }
 0x206   :  { %v564_v35 = vmul.f32 %v3762_v44, %v2482_v36  ;;  %v567_v7 = vmul.f32 %v3763_v5, %v2484_v37  ;;  %v3764_v45 = vstv %s3757_s21  ;;  %v3765_v18 = vstv %s2159_s23  ;;  %453 = vadd.xlane.f32.xlu1 %v2660_v19  ;;  %s3772_s24 = sld [smem:[#allocation115_spill]] }
 0x207   :  { %v570_v40 = vmul.f32 %v3764_v45, %v2486_v38  ;;  %v573_v46 = vmul.f32 %v3765_v18, %v2491_v39  ;;  %v3766_v47 = vstv %s3758_s8  ;;  %v794_v49 = vadd.f32 %v793_v30, %v792_v16  ;;  %s3773_s20 = sld [smem:[#allocation116_spill]] }
 0x208   :  { %v576_v21 = vmul.f32 %v3766_v47, %v2509_v41  ;;  %v3770_v50 = vstv %s2163_s12  ;;  %v580_v48 = vadd.f32 %v555_v0, %v552_v61  ;;  %v581_v51 = vadd.f32 %v561_v9, %v558_v2  ;;  %s3774_s23 = sld [smem:[#allocation117_spill]] }
 0x209   :  { %v579_v62 = vmul.f32 %v3770_v50, %v2511_v42  ;;  %v582_v1 = vadd.f32 %v567_v7, %v564_v35  ;;  %v583_v20 = vadd.f32 %v573_v46, %v570_v40  ;;  %v3775_v54 = vstv %s2165_s11  ;;  %s3778_s12 = sld [smem:[#allocation118_spill]] }
 0x20a   :  { %v897_v22 = vmul.f32 %v3775_v54, %v2443_v31  ;;  %v3776_v55 = vstv %s3760_s4  ;;  %v2690_v57 = vadd.f32 %v794_v49, %v791_v3  ;;  %v585_v53 = vadd.f32 %v581_v51, %v580_v48  ;;  %s3780_s28 = sld [smem:[#allocation119_spill]] }
 0x20b   :  { %v900_v25 = vmul.f32 %v3776_v55, %v2450_v60  ;;  %v584_v32 = vadd.f32 %v579_v62, %v576_v21  ;;  %v3777_v4 = vstv %s3623_s13  ;;  %v586_v58 = vadd.f32 %v583_v20, %v582_v1  ;;  %s3786_s11 = sld [smem:[#allocation121_spill]] }
 0x20c   :  { %v903_v27 = vmul.f32 %v3777_v4, %v2454_v24  ;;  %v3779_v52 = vstv %s3767_s1  ;;  %v3781_v26 = vstv %s3768_s17  ;;  %v3782_v34 = vstv %s3769_s19  ;;  %798 = vadd.xlane.f32.xlu0 %v2690_v57  ;;  %s3788_s13 = sld [smem:[#allocation122_spill]] }
 0x20d   :  { %v906_v15 = vmul.f32 %v3779_v52, %v2459_v33  ;;  %v909_v28 = vmul.f32 %v3781_v26, %v2482_v36  ;;  %v912_v10 = vmul.f32 %v3782_v34, %v2484_v37  ;;  %v3783_v14 = vstv %s3771_s7  ;;  %s3795_s30 = sld [smem:[#allocation123_spill]] }
 0x20e   :  { %v915_v17 = vmul.f32 %v3783_v14, %v2486_v38  ;;  %v3784_v61 = vstv %s3772_s24  ;;  %v3785_v16 = vstv %s3773_s20  ;;  %v3787_v29 = vstv %s3774_s23  ;;  %s2740_s26 = sld [smem:[#allocation11 + $0x63]] }
 0x20f   :  { %v918_v3 = vmul.f32 %v3784_v61, %v2491_v39  ;;  %v921_v0 = vmul.f32 %v3785_v16, %v2509_v41  ;;  %v924_v2 = vmul.f32 %v3787_v29, %v2511_v42  ;;  %v587_v30 = vadd.f32 %v586_v58, %v585_v53  ;;  %s2873_s14 = sld [smem:[#allocation13]] }
 0x210   :  { %v925_v43 = vadd.f32 %v900_v25, %v897_v22  ;;  %v926_v9 = vadd.f32 %v906_v15, %v903_v27  ;;  %v927_v44 = vadd.f32 %v912_v10, %v909_v28  ;;  %v3789_v7 = vstv %s3778_s12  ;;  %s2875_s5 = sld [smem:[#allocation13 + $0x2]] }
 0x211   :  { %v928_v35 = vadd.f32 %v918_v3, %v915_v17  ;;  %v929_v5 = vadd.f32 %v924_v2, %v921_v0  ;;  %v690_v45 = vmul.f32 %v3789_v7, %v2443_v31  ;;  %v3790_v40 = vstv %s3780_s28  ;;  %s2877_s2 = sld [smem:[#allocation13 + $0x1]] }
 0x212   :  { %v693_v18 = vmul.f32 %v3790_v40, %v2450_v60  ;;  %v2723_v46 = vadd.f32 %v587_v30, %v584_v32  ;;  %v930_v47 = vadd.f32 %v926_v9, %v925_v43  ;;  %v3791_v21 = vstv %s2254_s6  ;;  %s3803_s6 = sld [smem:[#allocation127_spill]] }
 0x213   :  { %v696_v49 = vmul.f32 %v3791_v21, %v2454_v24  ;;  %v3792_v50 = vstv %s3636_s9  ;;  %v931_v48 = vadd.f32 %v928_v35, %v927_v44  ;;  %v3793_v51 = vstv %s3786_s11  ;;  %s2879_s21 = sld [smem:[#allocation13 + $0x4]] }
 0x214   :  { %v699_v62 = vmul.f32 %v3792_v50, %v2459_v33  ;;  %v702_v1 = vmul.f32 %v3793_v51, %v2482_v36  ;;  %v3794_v20 = vstv %s2271_s0  ;;  %v3796_v22 = vstv %s2276_s16  ;;  %591 = vadd.xlane.f32.xlu1 %v2723_v46  ;;  %s3800_s0 = sld [smem:[#allocation124_spill]] }
 0x215   :  { %v705_v54 = vmul.f32 %v3794_v20, %v2484_v37  ;;  %v708_v55 = vmul.f32 %v3796_v22, %v2486_v38  ;;  %v3797_v25 = vstv %s2282_s18  ;;  %v3798_v53 = vstv %s3788_s13  ;;  %s3801_s16 = sld [smem:[#allocation126_spill]] }
 0x216   :  { %v711_v32 = vmul.f32 %v3797_v25, %v2491_v39  ;;  %v714_v4 = vmul.f32 %v3798_v53, %v2509_v41  ;;  %v3799_v27 = vstv %s2293_s15  ;;  %v718_v52 = vadd.f32 %v693_v18, %v690_v45  ;;  %s3810_s15 = sld [smem:[#allocation129_spill]] }
 0x217   :  { %v717_v58 = vmul.f32 %v3799_v27, %v2511_v42  ;;  %v932_v15 = vadd.f32 %v931_v48, %v930_v47  ;;  %v719_v26 = vadd.f32 %v699_v62, %v696_v49  ;;  %v720_v28 = vadd.f32 %v705_v54, %v702_v1  ;;  %3825 = sst [smem:[#allocation31_spill]] %s2875_s5 }
 0x218   :  { %v3802_v34 = vstv %s2298_s29  ;;  %v721_v14 = vadd.f32 %v711_v32, %v708_v55  ;;  %v3804_v61 = vstv %s2304_s10  ;;  %v3805_v16 = vstv %s3795_s30  ;;  %s3809_s29 = sld [smem:[#allocation110_spill]] }
 0x219   :  { %v828_v10 = vmul.f32 %v3802_v34, %v2443_v31  ;;  %v722_v17 = vadd.f32 %v717_v58, %v714_v4  ;;  %v831_v3 = vmul.f32 %v3804_v61, %v2450_v60  ;;  %v834_v0 = vmul.f32 %v3805_v16, %v2454_v24  ;;  %3826 = sst [smem:[#allocation32_spill]] %s2877_s2 }
 0x21a   :  { %v2761_v29 = vadd.f32 %v932_v15, %v929_v5  ;;  %v723_v2 = vadd.f32 %v719_v26, %v718_v52  ;;  %v3807_v30 = vstv %s2316_s27  ;;  %v3808_v9 = vstv %s2322_s3  ;;  %s3816_s3 = sld [smem:[#allocation120_spill]] }
 0x21b   :  { %v837_v43 = vmul.f32 %v3807_v30, %v2459_v33  ;;  %v840_v44 = vmul.f32 %v3808_v9, %v2482_v36  ;;  %v724_v35 = vadd.f32 %v721_v14, %v720_v28  ;;  %v3811_v7 = vstv %s2328_s25  ;;  %s2881_s8 = sld [smem:[#allocation13 + $0x3]] }
 0x21c   :  { %v843_v45 = vmul.f32 %v3811_v7, %v2484_v37  ;;  %v3812_v40 = vstv %s3800_s0  ;;  %v3813_v5 = vstv %s3642_s22  ;;  %936 = vadd.xlane.f32.xlu0 %v2761_v29  ;;  %v3815_v21 = vstv %s3801_s16  ;;  %s2883_s4 = sld [smem:[#allocation13 + $0x6]] }
 0x21d   :  { %v846_v18 = vmul.f32 %v3812_v40, %v2486_v38  ;;  %v849_v47 = vmul.f32 %v3813_v5, %v2491_v39  ;;  %v852_v49 = vmul.f32 %v3815_v21, %v2509_v41  ;;  %v3817_v50 = vstv %s3803_s6  ;;  %s2885_s1 = sld [smem:[#allocation13 + $0x5]] }
 0x21e   :  { %v855_v62 = vmul.f32 %v3817_v50, %v2511_v42  ;;  %v856_v48 = vadd.f32 %v831_v3, %v828_v10  ;;  %v857_v51 = vadd.f32 %v837_v43, %v834_v0  ;;  %v725_v1 = vadd.f32 %v724_v35, %v723_v2  ;;  %s2887_s17 = sld [smem:[#allocation13 + $0x8]] }
 0x21f   :  { %v858_v20 = vadd.f32 %v843_v45, %v840_v44  ;;  %v859_v54 = vadd.f32 %v849_v47, %v846_v18  ;;  %v966_v22 = vmul.f32 %v965_v63, %v2443_v31  ;;  %v3821_v25 = vstv %s3809_s29  ;;  %s2889_s19 = sld [smem:[#allocation13 + $0x7]] }
 0x220   :  { %v861_v55 = vadd.f32 %v857_v51, %v856_v48  ;;  %v969_v32 = vmul.f32 %v3821_v25, %v2450_v60  ;;  %v3823_v53 = vstv %s3810_s15  ;;  %v992_v27 = vstv %s2740_s26  ;;  %s2891_s7 = sld [smem:[#allocation13 + $0x9]] }
 0x221   :  { %v972_v4 = vmul.f32 %v3823_v53, %v2454_v24  ;;  %v2795_v58 = vadd.f32 %v725_v1, %v722_v17  ;;  %v862_v52 = vadd.f32 %v859_v54, %v858_v20  ;;  %v975_v15 = vmul.f32 %v974_v11, %v2459_v33  ;;  %3827 = sst [smem:[#allocation33_spill]] %s2881_s8 }
 0x222   :  { %v3824_v26 = vstv %s3816_s3  ;;  %v981_v63 = vmul.f32 %v980_v13, %v2484_v37  ;;  %v984_v31 = vmul.f32 %v983_v56, %v2486_v38  ;;  %v987_v60 = vmul.f32 %v986_v6, %v2491_v39  ;;  %3828 = sst [smem:[#allocation34_spill]] %s2883_s4 }
 0x223   :  { %v978_v28 = vmul.f32 %v3824_v26, %v2482_v36  ;;  %729 = vadd.xlane.f32.xlu1 %v2795_v58  ;;  %v860_v24 = vadd.f32 %v855_v62, %v852_v49  ;;  %v863_v34 = vadd.f32 %v862_v52, %v861_v55  ;;  %v994_v10 = vadd.f32 %v969_v32, %v966_v22  ;;  %3829 = sst [smem:[#allocation35_spill]] %s2885_s1 }
 0x224   :  { %v995_v14 = vadd.f32 %v975_v15, %v972_v4  ;;  %v990_v11 = vmul.f32 %v989_v8, %v2509_v41  ;;  %v993_v33 = vmul.f32 %v992_v27, %v2511_v42  ;;  %v997_v17 = vadd.f32 %v987_v60, %v984_v31  ;;  %3830 = sst [smem:[#allocation41_spill]] %s2887_s17 }
 0x225   :  { %v996_v36 = vadd.f32 %v981_v63, %v978_v28  ;;  %v2817_v13 = vadd.f32 %v863_v34, %v860_v24  ;;  %3831 = sst [smem:[#allocation36_spill]] %s2889_s19 }
 0x226   :  { %v999_v37 = vadd.f32 %v995_v14, %v994_v10  ;;  %v998_v6 = vadd.f32 %v993_v33, %v990_v11  ;;  %3832 = sst [smem:[#allocation42_spill]] %s2891_s7 }
 0x227   :  { %v1000_v56 = vadd.f32 %v997_v17, %v996_v36  ;;  %867 = vadd.xlane.f32.xlu1 %v2817_v13  ;;  %s2893_s24 = sld [smem:[#allocation14]] }
 0x228   :  { %s2895_s20 = sld [smem:[#allocation14 + $0x1]] }
 0x229   :  { %v1001_v38 = vadd.f32 %v1000_v56, %v999_v37  ;;  %s2897_s23 = sld [smem:[#allocation14 + $0x2]] }
 0x22a   :  { %s2899_s12 = sld [smem:[#allocation14 + $0x3]] }
 0x22b   :  { %v2820_v39 = vadd.f32 %v1001_v38, %v998_v6  ;;  %s2901_s28 = sld [smem:[#allocation14 + $0x4]] }
 0x22c   :  { %s2903_s11 = sld [smem:[#allocation14 + $0x5]] }
 0x22d   :  { %1005 = vadd.xlane.f32.xlu1 %v2820_v39  ;;  %3833 = sst [smem:[#allocation37_spill]] %s2893_s24 }
 0x22e   :  { %3834 = sst [smem:[#allocation43_spill]] %s2895_s20 }
 0x22f   :  { %3835 = sst [smem:[#allocation38_spill]] %s2897_s23 }
 0x230   :  { %3836 = sst [smem:[#allocation44_spill]] %s2899_s12 }
 0x231   :  { %3837 = sst [smem:[#allocation39_spill]] %s2901_s28 }
 0x232   :  { %3838 = sst [smem:[#allocation40_spill]] %s2903_s11 }
 0x233   :  { %s2905_s13 = sld [smem:[#allocation14 + $0x6]] }
 0x234   :  { %s2907_s30 = sld [smem:[#allocation14 + $0x7]] }
 0x235   :  { %s2909_s26 = sld [smem:[#allocation14 + $0x8]] }
 0x236   :  { %s2911_s0 = sld [smem:[#allocation14 + $0x9]] }
 0x237   :  { %s2913_s16 = sld [smem:[#allocation16 + $0xa]] }
 0x238   :  { %s2915_s6 = sld [smem:[#allocation16 + $0xb]] }
 0x239   :  { %3839 = sst [smem:[#allocation45_spill]] %s2905_s13 }
 0x23a   :  { %3840 = sst [smem:[#allocation46_spill]] %s2907_s30 }
 0x23b   :  { %3841 = sst [smem:[#allocation47_spill]] %s2909_s26 }
 0x23c   :  { %3842 = sst [smem:[#allocation51_spill]] %s2911_s0 }
 0x23d   :  { %3843 = sst [smem:[#allocation48_spill]] %s2913_s16 }
 0x23e   :  { %3844 = sst [smem:[#allocation52_spill]] %s2915_s6 }
 0x23f   :  { %s2917_s9 = sld [smem:[#allocation16 + $0xc]] }
 0x240   :  { %s2919_s29 = sld [smem:[#allocation16 + $0xd]] }
 0x241   :  { %s2921_s15 = sld [smem:[#allocation16 + $0xe]] }
 0x242   :  { %s2923_s10 = sld [smem:[#allocation16 + $0xf]] }
 0x243   :  { %s2925_s3 = sld [smem:[#allocation16 + $0x10]] }
 0x244   :  { %s2927_s27 = sld [smem:[#allocation16 + $0x11]] }
 0x245   :  { %3845 = sst [smem:[#allocation53_spill]] %s2917_s9 }
 0x246   :  { %3846 = sst [smem:[#allocation49_spill]] %s2919_s29 }
 0x247   :  { %3847 = sst [smem:[#allocation50_spill]] %s2921_s15 }
 0x248   :  { %3848 = sst [smem:[#allocation54_spill]] %s2923_s10 }
 0x249   :  { %3849 = sst [smem:[#allocation55_spill]] %s2925_s3 }
 0x24a   :  { %3850 = sst [smem:[#allocation56_spill]] %s2927_s27 }
 0x24b   :  { %s2929_s25 = sld [smem:[#allocation16 + $0x12]] }
 0x24c   :  { %s2931_s18 = sld [smem:[#allocation16 + $0x13]] }
 0x24d   :  { %s2933_s22 = sld [smem:[#allocation16]] }
 0x24e   :  { %s2935_s15 = sld [smem:[#allocation16 + $0x1]] }
 0x24f   :  { %s2937_s3 = sld [smem:[#allocation16 + $0x2]] }
 0x250   :  { %s2939_s27 = sld [smem:[#allocation16 + $0x3]] }
 0x251   :  { %3851 = sst [smem:[#allocation57_spill]] %s2929_s25 }
 0x252   :  { %3852 = sst [smem:[#allocation58_spill]] %s2931_s18 }
 0x253   :  { %3853 = sst [smem:[#allocation61_spill]] %s2933_s22 }
 0x254   :  { %s2941_s22 = sld [smem:[#allocation16 + $0x4]] }
 0x255   :  { %3854 = sst [smem:[#allocation62_spill]] %s2937_s3 }
 0x256   :  { %3855 = sst [smem:[#allocation63_spill]] %s2939_s27 }
 0x257   :  { %s2943_s18 = sld [smem:[#allocation16 + $0x5]] }
 0x258   :  { %s2945_s3 = sld [smem:[#allocation16 + $0x6]] }
 0x259   :  { %s2950_s27 = sld [smem:[#allocation16 + $0x7]] }
 0x25a   :  { %s2976_s7 = sld [smem:[#allocation16 + $0x22]] }
 0x25b   :  { %s3867_s30 = sld [smem:[#allocation55_spill]] }
 0x25c   :  { %s3014_s10 = sld [smem:[#allocation16 + $0x18]] }
 0x25d   :  { %3856 = sst [smem:[#allocation59_spill]] %s2943_s18 }
 0x25e   :  { %3857 = sst [smem:[#allocation60_spill]] %s2945_s3 }
 0x25f   :  { %3858 = sst [smem:[#allocation64_spill]] %s2950_s27 }
 0x260   :  { %s2953_s18 = sld [smem:[#allocation16 + $0x8]] }
 0x261   :  { %s3022_s0 = sld [smem:[#allocation16 + $0x1a]] }
 0x262   :  { %3877 = sst [smem:[#allocation75_spill]] %s3014_s10 }
 0x263   :  { %s3025_s25 = sld [smem:[#allocation16 + $0x1b]] }
 0x264   :  { %s3038_s27 = sld [smem:[#allocation16 + $0x28]] }
 0x266   :  { %3859 = sst [smem:[#allocation65_spill]] %s2953_s18 }
 0x267   :  { %s3067_s18 = sld [smem:[#allocation16 + $0x2e]] }
 0x27b   :  { %v523_v61 = vpop.xlane.xlu0 %522 }
 0x27c   :  { %v524_v3 = vrot.slane %v523_v61, 4 }
 0x27e   :  { %v525_v16 = vadd.f32 %v524_v3, %v523_v61 }
 0x280   :  { %v385_v8 = vpop.xlane.xlu1 %384  ;;  %v526_v41 = vrot.slane %v525_v16, 2 }
 0x281   :  { %v386_v42 = vrot.slane %v385_v8, 4 }
 0x282   :  { %v527_v0 = vadd.f32 %v526_v41, %v525_v16 }
 0x283   :  { %v387_v2 = vadd.f32 %v386_v42, %v385_v8 }
 0x284   :  { %v528_v30 = vrot.slane %v527_v0, 1 }
 0x285   :  { %v388_v43 = vrot.slane %v387_v2, 2 }
 0x286   :  { %v529_v45 = vadd.f32 %v528_v30, %v527_v0 }
 0x287   :  { %v389_v35 = vadd.f32 %v388_v43, %v387_v2 }
 0x288   :  { %v530_v48 = vmul.f32 0.0009765625, %v529_v45 }
 0x289   :  { %v661_v9 = vpop.xlane.xlu0 %660  ;;  %v390_v40 = vrot.slane %v389_v35, 1 }
 0x28a   :  { %v662_v44 = vrot.slane %v661_v9, 4  ;;  %v2829_v4 = vsub.f32 %v2564_v59, %v530_v48 }
 0x28b   :  { %v391_v47 = vadd.f32 %v390_v40, %v389_v35 }
 0x28c   :  { %v663_v7 = vadd.f32 %v662_v44, %v661_v9 }
 0x28d   :  { %v392_v62 = vmul.f32 0.0009765625, %v391_v47 }
 0x28e   :  { %v664_v18 = vrot.slane %v663_v7, 2 }
 0x28f   :  { %v454_v5 = vpop.xlane.xlu1 %453  ;;  %v2824_v22 = vsub.f32 %v2591_v12, %v392_v62  ;;  %v532_v12 = vmul.f32 %v2829_v4, %v2829_v4 }
 0x290   :  { %v455_v21 = vrot.slane %v454_v5, 4  ;;  %v665_v49 = vadd.f32 %v664_v18, %v663_v7 }
 0x291   :  { %v394_v53 = vmul.f32 %v2824_v22, %v2824_v22 }
 0x292   :  { %v456_v50 = vadd.f32 %v455_v21, %v454_v5  ;;  %v666_v51 = vrot.slane %v665_v49, 1 }
 0x293   :  { %395 = vadd.xlane.f32.xlu0 %v394_v53 }
 0x294   :  { %v457_v20 = vrot.slane %v456_v50, 2  ;;  %v667_v55 = vadd.f32 %v666_v51, %v665_v49 }
 0x295   :  { %v799_v1 = vpop.xlane.xlu0 %798 }
 0x296   :  { %v800_v54 = vrot.slane %v799_v1, 4  ;;  %v458_v25 = vadd.f32 %v457_v20, %v456_v50  ;;  %v668_v27 = vmul.f32 0.0009765625, %v667_v55 }
 0x297   :  { %533 = vadd.xlane.f32.xlu0 %v532_v12 }
 0x298   :  { %v801_v32 = vadd.f32 %v800_v54, %v799_v1  ;;  %v459_v52 = vrot.slane %v458_v25, 1  ;;  %v2834_v60 = vsub.f32 %v2627_v23, %v668_v27 }
 0x29a   :  { %v802_v15 = vrot.slane %v801_v32, 2  ;;  %v460_v63 = vadd.f32 %v459_v52, %v458_v25  ;;  %v670_v17 = vmul.f32 %v2834_v60, %v2834_v60 }
 0x29c   :  { %v803_v31 = vadd.f32 %v802_v15, %v801_v32  ;;  %v461_v10 = vmul.f32 0.0009765625, %v460_v63  ;;  %671 = vadd.xlane.f32.xlu0 %v670_v17 }
 0x29d   :  { %v592_v26 = vpop.xlane.xlu1 %591 }
 0x29e   :  { %v593_v28 = vrot.slane %v592_v26, 4  ;;  %v804_v34 = vrot.slane %v803_v31, 1  ;;  %v2837_v36 = vsub.f32 %v2660_v19, %v461_v10 }
 0x2a0   :  { %v594_v24 = vadd.f32 %v593_v28, %v592_v26  ;;  %v805_v11 = vadd.f32 %v804_v34, %v803_v31  ;;  %v463_v23 = vmul.f32 %v2837_v36, %v2837_v36 }
 0x2a2   :  { %v595_v59 = vrot.slane %v594_v24, 2  ;;  %v806_v6 = vmul.f32 0.0009765625, %v805_v11  ;;  %464 = vadd.xlane.f32.xlu1 %v463_v23 }
 0x2a4   :  { %v596_v37 = vadd.f32 %v595_v59, %v594_v24  ;;  %v2844_v16 = vsub.f32 %v2690_v57, %v806_v6 }
 0x2a5   :  { %v937_v14 = vpop.xlane.xlu0 %936 }
 0x2a6   :  { %v938_v33 = vrot.slane %v937_v14, 4  ;;  %v597_v38 = vrot.slane %v596_v37, 1  ;;  %v808_v42 = vmul.f32 %v2844_v16, %v2844_v16 }
 0x2a8   :  { %v939_v56 = vadd.f32 %v938_v33, %v937_v14  ;;  %v598_v8 = vadd.f32 %v597_v38, %v596_v37  ;;  %809 = vadd.xlane.f32.xlu0 %v808_v42  ;;  %v544_v42 = vstv %s2875_s5  ;;  %s2958_s5 = sld [smem:[#allocation16 + $0x9]] }
 0x2aa   :  { %v940_v61 = vrot.slane %v939_v56, 2  ;;  %v599_v2 = vmul.f32 0.0009765625, %v598_v8 }
 0x2ac   :  { %v730_v3 = vpop.xlane.xlu1 %729  ;;  %v941_v41 = vadd.f32 %v940_v61, %v939_v56  ;;  %v2849_v35 = vsub.f32 %v2723_v46, %v599_v2 }
 0x2ad   :  { %v731_v19 = vrot.slane %v730_v3, 4 }
 0x2ae   :  { %v942_v30 = vrot.slane %v941_v41, 1  ;;  %v601_v40 = vmul.f32 %v2849_v35, %v2849_v35  ;;  %3860 = sst [smem:[#allocation66_spill]] %s2958_s5 }
 0x2af   :  { %v732_v0 = vadd.f32 %v731_v19, %v730_v3  ;;  %v406_v19 = vstv %s2873_s14  ;;  %s3051_s14 = sld [smem:[#allocation16 + $0x2b]] }
 0x2b0   :  { %v868_v43 = vpop.xlane.xlu1 %867  ;;  %v943_v7 = vadd.f32 %v942_v30, %v941_v41  ;;  %602 = vadd.xlane.f32.xlu1 %v601_v40  ;;  %v751_v40 = vstv %s2885_s1  ;;  %s2969_s1 = sld [smem:[#allocation16 + $0x20]] }
 0x2b1   :  { %v733_v9 = vrot.slane %v732_v0, 2  ;;  %v869_v44 = vrot.slane %v868_v43, 4  ;;  %s3908_s5 = sld [smem:[#allocation59_spill]] }
 0x2b2   :  { %v944_v18 = vmul.f32 0.0009765625, %v943_v7  ;;  %v613_v7 = vstv %s2881_s8  ;;  %s2965_s8 = sld [smem:[#allocation16 + $0x1f]] }
 0x2b3   :  { %v734_v45 = vadd.f32 %v733_v9, %v732_v0  ;;  %v870_v57 = vadd.f32 %v869_v44, %v868_v43  ;;  %v475_v0 = vstv %s2877_s2  ;;  %v682_v9 = vstv %s2879_s21  ;;  %s2961_s2 = sld [smem:[#allocation16 + $0x1e]] }
 0x2b4   :  { %v2854_v50 = vsub.f32 %v2761_v29, %v944_v18  ;;  %s3909_s21 = sld [smem:[#allocation42_spill]] }
 0x2b5   :  { %v735_v5 = vrot.slane %v734_v45, 1  ;;  %v871_v47 = vrot.slane %v870_v57, 2 }
 0x2b6   :  { %v1006_v21 = vpop.xlane.xlu1 %1005  ;;  %v946_v46 = vmul.f32 %v2854_v50, %v2854_v50 }
 0x2b7   :  { %v1007_v49 = vrot.slane %v1006_v21, 4  ;;  %v736_v62 = vadd.f32 %v735_v5, %v734_v45  ;;  %v872_v48 = vadd.f32 %v871_v47, %v870_v57  ;;  %v820_v45 = vstv %s2883_s4  ;;  %s3872_s4 = sld [smem:[#allocation62_spill]] }
 0x2b8   :  { %947 = vadd.xlane.f32.xlu0 %v946_v46 }
 0x2b9   :  { %v1008_v51 = vadd.f32 %v1007_v49, %v1006_v21  ;;  %v873_v1 = vrot.slane %v872_v48, 1  ;;  %v737_v20 = vmul.f32 0.0009765625, %v736_v62  ;;  %v958_v21 = vstv %s2887_s17  ;;  %s2973_s17 = sld [smem:[#allocation16 + $0x21]] }
 0x2bb   :  { %v1009_v54 = vrot.slane %v1008_v51, 2  ;;  %v874_v55 = vadd.f32 %v873_v1, %v872_v48  ;;  %v2859_v25 = vsub.f32 %v2795_v58, %v737_v20  ;;  %v889_v48 = vstv %s2889_s19  ;;  %s2979_s19 = sld [smem:[#allocation16 + $0x23]] }
 0x2bd   :  { %v1010_v32 = vadd.f32 %v1009_v54, %v1008_v51  ;;  %v739_v53 = vmul.f32 %v2859_v25, %v2859_v25  ;;  %v875_v29 = vmul.f32 0.0009765625, %v874_v55  ;;  %v409_v54 = vstv %s2893_s24  ;;  %s3001_s24 = sld [smem:[#allocation16 + $0x15]] }
 0x2be   :  { %v478_v55 = vstv %s2895_s20  ;;  %s2997_s20 = sld [smem:[#allocation16 + $0x14]] }
 0x2bf   :  { %v1011_v27 = vrot.slane %v1010_v32, 1  ;;  %740 = vadd.xlane.f32.xlu1 %v739_v53  ;;  %v2864_v52 = vsub.f32 %v2817_v13, %v875_v29  ;;  %v547_v29 = vstv %s2897_s23  ;;  %3861 = sst [smem:[#allocation67_spill]] %s2973_s17 }
 0x2c0   :  { %s3017_s23 = sld [smem:[#allocation16 + $0x19]] }
 0x2c1   :  { %v1012_v15 = vadd.f32 %v1011_v27, %v1010_v32  ;;  %v877_v26 = vmul.f32 %v2864_v52, %v2864_v52  ;;  %v616_v27 = vstv %s2899_s12  ;;  %3862 = sst [smem:[#allocation68_spill]] %s2979_s19 }
 0x2c2   :  { %s2983_s12 = sld [smem:[#allocation16 + $0x24]] }
 0x2c3   :  { %v1013_v28 = vmul.f32 0.0009765625, %v1012_v15  ;;  %878 = vadd.xlane.f32.xlu1 %v877_v26  ;;  %s3907_s19 = sld [smem:[#allocation54_spill]] }
 0x2c5   :  { %v2869_v63 = vsub.f32 %v2820_v39, %v1013_v28 }
 0x2c7   :  { %v1015_v58 = vmul.f32 %v2869_v63, %v2869_v63 }
 0x2c8   :  { %3863 = sst [smem:[#allocation69_spill]] %s2983_s12 }
 0x2c9   :  { %1016 = vadd.xlane.f32.xlu1 %v1015_v58  ;;  %v685_v58 = vstv %s2901_s28  ;;  %s2987_s28 = sld [smem:[#allocation16 + $0x25]] }
 0x2cf   :  { %3864 = sst [smem:[#allocation70_spill]] %s2987_s28 }
 0x2d0   :  { %s3057_s28 = sld [smem:[#allocation16 + $0x2c]] }
 0x31c   :  { %v396_v13 = vpop.xlane.xlu0 %395 }
 0x31d   :  { %v397_v39 = vrot.slane %v396_v13, 4 }
 0x31f   :  { %v398_v31 = vadd.f32 %v397_v39, %v396_v13 }
 0x320   :  { %v534_v12 = vpop.xlane.xlu0 %533 }
 0x321   :  { %v399_v24 = vrot.slane %v398_v31, 2  ;;  %v535_v34 = vrot.slane %v534_v12, 4 }
 0x323   :  { %v400_v10 = vadd.f32 %v399_v24, %v398_v31  ;;  %v536_v59 = vadd.f32 %v535_v34, %v534_v12  ;;  %v754_v31 = vstv %s2903_s11  ;;  %v823_v34 = vstv %s2905_s13  ;;  %s3865_s11 = sld [smem:[#allocation50_spill]] }
 0x324   :  { %s2990_s13 = sld [smem:[#allocation16 + $0x26]] }
 0x325   :  { %v672_v14 = vpop.xlane.xlu0 %671  ;;  %v401_v11 = vrot.slane %v400_v10, 1  ;;  %v537_v33 = vrot.slane %v536_v59, 2 }
 0x326   :  { %v673_v17 = vrot.slane %v672_v14, 4 }
 0x327   :  { %v402_v56 = vadd.f32 %v401_v11, %v400_v10  ;;  %v538_v23 = vadd.f32 %v537_v33, %v536_v59  ;;  %v961_v33 = vstv %s2909_s26  ;;  %s2993_s26 = sld [smem:[#allocation16 + $0x27]] }
 0x328   :  { %v674_v38 = vadd.f32 %v673_v17, %v672_v14  ;;  %v1250_v17 = vstv %s2973_s17  ;;  %s3047_s17 = sld [smem:[#allocation16 + $0x2a]] }
 0x329   :  { %v539_v61 = vrot.slane %v538_v23, 1  ;;  %v403_v41 = vmul.f32 0.0009765625, %v402_v56 }
 0x32a   :  { %v675_v8 = vrot.slane %v674_v38, 2  ;;  %3866 = sst [smem:[#allocation71_spill]] %s2990_s13  ;;  %v1265_v51 = vstv %s2990_s13 }
 0x32b   :  { %v465_v37 = vpop.xlane.xlu1 %464  ;;  %v540_v30 = vadd.f32 %v539_v61, %v538_v23  ;;  %v404_v49 = vadd.f32 1e-05, %v403_v41  ;;  %v1103_v23 = vstv %s2913_s16  ;;  %v1106_v61 = vstv %s2915_s6  ;;  %s3871_s16 = sld [smem:[#allocation61_spill]] }
 0x32c   :  { %v466_v6 = vrot.slane %v465_v37, 4  ;;  %v676_v44 = vadd.f32 %v675_v8, %v674_v38  ;;  %v1109_v8 = vstv %s2917_s9  ;;  %v1112_v41 = vstv %s2919_s29  ;;  %s3873_s6 = sld [smem:[#allocation63_spill]] }
 0x32d   :  { %v541_v18 = vmul.f32 0.0009765625, %v540_v30  ;;  %1663 = vrsqrt.f32 %v404_v49  ;;  %3869 = sst [smem:[#allocation72_spill]] %s2993_s26 }
 0x32e   :  { %v467_v3 = vadd.f32 %v466_v6, %v465_v37  ;;  %v677_v47 = vrot.slane %v676_v44, 1  ;;  %s3006_s9 = sld [smem:[#allocation16 + $0x16]] }
 0x32f   :  { %v542_v15 = vadd.f32 1e-05, %v541_v18  ;;  %s3030_s29 = sld [smem:[#allocation16 + $0x1c]] }
 0x330   :  { %v468_v43 = vrot.slane %v467_v3, 2  ;;  %v678_v1 = vadd.f32 %v677_v47, %v676_v44  ;;  %v1259_v47 = vstv %s2983_s12  ;;  %s3061_s13 = sld [smem:[#allocation16 + $0x2d]] }
 0x331   :  { %v810_v2 = vpop.xlane.xlu0 %809  ;;  %1665 = vrsqrt.f32 %v542_v15  ;;  %v1037_v15 = vstv %s2935_s15  ;;  %s3071_s26 = sld [smem:[#allocation16 + $0x2f]] }
 0x332   :  { %v811_v57 = vrot.slane %v810_v2, 4  ;;  %v469_v5 = vadd.f32 %v468_v43, %v467_v3  ;;  %v679_v28 = vmul.f32 0.0009765625, %v678_v1  ;;  %v1115_v43 = vstv %s3865_s11  ;;  %s3009_s11 = sld [smem:[#allocation16 + $0x17]] }
 0x333   :  { %s3076_s12 = sld [smem:[#allocation16 + $0x30]] }
 0x334   :  { %v812_v62 = vadd.f32 %v811_v57, %v810_v2  ;;  %v470_v46 = vrot.slane %v469_v5, 1  ;;  %v680_v24 = vadd.f32 1e-05, %v679_v28  ;;  %3874 = sst [smem:[#allocation73_spill]] %s3006_s9 }
 0x335   :  { %s1630_s15 = sld [smem:[#allocation20 + $0x4]] }
 0x336   :  { %v813_v53 = vrot.slane %v812_v62, 2  ;;  %v471_v26 = vadd.f32 %v470_v46, %v469_v5  ;;  %1667 = vrsqrt.f32 %v680_v24  ;;  %v1121_v5 = vstv %s3867_s30  ;;  %s3043_s30 = sld [smem:[#allocation16 + $0x29]] }
 0x338   :  { %v814_v39 = vadd.f32 %v813_v53, %v812_v62  ;;  %v472_v12 = vmul.f32 0.0009765625, %v471_v26  ;;  %3876 = sst [smem:[#allocation74_spill]] %s3009_s11  ;;  %v1034_v53 = vstv %s3871_s16  ;;  %v1040_v26 = vstv %s3872_s4 }
 0x339   :  { %v603_v20 = vpop.xlane.xlu1 %602  ;;  %s3263_s16 = sld [smem:[#allocation19 + $0x3]] }
 0x33a   :  { %v604_v32 = vrot.slane %v603_v20, 4  ;;  %v815_v14 = vrot.slane %v814_v39, 1  ;;  %v473_v37 = vadd.f32 1e-05, %v472_v12  ;;  %s3271_s4 = sld [smem:[#allocation20 + $0x1]] }
 0x33c   :  { %v605_v13 = vadd.f32 %v604_v32, %v603_v20  ;;  %v816_v38 = vadd.f32 %v815_v14, %v814_v39  ;;  %1669 = vrsqrt.f32 %v473_v37  ;;  %v1043_v39 = vstv %s3873_s6  ;;  %s3917_s6 = sld [smem:[#allocation64_spill]] }
 0x33d   :  { %v1247_v20 = vstv %s2969_s1  ;;  %v1310_v14 = vstv %s3038_s27  ;;  %s3930_s27 = sld [smem:[#allocation66_spill]] }
 0x33e   :  { %v606_v59 = vrot.slane %v605_v13, 2  ;;  %v817_v30 = vmul.f32 0.0009765625, %v816_v38  ;;  %v1253_v38 = vstv %s2976_s7  ;;  %s3273_s1 = sld [smem:[#allocation20 + $0x2]] }
 0x340   :  { %v607_v6 = vadd.f32 %v606_v59, %v605_v13  ;;  %v818_v46 = vadd.f32 1e-05, %v817_v30  ;;  %v1046_v59 = vstv %s2941_s22  ;;  %s3906_s22 = sld [smem:[#allocation46_spill]] }
 0x341   :  { %v948_v11 = vpop.xlane.xlu0 %947 }
 0x342   :  { %v949_v56 = vrot.slane %v948_v11, 4  ;;  %v608_v2 = vrot.slane %v607_v6, 1  ;;  %1671 = vrsqrt.f32 %v818_v46 }
 0x344   :  { %v950_v3 = vadd.f32 %v949_v56, %v948_v11  ;;  %v609_v62 = vadd.f32 %v608_v2, %v607_v6  ;;  %v1052_v11 = vstv %s2945_s3  ;;  %s3033_s3 = sld [smem:[#allocation16 + $0x1d]] }
 0x346   :  { %v951_v18 = vrot.slane %v950_v3, 2  ;;  %v610_v28 = vmul.f32 0.0009765625, %v609_v62 }
 0x348   :  { %v741_v57 = vpop.xlane.xlu1 %740  ;;  %v952_v32 = vadd.f32 %v951_v18, %v950_v3  ;;  %v611_v37 = vadd.f32 1e-05, %v610_v28  ;;  %v1664_v3 = vpop.eup %1663  ;;  %v1241_v18 = vstv %s2961_s2  ;;  %s3265_s2 = sld [smem:[#allocation17 + $0x4]] }
 0x349   :  { %v742_v1 = vrot.slane %v741_v57, 4 }
 0x34a   :  { %v953_v12 = vrot.slane %v952_v32, 1  ;;  %1673 = vrsqrt.f32 %v611_v37 }
 0x34b   :  { %v743_v13 = vadd.f32 %v742_v1, %v741_v57  ;;  %v1244_v1 = vstv %s2965_s8  ;;  %s3269_s8 = sld [smem:[#allocation20]] }
 0x34c   :  { %v879_v24 = vpop.xlane.xlu1 %878  ;;  %v954_v2 = vadd.f32 %v953_v12, %v952_v32  ;;  %v1666_v32 = vpop.eup %1665  ;;  %v407_v12 = vmul.f32 %v1664_v3, %v406_v19 }
 0x34d   :  { %v744_v56 = vrot.slane %v743_v13, 2  ;;  %v880_v6 = vrot.slane %v879_v24, 4 }
 0x34e   :  { %v955_v28 = vmul.f32 0.0009765625, %v954_v2  ;;  %v408_v44 = vmul.f32 %v407_v12, %v2824_v22  ;;  %v1181_v12 = vstv %s3009_s11  ;;  %s3910_s11 = sld [smem:[#allocation68_spill]] }
 0x34f   :  { %v745_v62 = vadd.f32 %v744_v56, %v743_v13  ;;  %v881_v46 = vadd.f32 %v880_v6, %v879_v24  ;;  %v1668_v56 = vpop.eup %1667  ;;  %v545_v24 = vmul.f32 %v1666_v32, %v544_v42  ;;  %v1175_v42 = vstv %s3001_s24  ;;  %s3277_s24 = sld [smem:[#allocation20 + $0x3]] }
 0x350   :  { %v956_v6 = vadd.f32 1e-05, %v955_v28  ;;  %v1670_v49 = vpop.eup %1669 }
 0x351   :  { %v746_v57 = vrot.slane %v745_v62, 1  ;;  %v882_v37 = vrot.slane %v881_v46, 2  ;;  %v476_v28 = vmul.f32 %v1670_v49, %v475_v0  ;;  %v1178_v0 = vstv %s3006_s9  ;;  %s3081_s9 = sld [smem:[#allocation16 + $0x31]] }
 0x352   :  { %v1017_v13 = vpop.xlane.xlu1 %1016  ;;  %1675 = vrsqrt.f32 %v956_v6  ;;  %v1184_v6 = vstv %s3014_s10  ;;  %s3918_s10 = sld [smem:[#allocation70_spill]] }
 0x353   :  { %v1018_v2 = vrot.slane %v1017_v13, 4  ;;  %v747_v19 = vadd.f32 %v746_v57, %v745_v62  ;;  %v883_v3 = vadd.f32 %v882_v37, %v881_v46  ;;  %v1172_v62 = vstv %s2997_s20  ;;  %s3267_s20 = sld [smem:[#allocation19 + $0x4]] }
 0x354   :  { %v683_v46 = vmul.f32 %v1668_v56, %v682_v9  ;;  %v477_v49 = vmul.f32 %v476_v28, %v2837_v36  ;;  %v546_v9 = vmul.f32 %v545_v24, %v2829_v4  ;;  %v1193_v24 = vstv %s3025_s25  ;;  %s3261_s25 = sld [smem:[#allocation19 + $0x2]] }
 0x355   :  { %v1019_v30 = vadd.f32 %v1018_v2, %v1017_v13  ;;  %v748_v10 = vmul.f32 0.0009765625, %v747_v19  ;;  %v884_v57 = vrot.slane %v883_v3, 1  ;;  %v1672_v13 = vpop.eup %1671  ;;  %v1187_v2 = vstv %s3017_s23  ;;  %s3929_s23 = sld [smem:[#allocation58_spill]] }
 0x356   :  { %v1190_v19 = vstv %s3022_s0  ;;  %v684_v4 = vmul.f32 %v683_v46, %v2834_v60  ;;  %v821_v28 = vmul.f32 %v1672_v13, %v820_v45  ;;  %v1313_v60 = vstv %s3043_s30  ;;  %s3911_s30 = sld [smem:[#allocation57_spill]] }
 0x357   :  { %v1020_v37 = vrot.slane %v1019_v30, 2  ;;  %v749_v32 = vadd.f32 1e-05, %v748_v10  ;;  %v885_v22 = vadd.f32 %v884_v57, %v883_v3  ;;  %v410_v10 = vadd.f32 %v409_v54, %v408_v44  ;;  %v1674_v54 = vpop.eup %1673  ;;  %s3920_s0 = sld [smem:[#allocation51_spill]] }
 0x358   :  { %v614_v46 = vmul.f32 %v1674_v54, %v613_v7  ;;  %v1316_v45 = vstv %s3047_s17  ;;  %v1331_v54 = vstv %s3071_s26  ;;  %s3912_s17 = sld [smem:[#allocation65_spill]] }
 0x359   :  { %v1021_v56 = vadd.f32 %v1020_v37, %v1019_v30  ;;  %1677 = vrsqrt.f32 %v749_v32  ;;  %v886_v36 = vmul.f32 0.0009765625, %v885_v22  ;;  %v479_v37 = vadd.f32 %v478_v55, %v477_v49  ;;  %s3259_s26 = sld [smem:[#allocation17 + $0x3]] }
 0x35a   :  { %v1199_v32 = vstv %s3033_s3  ;;  %v548_v22 = vadd.f32 %v547_v29, %v546_v9  ;;  %v411_v3 = vmax.f32 %v410_v10, 0.0  ;;  %v686_v55 = vadd.f32 %v685_v58, %v684_v4  ;;  %s1590_s3 = sld [smem:[#allocation19 + $0x1]] }
 0x35b   :  { %v1022_v30 = vrot.slane %v1021_v56, 1  ;;  %v887_v57 = vadd.f32 1e-05, %v886_v36  ;;  %v1319_v49 = vstv %s3051_s14  ;;  %v615_v29 = vmul.f32 %v614_v46, %v2849_v35 }
 0x35c   :  { %v822_v9 = vmul.f32 %v821_v28, %v2844_v16  ;;  %v480_v7 = vmax.f32 %v479_v37, 0.0  ;;  %v1325_v36 = vstv %s3061_s13  ;;  %v1104_v35 = vmul.f32 %v1103_v23, %v411_v3  ;;  %s1589_s13 = sld [smem:[#allocation17 + $0x1]] }
 0x35d   :  { %v1023_v44 = vadd.f32 %v1022_v30, %v1021_v56  ;;  %1679 = vrsqrt.f32 %v887_v57  ;;  %v1322_v56 = vstv %s3057_s28  ;;  %v549_v30 = vmax.f32 %v548_v22, 0.0  ;;  %s3915_s28 = sld [smem:[#allocation56_spill]] }
 0x35e   :  { %v1328_v57 = vstv %s3067_s18  ;;  %v617_v4 = vadd.f32 %v616_v27, %v615_v29  ;;  %v1334_v16 = vstv %s3076_s12  ;;  %v1337_v28 = vstv %s3081_s9  ;;  %s3931_s18 = sld [smem:[#allocation72_spill]] }
 0x35f   :  { %v1024_v13 = vmul.f32 0.0009765625, %v1023_v44  ;;  %v1676_v58 = vpop.eup %1675  ;;  %v687_v44 = vmax.f32 %v686_v55, 0.0  ;;  %v1035_v22 = vmul.f32 %v1034_v53, %v411_v3  ;;  %v824_v46 = vadd.f32 %v823_v34, %v822_v9  ;;  %s1072_s12 = sld [smem:[#allocation17]] }
 0x360   :  { %v959_v37 = vmul.f32 %v1676_v58, %v958_v21  ;;  %v1107_v27 = vmul.f32 %v1106_v61, %v480_v7  ;;  %v1242_v23 = vmul.f32 %v1241_v18, %v411_v3  ;;  %v618_v29 = vmax.f32 %v617_v4, 0.0  ;;  %s1073_s9 = sld [smem:[#allocation19]] }
 0x361   :  { %v1025_v10 = vadd.f32 1e-05, %v1024_v13  ;;  %v1173_v13 = vmul.f32 %v1172_v62, %v411_v3  ;;  %v1110_v21 = vmul.f32 %v1109_v8, %v549_v30  ;;  %v1038_v55 = vmul.f32 %v1037_v15, %v480_v7 }
 0x362   :  { %v1245_v53 = vmul.f32 %v1244_v1, %v480_v7  ;;  %v960_v34 = vmul.f32 %v959_v37, %v2854_v50  ;;  %v1041_v9 = vmul.f32 %v1040_v26, %v549_v30  ;;  %v1248_v61 = vmul.f32 %v1247_v20, %v549_v30 }
 0x363   :  { %1681 = vrsqrt.f32 %v1025_v10  ;;  %v1176_v18 = vmul.f32 %v1175_v42, %v480_v7  ;;  %v1116_v10 = vmul.f32 %v1115_v43, %v687_v44  ;;  %v1047_v8 = vmul.f32 %v1046_v59, %v687_v44 }
 0x364   :  { %v1254_v15 = vmul.f32 %v1253_v38, %v687_v44  ;;  %v1179_v58 = vmul.f32 %v1178_v0, %v549_v30  ;;  %v825_v50 = vmax.f32 %v824_v46, 0.0  ;;  %v1132_v26 = vadd.f32 %v1107_v27, %v1104_v35 }
 0x365   :  { %v1185_v20 = vmul.f32 %v1184_v6, %v687_v44  ;;  %v1113_v42 = vmul.f32 %v1112_v41, %v618_v29  ;;  %v1044_v43 = vmul.f32 %v1043_v39, %v618_v29  ;;  %v1063_v4 = vadd.f32 %v1038_v55, %v1035_v22 }
 0x366   :  { %v1678_v62 = vpop.eup %1677  ;;  %v1270_v59 = vadd.f32 %v1245_v53, %v1242_v23  ;;  %v1251_v0 = vmul.f32 %v1250_v17, %v618_v29  ;;  %v3159_v35 = vadd.f32 %v1176_v18, %v1173_v13  ;;  %v1311_v6 = vmul.f32 %v1310_v14, %v411_v3 }
 0x367   :  { %v752_v1 = vmul.f32 %v1678_v62, %v751_v40  ;;  %v962_v40 = vadd.f32 %v961_v33, %v960_v34  ;;  %v1314_v46 = vmul.f32 %v1313_v60, %v480_v7  ;;  %v3161_v41 = vmul.f32 %v1316_v45, %v549_v30 }
 0x368   :  { %v3163_v39 = vmul.f32 %v1322_v56, %v687_v44  ;;  %v1122_v33 = vmul.f32 %v1121_v5, %v825_v50  ;;  %v1182_v17 = vmul.f32 %v1181_v12, %v618_v29  ;;  %v1133_v27 = vadd.f32 %v1113_v42, %v1110_v21 }
 0x369   :  { %v753_v38 = vmul.f32 %v752_v1, %v2859_v25  ;;  %v1053_v14 = vmul.f32 %v1052_v11, %v825_v50  ;;  %v1064_v3 = vadd.f32 %v1044_v43, %v1041_v9  ;;  %v1260_v60 = vmul.f32 %v1259_v47, %v825_v50 }
 0x36a   :  { %v1680_v37 = vpop.eup %1679  ;;  %v1271_v5 = vadd.f32 %v1251_v0, %v1248_v61  ;;  %v1191_v56 = vmul.f32 %v1190_v19, %v825_v50  ;;  %v1320_v12 = vmul.f32 %v1319_v49, %v618_v29  ;;  %v1329_v7 = vmul.f32 %v1328_v57, %v825_v50 }
 0x36b   :  { %v890_v22 = vmul.f32 %v1680_v37, %v889_v48  ;;  %v755_v25 = vadd.f32 %v754_v31, %v753_v38  ;;  %v3178_v31 = vmax.f32 %v962_v40, 0.0  ;;  %v1339_v30 = vadd.f32 %v1314_v46, %v1311_v6 }
 0x36c   :  { %v3913_v44 = vstv %s3906_s22  ;;  %v3914_v47 = vstv %s3907_s19  ;;  %v1202_v55 = vadd.f32 %v1182_v17, %v1179_v58  ;;  %v3919_v53 = vstv %s3909_s21  ;;  %s3936_s19 = sld [smem:[#allocation134_spill]] }
 0x36d   :  { %v891_v45 = vmul.f32 %v890_v22, %v2864_v52  ;;  %v756_v48 = vmax.f32 %v755_v25, 0.0  ;;  %v3916_v52 = vstv %s3908_s5  ;;  %v1137_v19 = vadd.f32 %v1133_v27, %v1132_v26  ;;  %s1882_s5 = smov [#allocation22]  }
 0x36e   :  { %v3921_v49 = vstv %s3910_s11  ;;  %v3922_v61 = vstv %s3911_s30  ;;  %v1068_v62 = vadd.f32 %v1064_v3, %v1063_v4  ;;  %v1275_v1 = vadd.f32 %v1271_v5, %v1270_v59  ;;  %s1411_s21 = sshll.u32 %s1882_s5, 4  ;;  %s1412_s21 = int_to_ptr.vmem [resolvable:$true] %s1411_s21 }
 0x36f   :  { %v893_v23 = vadd.f32 %v3913_v44, %v891_v45  ;;  %v1119_v13 = vmul.f32 %v3914_v47, %v756_v48  ;;  %v1050_v21 = vmul.f32 %v3916_v52, %v756_v48  ;;  %v1257_v57 = vmul.f32 %v3921_v49, %v756_v48  ;;  %s1835_s11 = scalar_lea.vmem %s1412_s21, 128  ;;  %p1840_p0 = scmp.lt.s32.totalorder %s1412_s21, %s1412_s21 }
 0x370   :  { %v1682_v11 = vpop.eup %1681  ;;  %v1188_v29 = vmul.f32 %v1187_v2, %v756_v48  ;;  %v1128_v18 = vmul.f32 %v3922_v61, %v3178_v31  ;;  %v3923_v58 = vstv %s3912_s17  ;;  %v3925_v38 = vstv %s3915_s28  ;;  %p1836_p13 = scmp.ne.s32.totalorder %s1412_s21, %s1835_s11  ;;  %p1841_p1 = scmp.lt.s32.totalorder %s1835_s11, %s1835_s11 }
 0x371   :  { %v1028_v34 = vmul.f32 %v1682_v11, %v3919_v53  ;;  %v894_v9 = vmax.f32 %v893_v23, 0.0  ;;  %v1134_v42 = vadd.f32 %v1119_v13, %v1116_v10  ;;  %v1059_v43 = vmul.f32 %v3923_v58, %v3178_v31 }
 0x372   :  { %v1065_v26 = vadd.f32 %v1050_v21, %v1047_v8  ;;  %v3926_v0 = vstv %s3917_s6  ;;  %v3927_v37 = vstv %s3918_s10  ;;  %v3928_v22 = vstv %s3920_s0  ;;  %p1842_p2 = por %p1841_p1, %p1840_p0 }
 0x373   :  { %v1029_v50 = vmul.f32 %v1028_v34, %v2869_v63  ;;  %v1125_v40 = vmul.f32 %v3925_v38, %v894_v9  ;;  %v1056_v2 = vmul.f32 %v3926_v0, %v894_v9  ;;  %v1263_v6 = vmul.f32 %v3927_v37, %v894_v9 }
 0x374   :  { %v1194_v46 = vmul.f32 %v1193_v24, %v894_v9  ;;  %v1272_v59 = vadd.f32 %v1257_v57, %v1254_v15  ;;  %v1203_v63 = vadd.f32 %v1188_v29, %v1185_v20  ;;  %v1332_v10 = vmul.f32 %v1331_v54, %v894_v9  ;;  %p1843_p3 = pnand %p1842_p2, %p1836_p13 }
 0x375   :  { %v1031_v4 = vadd.f32 %v3928_v22, %v1029_v50  ;;  %v1135_v25 = vadd.f32 %v1125_v40, %v1122_v33  ;;  %v1066_v8 = vadd.f32 %v1056_v2, %v1053_v14  ;;  %v1273_v17 = vadd.f32 %v1263_v6, %v1260_v60 }
 0x376   :  { %v1204_v27 = vadd.f32 %v1194_v46, %v1191_v56  ;;  %v1266_v45 = vmul.f32 %v1265_v51, %v3178_v31  ;;  %v1326_v24 = vmul.f32 %v1325_v36, %v756_v48  ;;  %v1342_v5 = vadd.f32 %v1332_v10, %v1329_v7 }
 0x377   :  { %v1032_v3 = vmax.f32 %v1031_v4, 0.0  ;;  %v1138_v11 = vadd.f32 %v1135_v25, %v1134_v42  ;;  %v1069_v15 = vadd.f32 %v1066_v8, %v1065_v26  ;;  %v1276_v44 = vadd.f32 %v1273_v17, %v1272_v59 }
 0x378   :  { %v1207_v20 = vadd.f32 %v1204_v27, %v1203_v63  ;;  %v3932_v23 = vstv %s3929_s23  ;;  %v3933_v54 = vstv %s3930_s27  ;;  %v3934_v33 = vstv %s3931_s18 }
 0x379   :  { %v1131_v47 = vmul.f32 %v3932_v23, %v1032_v3  ;;  %v1062_v13 = vmul.f32 %v3933_v54, %v1032_v3  ;;  %v1269_v14 = vmul.f32 %v3934_v33, %v1032_v3  ;;  %v1200_v60 = vmul.f32 %v1199_v32, %v1032_v3 }
 0x37a   :  { %v1139_v56 = vadd.f32 %v1138_v11, %v1137_v19  ;;  %v1070_v52 = vadd.f32 %v1069_v15, %v1068_v62  ;;  %v3935_v51 = vstv %s3030_s29  ;;  %v1206_v36 = vadd.f32 %v1202_v55, %v3159_v35  ;;  %s1601_s29 = sld [smem:[#allocation17 + $0x2]] }
 0x37b   :  { %v1197_v21 = vmul.f32 %v3935_v51, %v3178_v31  ;;  %v1136_v48 = vadd.f32 %v1131_v47, %v1128_v18  ;;  %v1067_v7 = vadd.f32 %v1062_v13, %v1059_v43  ;;  %v1340_v53 = vadd.f32 %v1320_v12, %v3161_v41 }
 0x37c   :  { %v1341_v34 = vadd.f32 %v1326_v24, %v3163_v39  ;;  %v1274_v49 = vadd.f32 %v1269_v14, %v1266_v45  ;;  %v1277_v57 = vadd.f32 %v1276_v44, %v1275_v1  ;;  %v1208_v9 = vadd.f32 %v1207_v20, %v1206_v36 }
 0x37d   :  { %v1205_v29 = vadd.f32 %v1200_v60, %v1197_v21  ;;  %v1140_v61 = vadd.f32 %v1139_v56, %v1136_v48  ;;  %v1071_v32 = vadd.f32 %v1070_v52, %v1067_v7  ;;  %v1338_v19 = vmul.f32 %v1337_v28, %v1032_v3 }
 0x37e   :  { %v1345_v62 = vadd.f32 %v1342_v5, %v1341_v34  ;;  %v1335_v35 = vmul.f32 %v1334_v16, %v3178_v31  ;;  %v1344_v55 = vadd.f32 %v1340_v53, %v1339_v30  ;;  %v1278_v18 = vadd.f32 %v1277_v57, %v1274_v49 }
 0x37f   :  { %1143 = vadd.xlane.f32.xlu1 %v1140_v61  ;;  %1074 = vadd.xlane.f32.xlu0 %v1071_v32  ;;  %v1209_v50 = vadd.f32 %v1208_v9, %v1205_v29 }
 0x380   :  { %v1343_v41 = vadd.f32 %v1338_v19, %v1335_v35  ;;  %v1346_v12 = vadd.f32 %v1345_v62, %v1344_v55 }
 0x382   :  { %v1347_v39 = vadd.f32 %v1346_v12, %v1343_v41 }
 0x383   :  { %1281 = vadd.xlane.f32.xlu1 %v1278_v18  ;;  %1212 = vadd.xlane.f32.xlu0 %v1209_v50 }
 0x387   :  { %1350 = vadd.xlane.f32.xlu0 %v1347_v39 }
 0x408   :  { %v1144_v1 = vpop.xlane.xlu1 %1143  ;;  %v1075_v42 = vpop.xlane.xlu0 %1074 }
 0x409   :  { %v1145_v58 = vrot.slane %v1144_v1, 4  ;;  %v1076_v43 = vrot.slane %v1075_v42, 4 }
 0x40b   :  { %v1146_v28 = vadd.f32 %v1145_v58, %v1144_v1  ;;  %v1077_v26 = vadd.f32 %v1076_v43, %v1075_v42 }
 0x40c   :  { %v1282_v38 = vpop.xlane.xlu1 %1281  ;;  %v1213_v40 = vpop.xlane.xlu0 %1212 }
 0x40d   :  { %v1147_v0 = vrot.slane %v1146_v28, 2  ;;  %v1078_v2 = vrot.slane %v1077_v26, 2  ;;  %v1283_v16 = vrot.slane %v1282_v38, 4  ;;  %v1214_v31 = vrot.slane %v1213_v40, 4 }
 0x40f   :  { %v1148_v30 = vadd.f32 %v1147_v0, %v1146_v28  ;;  %v1079_v37 = vadd.f32 %v1078_v2, %v1077_v26  ;;  %v1284_v6 = vadd.f32 %v1283_v16, %v1282_v38  ;;  %v1215_v46 = vadd.f32 %v1214_v31, %v1213_v40 }
 0x410   :  { %v1351_v22 = vpop.xlane.xlu0 %1350 }
 0x411   :  { %v1149_v4 = vrot.slane %v1148_v30, 1  ;;  %v1080_v59 = vrot.slane %v1079_v37, 1  ;;  %v1285_v63 = vrot.slane %v1284_v6, 2  ;;  %v1216_v10 = vrot.slane %v1215_v46, 2 }
 0x412   :  { %v1352_v25 = vrot.slane %v1351_v22, 4 }
 0x413   :  { %v1150_v8 = vadd.f32 %v1149_v4, %v1148_v30  ;;  %v1081_v17 = vadd.f32 %v1080_v59, %v1079_v37  ;;  %v1286_v27 = vadd.f32 %v1285_v63, %v1284_v6  ;;  %v1217_v3 = vadd.f32 %v1216_v10, %v1215_v46 }
 0x414   :  { %v1353_v45 = vadd.f32 %v1352_v25, %v1351_v22 }
 0x415   :  { %v1287_v24 = vrot.slane %v1286_v27, 1  ;;  %v1218_v5 = vrot.slane %v1217_v3, 1  ;;  %v1151_v11 = vmul.f32 0.0009765625, %v1150_v8  ;;  %v1082_v15 = vmul.f32 0.0009765625, %v1081_v17 }
 0x416   :  { %v1354_v44 = vrot.slane %v1353_v45, 2 }
 0x417   :  { %v1288_v20 = vadd.f32 %v1287_v24, %v1286_v27  ;;  %v1219_v23 = vadd.f32 %v1218_v5, %v1217_v3  ;;  %v3239_v47 = vsub.f32 %v1140_v61, %v1151_v11  ;;  %v3241_v54 = vsub.f32 %v1071_v32, %v1082_v15 }
 0x418   :  { %v1355_v13 = vadd.f32 %v1354_v44, %v1353_v45  ;;  %v1096_v44 = vstv %s1072_s12 }
 0x419   :  { %v1153_v33 = vmul.f32 %v3239_v47, %v3239_v47  ;;  %v1084_v14 = vmul.f32 %v3241_v54, %v3241_v54  ;;  %v1289_v60 = vmul.f32 0.0009765625, %v1288_v20  ;;  %v1220_v56 = vmul.f32 0.0009765625, %v1219_v23 }
 0x41a   :  { %v1356_v52 = vrot.slane %v1355_v13, 1  ;;  %v1165_v20 = vstv %s1589_s13 }
 0x41b   :  { %1154 = vadd.xlane.f32.xlu0 %v1153_v33  ;;  %1085 = vadd.xlane.f32.xlu1 %v1084_v14  ;;  %v3247_v51 = vsub.f32 %v1278_v18, %v1289_v60  ;;  %v3249_v21 = vsub.f32 %v1209_v50, %v1220_v56  ;;  %v1099_v14 = vstv %s1073_s9  ;;  %v1234_v56 = vstv %s1601_s29 }
 0x41c   :  { %v1357_v36 = vadd.f32 %v1356_v52, %v1355_v13  ;;  %v1303_v52 = vstv %s3259_s26 }
 0x41d   :  { %v1291_v48 = vmul.f32 %v3247_v51, %v3247_v51  ;;  %v1222_v7 = vmul.f32 %v3249_v21, %v3249_v21 }
 0x41e   :  { %v1358_v53 = vmul.f32 0.0009765625, %v1357_v36 }
 0x41f   :  { %1292 = vadd.xlane.f32.xlu0 %v1291_v48  ;;  %1223 = vadd.xlane.f32.xlu1 %v1222_v7  ;;  %v1168_v48 = vstv %s1590_s3 }
 0x420   :  { %v3255_v34 = vsub.f32 %v1347_v39, %v1358_v53 }
 0x422   :  { %v1360_v49 = vmul.f32 %v3255_v34, %v3255_v34 }
 0x424   :  { %1361 = vadd.xlane.f32.xlu1 %v1360_v49 }
 0x4a4   :  { %v1086_v57 = vpop.xlane.xlu1 %1085  ;;  %v1155_v29 = vpop.xlane.xlu0 %1154 }
 0x4a5   :  { %v1087_v9 = vrot.slane %v1086_v57, 4  ;;  %v1156_v61 = vrot.slane %v1155_v29, 4 }
 0x4a7   :  { %v1088_v32 = vadd.f32 %v1087_v9, %v1086_v57  ;;  %v1157_v19 = vadd.f32 %v1156_v61, %v1155_v29 }
 0x4a8   :  { %v1224_v62 = vpop.xlane.xlu1 %1223  ;;  %v1293_v35 = vpop.xlane.xlu0 %1292 }
 0x4a9   :  { %v1089_v55 = vrot.slane %v1088_v32, 2  ;;  %v1158_v18 = vrot.slane %v1157_v19, 2  ;;  %v1225_v50 = vrot.slane %v1224_v62, 4  ;;  %v1294_v41 = vrot.slane %v1293_v35, 4 }
 0x4ab   :  { %v1090_v12 = vadd.f32 %v1089_v55, %v1088_v32  ;;  %v1159_v1 = vadd.f32 %v1158_v18, %v1157_v19  ;;  %v1226_v39 = vadd.f32 %v1225_v50, %v1224_v62  ;;  %v1295_v42 = vadd.f32 %v1294_v41, %v1293_v35 }
 0x4ac   :  { %v1237_v32 = vstv %s3261_s25  ;;  %v1372_v62 = vstv %s3265_s2  ;;  %v1379_v41 = vstv %s3269_s8 }
 0x4ad   :  { %v1091_v58 = vrot.slane %v1090_v12, 1  ;;  %v1160_v43 = vrot.slane %v1159_v1, 1  ;;  %v1227_v28 = vrot.slane %v1226_v39, 2  ;;  %v1296_v26 = vrot.slane %v1295_v42, 2  ;;  %v1362_v38 = vpop.xlane.xlu1 %1361 }
 0x4ae   :  { %v1363_v40 = vrot.slane %v1362_v38, 4 }
 0x4af   :  { %v1092_v0 = vadd.f32 %v1091_v58, %v1090_v12  ;;  %v1161_v2 = vadd.f32 %v1160_v43, %v1159_v1  ;;  %v1228_v16 = vadd.f32 %v1227_v28, %v1226_v39  ;;  %v1297_v31 = vadd.f32 %v1296_v26, %v1295_v42 }
 0x4b0   :  { %v1364_v30 = vadd.f32 %v1363_v40, %v1362_v38  ;;  %v1382_v12 = vstv %s3271_s4  ;;  %v1385_v42 = vstv %s3273_s1  ;;  %v1375_v43 = vstv %s3267_s20 }
 0x4b1   :  { %v1093_v37 = vmul.f32 0.0009765625, %v1092_v0  ;;  %v1162_v6 = vmul.f32 0.0009765625, %v1161_v2  ;;  %v1229_v46 = vrot.slane %v1228_v16, 1  ;;  %v1298_v22 = vrot.slane %v1297_v31, 1 }
 0x4b2   :  { %v1365_v4 = vrot.slane %v1364_v30, 2  ;;  %v1388_v28 = vstv %s3277_s24 }
 0x4b3   :  { %v1094_v59 = vadd.f32 1e-05, %v1093_v37  ;;  %v1163_v63 = vadd.f32 1e-05, %v1162_v6  ;;  %v1230_v10 = vadd.f32 %v1229_v46, %v1228_v16  ;;  %v1299_v25 = vadd.f32 %v1298_v22, %v1297_v31 }
 0x4b4   :  { %v1366_v8 = vadd.f32 %v1365_v4, %v1364_v30  ;;  %v1391_v31 = vstv %s1630_s15  ;;  %v1398_v22 = vstv %s3936_s19 }
 0x4b5   :  { %1683 = vrsqrt.f32 %v1094_v59  ;;  %v1231_v17 = vmul.f32 0.0009765625, %v1230_v10  ;;  %v1300_v27 = vmul.f32 0.0009765625, %v1299_v25 }
 0x4b6   :  { %1685 = vrsqrt.f32 %v1163_v63  ;;  %v1367_v3 = vrot.slane %v1366_v8, 1 }
 0x4b7   :  { %v1232_v45 = vadd.f32 1e-05, %v1231_v17  ;;  %v1301_v24 = vadd.f32 1e-05, %v1300_v27 }
 0x4b8   :  { %v1368_v5 = vadd.f32 %v1367_v3, %v1366_v8 }
 0x4b9   :  { %1687 = vrsqrt.f32 %v1232_v45 }
 0x4ba   :  { %1689 = vrsqrt.f32 %v1301_v24  ;;  %v1369_v11 = vmul.f32 0.0009765625, %v1368_v5 }
 0x4bc   :  { %v1370_v15 = vadd.f32 1e-05, %v1369_v11 }
 0x4be   :  { %1691 = vrsqrt.f32 %v1370_v15 }
 0x4c2   :  { %v1684_v23 = vpop.eup %1683 }
 0x4c3   :  { %v1686_v13 = vpop.eup %1685  ;;  %v1097_v33 = vmul.f32 %v1684_v23, %v1096_v44 }
 0x4c4   :  { %v1166_v60 = vmul.f32 %v1686_v13, %v1165_v20 }
 0x4c5   :  { %v1098_v36 = vmul.f32 %v1097_v33, %v3241_v54  ;;  %v1306_v54 = vstv %s3263_s16 }
 0x4c6   :  { %v1688_v7 = vpop.eup %1687  ;;  %v1167_v53 = vmul.f32 %v1166_v60, %v3239_v47 }
 0x4c7   :  { %v1690_v49 = vpop.eup %1689  ;;  %v1100_v57 = vadd.f32 %v1099_v14, %v1098_v36  ;;  %v1235_v29 = vmul.f32 %v1688_v7, %v1234_v56 }
 0x4c8   :  { %v1304_v9 = vmul.f32 %v1690_v49, %v1303_v52  ;;  %v1169_v61 = vadd.f32 %v1168_v48, %v1167_v53 }
 0x4c9   :  { %v1236_v19 = vmul.f32 %v1235_v29, %v3249_v21  ;;  %v1101_v35 = vmax.f32 %v1100_v57, 0.0 }
 0x4ca   :  { %v1170_v55 = vmax.f32 %v1169_v61, 0.0  ;;  %v1305_v47 = vmul.f32 %v1304_v9, %v3247_v51 }
 0x4cb   :  { %v1692_v18 = vpop.eup %1691  ;;  %v1238_v50 = vadd.f32 %v1237_v32, %v1236_v19  ;;  %v1380_v38 = vmul.f32 %v1379_v41, %v1101_v35 }
 0x4cc   :  { %v1307_v1 = vadd.f32 %v1306_v54, %v1305_v47  ;;  %v1373_v39 = vmul.f32 %v1692_v18, %v1372_v62  ;;  %v1383_v40 = vmul.f32 %v1382_v12, %v1170_v55 }
 0x4cd   :  { %v1239_v58 = vmax.f32 %v1238_v50, 0.0 }
 0x4ce   :  { %v1308_v26 = vmax.f32 %v1307_v1, 0.0  ;;  %v1374_v21 = vmul.f32 %v1373_v39, %v3255_v34  ;;  %v1393_v30 = vadd.f32 %v1383_v40, %v1380_v38 }
 0x4cf   :  { %v1386_v0 = vmul.f32 %v1385_v42, %v1239_v58 }
 0x4d0   :  { %v1376_v2 = vadd.f32 %v1375_v43, %v1374_v21  ;;  %v1389_v16 = vmul.f32 %v1388_v28, %v1308_v26 }
 0x4d2   :  { %v1377_v51 = vmax.f32 %v1376_v2, 0.0  ;;  %v1394_v37 = vadd.f32 %v1389_v16, %v1386_v0 }
 0x4d4   :  { %v1392_v6 = vmul.f32 %v1391_v31, %v1377_v51  ;;  %v1395_v46 = vadd.f32 %v1394_v37, %v1393_v30 }
 0x4d6   :  { %v1396_v4 = vadd.f32 %v1395_v46, %v1392_v6 }
 0x4d8   :  { %v1399_v59 = vadd.f32 %v1398_v22, %v1396_v4 }
 0x4da   :  { %v1400_v63 = vmul.f32 0.5, %v1399_v59 }
 0x4dc   :  { %1693 = vtanh.f32 %v1400_v63 }
 0x4e9   :  { %v1694_v34 = vpop.eup %1693 }
 0x4ea   :  { %v1402_v10 = vmul.f32 0.5, %v1694_v34 }
 0x4ec   :  { %v1403_v25 = vadd.f32 0.5, %v1402_v10 }
 0x4ee   :  { %1404 = vst [vmem:[#allocation22] sm:$0xff] %v1403_v25 }
 0x4ef   :  { %1846 = shalt.err (!%p1843_p3)
}
 0x4f0   :  { %s3937_s28 = sld [smem:[#allocation135_spill]] }
 0x4f6   :  { %1414 = dma.vmem_to_hbm [thread:$0]  %s1412_s21, 128, %s3937_s28, [#allocation5]  }
 0x4f7   :  { %1869 = dma.done.wait [#allocation5], 128  }
 0x4f8   :  { %1870 = vsyncadd [#allocation5], 4294967168 }
 0x4f9   :  { %1418 = vsyncpa [#allocation4], 1 }
 0x4fa   :  { %1419 = vsyncpa [#allocation5], 1 }
 0x4fb   :  { %1420 = vsyncpa [#allocation6], 1 }
 0x4fc   :  { %1421 = vsyncpa [#allocation9], 1 }
 0x4fd   :  { %1422 = vsyncpa [#allocation12], 1 }
 0x4fe   :  { %1423 = vsyncpa [#allocation15], 1 }
 0x4ff   :  { %1424 = vsyncpa [#allocation18], 1 }
 0x500   :  { %1425 = vsyncpa [#allocation21], 1 }

</bundles_post_ra>
